<compile_context>
chip_gen: v6e
topology: v6e:2x2x1
jax: 0.10.0
libtpu: 0.0.40
codegen_flags: <defaults>
</compile_context>

<pallas_src>
import functools

import jax
import jax.numpy as jnp
from jax import lax
from jax.experimental import pallas as pl
from jax.experimental.pallas import tpu as pltpu


def _round_up(x, m):
    return ((x + m - 1) // m) * m


# ---------------------------------------------------------------------------
# Single fused kernel: the whole forward pass
# ---------------------------------------------------------------------------
def fused_forward_kernel(
    # data
    x_ref, adj_ref, batch_row_ref, batch_col_ref,
    # input proj + layer norm
    in_w_ref, in_b_ref, ln_g_ref, ln_b_ref,
    # fused Bi-GRU stack (layer-stacked, gate-interleaved [r_f r_b | z_f z_b | n_f n_b])
    gru_wih_ref, gru_bih_ref, gru_whh_ref, gru_bhh_ref,
    # shared SwiGLU (W1 | W2)
    sw_w_ref, sw_b_ref,
    # GGNN stack (message Linear folded in; gate matmuls merged into one block-diag weight)
    gg_blk_ref, gg_bih_ref, gg_bhh_ref, gg_bfold_ref,
    # output proj
    out_w_ref, out_b_ref,
    # output
    o_ref,
    # scratch
    xg_scr, gru_out,
):
    f32 = jnp.float32
    bf16 = jnp.bfloat16

    N = x_ref.shape[0]
    H = ln_g_ref.shape[-1]                  # hidden_dim
    Hh = H // 2                             # per-direction GRU width
    G6 = 6 * Hh                             # fused gate width (both directions)
    GP = gru_wih_ref.shape[-1] // 2         # lane-padded per-direction gate block (>= G6)
    H3 = 3 * H
    GGP = gg_blk_ref.shape[-1] // 2         # lane-padded GGNN gate block (>= 3H)
    L_GRU = gru_wih_ref.shape[0]
    L_GGNN = gg_blk_ref.shape[0]
    G = o_ref.shape[0]                      # num_graphs

    # ---- input projection (+ Dropout(0.2) == identity at inference) + LayerNorm(eps=1e-6) ----
    h = jnp.dot(x_ref[...].astype(bf16), in_w_ref[...], preferred_element_type=f32) + in_b_ref[...]
    mu = jnp.mean(h, axis=-1, keepdims=True)
    var = jnp.mean(jnp.square(h - mu), axis=-1, keepdims=True)
    h = (h - mu) * lax.rsqrt(var + 1e-6) * ln_g_ref[...] + ln_b_ref[...]

    sw_w = sw_w_ref[...]                    # [H, 2H] bf16 (W1 | W2)
    sw_b = sw_b_ref[...]                    # [1, 2H]

    # ---- Bi-GRU stack: fwd+bwd fused into one recurrence; fully in-kernel, statically unrolled ----
    for l in range(L_GRU):
        h_bf = h.astype(bf16)               # hoisted cast (reused by GRU + SwiGLU matmuls)
        # Input-gate preactivations for BOTH directions in one matmul.
        # Columns [0:G6]        = fwd contribution in interleaved gate slots (bwd slots zero)
        # Columns [GP:GP+G6]    = bwd contribution in interleaved gate slots (fwd slots zero)
        xg_scr[...] = (jnp.dot(h_bf, gru_wih_ref[l], preferred_element_type=f32)
                       + gru_bih_ref[l])

        whh = gru_whh_ref[l]                # [2*Hh, 6*Hh] bf16 block-diagonal
        bhh = gru_bhh_ref[l]                # [1, 6*Hh]
        s = jnp.zeros((1, 2 * Hh), f32)     # fused state: [fwd | bwd]

        # TODO(synk): switch to lax.fori_loop carrying `s` once N grows beyond ~16.
        for t in range(N):
            tb = N - 1 - t
            # combine fwd step-t and bwd step-(N-1-t) input gates (row slices; cheap adds)
            xg_t = xg_scr[t:t + 1, 0:G6] + xg_scr[tb:tb + 1, GP:GP + G6]
            # single bf16 MXU pass on the serial chain; f32 accumulation
            hg = jnp.dot(s.astype(bf16), whh, preferred_element_type=f32) + bhh
            r = jax.nn.sigmoid(xg_t[:, 0:2 * Hh] + hg[:, 0:2 * Hh])
            z = jax.nn.sigmoid(xg_t[:, 2 * Hh:4 * Hh] + hg[:, 2 * Hh:4 * Hh])
            n = jnp.tanh(xg_t[:, 4 * Hh:6 * Hh] + r * hg[:, 4 * Hh:6 * Hh])
            s = (1.0 - z) * n + z * s
            # scatter into the layer output scratch (masked row stores, no concatenates)
            gru_out[t:t + 1, 0:Hh] = s[:, 0:Hh]          # forward state -> node t
            gru_out[tb:tb + 1, Hh:H] = s[:, Hh:2 * Hh]   # backward state -> node N-1-t
        h = gru_out[...]

        # shared SwiGLU: one [N,H]@[H,2H] matmul, split, gate (silu(a) * g)
        ag = jnp.dot(h.astype(bf16), sw_w, preferred_element_type=f32) + sw_b
        a, g = ag[:, :H], ag[:, H:]
        h = (a * jax.nn.sigmoid(a)) * g

    # ---- GGNN propagation layers (message Linear folded, gate matmuls merged) ----
    adj = adj_ref[...]                      # [N, N] f32, VMEM-resident across all layers
    adj_bf = adj.astype(bf16)
    deg = jnp.sum(adj, axis=1, keepdims=True)   # [N, 1] weighted in-degree (for folded bias)
    for l in range(L_GGNN):
        h_bf = h.astype(bf16)
        agg = jnp.dot(adj_bf, h_bf, preferred_element_type=f32)       # adj @ h
        cat = jnp.concatenate([agg.astype(bf16), h_bf], axis=1)       # [N, 2H]
        gates = jnp.dot(cat, gg_blk_ref[l], preferred_element_type=f32)
        xg = gates[:, 0:H3] + deg * gg_bfold_ref[l] + gg_bih_ref[l]   # (adj@h)(Wm Wih)+deg(bm Wih)+bih
        hg = gates[:, GGP:GGP + H3] + gg_bhh_ref[l]                   # h @ W_hh + bhh
        r = jax.nn.sigmoid(xg[:, 0:H] + hg[:, 0:H])
        z = jax.nn.sigmoid(xg[:, H:2 * H] + hg[:, H:2 * H])
        n = jnp.tanh(xg[:, 2 * H:H3] + r * hg[:, 2 * H:H3])
        h = (1.0 - z) * n + z * h

    # ---- readout: [mean-pool ; max-pool] per graph (masks built in-kernel from batch vector) ----
    batch_row = batch_row_ref[...]                                    # [1, N] int32
    batch_col = batch_col_ref[...]                                    # [N, 1] int32
    mask = (lax.broadcasted_iota(jnp.int32, (G, N), 0) == batch_row).astype(f32)   # [G, N]
    maskT = (lax.broadcasted_iota(jnp.int32, (N, G), 1) == batch_col).astype(f32)  # [N, G]
    count = jnp.sum(mask, axis=1, keepdims=True)                      # [G, 1]
    invc = 1.0 / jnp.maximum(count, 1.0)
    mean = jnp.dot(mask, h, preferred_element_type=f32) * invc        # [G, H]

    mx_rows = []
    for gi in range(G):
        mg = maskT[:, gi:gi + 1]                                      # [N, 1]
        mx_rows.append(jnp.max(h + (mg - 1.0) * 1e30, axis=0, keepdims=True))
    mx = jnp.concatenate(mx_rows, axis=0)                             # [G, H]
    mx = jnp.where(count > 0.0, mx, 0.0)                              # empty graphs -> 0, stay benign
    pooled = jnp.concatenate([mean, mx], axis=1)                      # [G, 2H]

    o_ref[...] = (jnp.dot(pooled.astype(bf16), out_w_ref[...], preferred_element_type=f32)
                  + out_b_ref[...]).astype(o_ref.dtype)


# ---------------------------------------------------------------------------
# Forward wrapper: edge-list -> dense adjacency (JAX scatter-add) + one pallas_call
# ---------------------------------------------------------------------------
def sentence_graph_forward(prep, x, edge_index, edge_weight, batch, num_graphs):
    N = x.shape[0]
    H = prep["ln_g"].shape[-1]
    out_dim = prep["out_w"].shape[-1]
    GP = prep["gru_wih"].shape[-1] // 2

    src, dst = edge_index[0], edge_index[1]
    # TODO(synk): at realistic N replace this dense scatter-add with an in-kernel scalar-prefetch
    #             edge-list segment-sum and HBM-tiled adjacency panels (v7x VMEM = 64 MiB).
    adj = jnp.zeros((N, N), jnp.float32).at[dst, src].add(edge_weight)
    batch_row = batch.astype(jnp.int32)[None, :]
    batch_col = batch.astype(jnp.int32)[:, None]

    args = (
        x, adj, batch_row, batch_col,
        prep["in_w"], prep["in_b"], prep["ln_g"], prep["ln_b"],
        prep["gru_wih"], prep["gru_bih"], prep["gru_whh"], prep["gru_bhh"],
        prep["sw_w"], prep["sw_b"],
        prep["gg_blk"], prep["gg_bih"], prep["gg_bhh"], prep["gg_bfold"],
        prep["out_w"], prep["out_b"],
    )
    vmem = pl.BlockSpec(memory_space=pltpu.MemorySpace.VMEM)
    return pl.pallas_call(
        fused_forward_kernel,
        out_shape=jax.ShapeDtypeStruct((num_graphs, out_dim), jnp.float32),
        in_specs=[vmem] * len(args),
        out_specs=vmem,
        scratch_shapes=[
            pltpu.VMEM((N, 2 * GP), jnp.float32),   # fused-direction input-gate preactivations
            pltpu.VMEM((N, H), jnp.float32),        # per-layer Bi-GRU output rows
        ],
        compiler_params=pltpu.CompilerParams(vmem_limit_bytes=32 * 1024 * 1024),
    )(*args)


# ---------------------------------------------------------------------------
# One-time parameter transform: transpose to [din, dout], interleave/fuse GRU directions,
# block-diagonalize recurrent & GGNN gate weights, fold GGNN message Linear, stack layers,
# cast all MXU weights to bf16.
# ---------------------------------------------------------------------------
def prepare_params(p):
    bf16 = jnp.bfloat16
    H = p["ln_g"].shape[0]
    Hh = H // 2
    GP = _round_up(6 * Hh, 128)     # lane-padded per-direction gate block (fwd @ 0, bwd @ GP)
    GGP = _round_up(3 * H, 128)     # lane-padded GGNN gate block (xg @ 0, hg @ GGP)

    prep = {
        "in_w": p["in_w"].T.astype(bf16),
        "in_b": p["in_b"][None, :],
        "ln_g": p["ln_g"][None, :],
        "ln_b": p["ln_b"][None, :],
        "sw_w": jnp.concatenate([p["swiglu"]["w1"].T, p["swiglu"]["w2"].T], axis=1).astype(bf16),
        "sw_b": jnp.concatenate([p["swiglu"]["b1"], p["swiglu"]["b2"]])[None, :],
        "out_w": p["out_w"].T.astype(bf16),
        "out_b": p["out_b"][None, :],
    }

    # --- Bi-GRU: fuse directions. Interleaved gate layout: [r_f r_b | z_f z_b | n_f n_b]. ---
    wih_l, bih_l, whh_l, bhh_l = [], [], [], []
    for gp in p["bigru"]:
        wih = jnp.zeros((H, 2 * GP), jnp.float32)
        bih = jnp.zeros((1, 2 * GP), jnp.float32)
        whh = jnp.zeros((2 * Hh, 6 * Hh), jnp.float32)     # block-diag over directions
        bhh = jnp.zeros((1, 6 * Hh), jnp.float32)
        wf, wb = gp["w_ih_f"].T, gp["w_ih_b"].T            # [H, 3*Hh]
        hf, hb = gp["w_hh_f"].T, gp["w_hh_b"].T            # [Hh, 3*Hh]
        for g in range(3):                                 # PyTorch gate order r, z, n
            o = g * 2 * Hh
            gs = slice(g * Hh, (g + 1) * Hh)
            wih = wih.at[:, o:o + Hh].set(wf[:, gs])
            wih = wih.at[:, GP + o + Hh:GP + o + 2 * Hh].set(wb[:, gs])
            bih = bih.at[0, o:o + Hh].set(gp["b_ih_f"][gs])
            bih = bih.at[0, GP + o + Hh:GP + o + 2 * Hh].set(gp["b_ih_b"][gs])
            whh = whh.at[:Hh, o:o + Hh].set(hf[:, gs])
            whh = whh.at[Hh:, o + Hh:o + 2 * Hh].set(hb[:, gs])
            bhh = bhh.at[0, o:o + Hh].set(gp["b_hh_f"][gs])
            bhh = bhh.at[0, o + Hh:o + 2 * Hh].set(gp["b_hh_b"][gs])
        wih_l.append(wih); bih_l.append(bih); whh_l.append(whh); bhh_l.append(bhh)
    prep["gru_wih"] = jnp.stack(wih_l).astype(bf16)    # [L, H, 2*GP]
    prep["gru_bih"] = jnp.stack(bih_l)                 # [L, 1, 2*GP]
    prep["gru_whh"] = jnp.stack(whh_l).astype(bf16)    # [L, 2*Hh, 6*Hh]  (bf16 recurrence, f32 acc)
    prep["gru_bhh"] = jnp.stack(bhh_l)                 # [L, 1, 6*Hh]

    # --- GGNN: fold message Linear into cell W_ih, merge gate matmuls into one block-diag. ---
    blk_l, bih2_l, bhh2_l, bfold_l = [], [], [], []
    for gp in p["ggnn"]:
        w_m = gp["msg"]["w"].T                 # [H, H]
        b_m = gp["msg"]["b"][None, :]          # [1, H]
        w_ih = gp["cell"]["w_ih"].T            # [H, 3H]
        w_hh = gp["cell"]["w_hh"].T            # [H, 3H]
        w_fold = w_m @ w_ih                    # (adj@h) @ (Wm Wih)
        b_fold = b_m @ w_ih                    # deg * (bm Wih)
        blk = jnp.zeros((2 * H, 2 * GGP), jnp.float32)
        blk = blk.at[:H, :3 * H].set(w_fold)
        blk = blk.at[H:, GGP:GGP + 3 * H].set(w_hh)
        blk_l.append(blk)
        bih2_l.append(gp["cell"]["b_ih"][None, :])
        bhh2_l.append(gp["cell"]["b_hh"][None, :])
        bfold_l.append(b_fold)
    prep["gg_blk"] = jnp.stack(blk_l).astype(bf16)     # [L, 2H, 2*GGP]
    prep["gg_bih"] = jnp.stack(bih2_l)                 # [L, 1, 3H]
    prep["gg_bhh"] = jnp.stack(bhh2_l)                 # [L, 1, 3H]
    prep["gg_bfold"] = jnp.stack(bfold_l)              # [L, 1, 3H]
    return prep


# ---------------------------------------------------------------------------
# Deterministic parameter init (PyTorch-style uniform(-1/sqrt(fan_in), ...)), torch layouts
# ---------------------------------------------------------------------------
def init_params(key, input_dim, hidden_dim, output_dim, num_layers=3):
    Hh = hidden_dim // 2
    keys = iter(jax.random.split(key, 256))

    def unif(shape, bound):
        return jax.random.uniform(next(keys), shape, jnp.float32, -bound, bound)

    def linear(din, dout):
        b = 1.0 / (din ** 0.5)
        return unif((dout, din), b), unif((dout,), b)

    params = {}
    params["in_w"], params["in_b"] = linear(input_dim, hidden_dim)
    params["ln_g"] = jnp.ones((hidden_dim,), jnp.float32)
    params["ln_b"] = jnp.zeros((hidden_dim,), jnp.float32)

    params["bigru"] = []
    for _ in range(num_layers):
        bnd = 1.0 / (Hh ** 0.5)
        params["bigru"].append({
            "w_ih_f": unif((3 * Hh, hidden_dim), bnd), "w_hh_f": unif((3 * Hh, Hh), bnd),
            "b_ih_f": unif((3 * Hh,), bnd),            "b_hh_f": unif((3 * Hh,), bnd),
            "w_ih_b": unif((3 * Hh, hidden_dim), bnd), "w_hh_b": unif((3 * Hh, Hh), bnd),
            "b_ih_b": unif((3 * Hh,), bnd),            "b_hh_b": unif((3 * Hh,), bnd),
        })

    w1, b1 = linear(hidden_dim, hidden_dim)
    w2, b2 = linear(hidden_dim, hidden_dim)
    params["swiglu"] = {"w1": w1, "b1": b1, "w2": w2, "b2": b2}

    params["ggnn"] = []
    for _ in range(num_layers):
        mw, mb = linear(hidden_dim, hidden_dim)
        bnd = 1.0 / (hidden_dim ** 0.5)
        params["ggnn"].append({
            "msg": {"w": mw, "b": mb},
            "cell": {
                "w_ih": unif((3 * hidden_dim, hidden_dim), bnd),
                "w_hh": unif((3 * hidden_dim, hidden_dim), bnd),
                "b_ih": unif((3 * hidden_dim,), bnd),
                "b_hh": unif((3 * hidden_dim,), bnd),
            },
        })

    params["out_w"], params["out_b"] = linear(2 * hidden_dim, output_dim)
    return params


# ---------------------------------------------------------------------------
if __name__ == "__main__":
    INPUT_DIM, HIDDEN_DIM, OUTPUT_DIM = 16, 32, 8
    N_SENT, N_EDGES, N_GRAPHS = 8, 16, 2

    key = jax.random.PRNGKey(0)
    k_param, k_x, k_src, k_dst, k_w = jax.random.split(key, 5)

    params = init_params(k_param, INPUT_DIM, HIDDEN_DIM, OUTPUT_DIM, num_layers=3)
    prep = prepare_params(params)   # one-time transform (transpose / fuse / block-diag / bf16)

    x = jax.random.normal(k_x, (N_SENT, INPUT_DIM), jnp.float32)
    edge_index = jnp.stack([
        jax.random.randint(k_src, (N_EDGES,), 0, N_SENT),
        jax.random.randint(k_dst, (N_EDGES,), 0, N_SENT),
    ]).astype(jnp.int32)
    edge_weight = jax.random.uniform(k_w, (N_EDGES,), jnp.float32)
    batch = jnp.array([0, 0, 0, 0, 1, 1, 1, 1], jnp.int32)

    fwd = jax.jit(functools.partial(sentence_graph_forward, num_graphs=N_GRAPHS))
    out = jax.block_until_ready(fwd(prep, x, edge_index, edge_weight, batch))

    assert out.shape == (N_GRAPHS, OUTPUT_DIM), out.shape
    assert bool(jnp.all(jnp.isfinite(out)))
    print("KERNEL_OK")
</pallas_src>

<mosaic_0001>
module attributes {stable_mosaic.version = 11 : i64} {
  func.func private @main(%arg0: i32) attributes {dimension_semantics = [#tpu.dimension_semantics<core_parallel>], iteration_bounds = array<i64: 2>, tpu.core_type = #tpu.core_type<sc_scalar_subcore>, window_params = []} {
    return
  }
}

module attributes {stable_mosaic.version = 11 : i64} {
  func.func private @main(%arg0: i32) attributes {dimension_semantics = [#tpu.dimension_semantics<core_parallel>], iteration_bounds = array<i64: 2>, tpu.core_type = #tpu.core_type<sc_scalar_subcore>, window_params = []} {
    return
  }
}

module attributes {stable_mosaic.version = 11 : i64} {
  func.func @fused_forward_kernel(%arg0: memref<8x16xf32, #tpu.memory_space<vmem>>, %arg1: memref<8x8xf32, #tpu.memory_space<vmem>>, %arg2: memref<1x8xi32, #tpu.memory_space<vmem>>, %arg3: memref<8x1xi32, #tpu.memory_space<vmem>>, %arg4: memref<16x32xbf16, #tpu.memory_space<vmem>>, %arg5: memref<1x32xf32, #tpu.memory_space<vmem>>, %arg6: memref<1x32xf32, #tpu.memory_space<vmem>>, %arg7: memref<1x32xf32, #tpu.memory_space<vmem>>, %arg8: memref<3x32x256xbf16, #tpu.memory_space<vmem>>, %arg9: memref<3x1x256xf32, #tpu.memory_space<vmem>>, %arg10: memref<3x32x96xbf16, #tpu.memory_space<vmem>>, %arg11: memref<3x1x96xf32, #tpu.memory_space<vmem>>, %arg12: memref<32x64xbf16, #tpu.memory_space<vmem>>, %arg13: memref<1x64xf32, #tpu.memory_space<vmem>>, %arg14: memref<3x64x256xbf16, #tpu.memory_space<vmem>>, %arg15: memref<3x1x96xf32, #tpu.memory_space<vmem>>, %arg16: memref<3x1x96xf32, #tpu.memory_space<vmem>>, %arg17: memref<3x1x96xf32, #tpu.memory_space<vmem>>, %arg18: memref<64x8xbf16, #tpu.memory_space<vmem>>, %arg19: memref<1x8xf32, #tpu.memory_space<vmem>>, %arg20: memref<2x8xf32, #tpu.memory_space<vmem>>, %arg21: memref<8x256xf32, #tpu.memory_space<vmem>>, %arg22: memref<8x32xf32, #tpu.memory_space<vmem>>) attributes {dimension_semantics = [], scalar_prefetch = 0 : i64, scratch_operands = 2 : i64, tpu.core_type = #tpu.core_type<tc>} {
    %c0 = arith.constant 0 : index
    %c0_0 = arith.constant 0 : index
    %0 = vector.load %arg0[%c0, %c0_0] : memref<8x16xf32, #tpu.memory_space<vmem>>, vector<8x16xf32>
    %1 = arith.truncf %0 : vector<8x16xf32> to vector<8x16xbf16>
    %c0_1 = arith.constant 0 : index
    %c0_2 = arith.constant 0 : index
    %2 = vector.load %arg4[%c0_1, %c0_2] : memref<16x32xbf16, #tpu.memory_space<vmem>>, vector<16x32xbf16>
    %cst = arith.constant dense<0.000000e+00> : vector<8x32xf32>
    %3 = tpu.matmul %1, %2, %cst {dimension_numbers = #tpu.dot_dimension_numbers<[1], [0], [0], [1], [0, 0, 1, 1], [], []>} : vector<8x16xbf16>, vector<16x32xbf16>, vector<8x32xf32> -> vector<8x32xf32>
    %c0_3 = arith.constant 0 : index
    %c0_4 = arith.constant 0 : index
    %4 = vector.load %arg5[%c0_3, %c0_4] : memref<1x32xf32, #tpu.memory_space<vmem>>, vector<1x32xf32>
    %5 = vector.broadcast %4 : vector<1x32xf32> to vector<8x32xf32>
    %6 = arith.addf %3, %5 : vector<8x32xf32>
    %cst_5 = arith.constant dense<0.000000e+00> : vector<8xf32>
    %7 = vector.multi_reduction <add>, %6, %cst_5 [1] : vector<8x32xf32> to vector<8xf32>
    %8 = vector.shape_cast %7 : vector<8xf32> to vector<8x1xf32>
    %cst_6 = arith.constant 3.200000e+01 : f32
    %9 = vector.broadcast %cst_6 : f32 to vector<8x1xf32>
    %10 = arith.divf %8, %9 : vector<8x1xf32>
    %11 = vector.broadcast %10 : vector<8x1xf32> to vector<8x32xf32>
    %12 = arith.subf %6, %11 : vector<8x32xf32>
    %13 = arith.mulf %12, %12 : vector<8x32xf32>
    %cst_7 = arith.constant dense<0.000000e+00> : vector<8xf32>
    %14 = vector.multi_reduction <add>, %13, %cst_7 [1] : vector<8x32xf32> to vector<8xf32>
    %15 = vector.shape_cast %14 : vector<8xf32> to vector<8x1xf32>
    %cst_8 = arith.constant 3.200000e+01 : f32
    %16 = vector.broadcast %cst_8 : f32 to vector<8x1xf32>
    %17 = arith.divf %15, %16 : vector<8x1xf32>
    %18 = vector.broadcast %10 : vector<8x1xf32> to vector<8x32xf32>
    %19 = arith.subf %6, %18 : vector<8x32xf32>
    %cst_9 = arith.constant 9.99999997E-7 : f32
    %20 = vector.broadcast %cst_9 : f32 to vector<8x1xf32>
    %21 = arith.addf %17, %20 : vector<8x1xf32>
    %22 = math.rsqrt %21 : vector<8x1xf32>
    %23 = vector.broadcast %22 : vector<8x1xf32> to vector<8x32xf32>
    %24 = arith.mulf %19, %23 : vector<8x32xf32>
    %c0_10 = arith.constant 0 : index
    %c0_11 = arith.constant 0 : index
    %25 = vector.load %arg6[%c0_10, %c0_11] : memref<1x32xf32, #tpu.memory_space<vmem>>, vector<1x32xf32>
    %26 = vector.broadcast %25 : vector<1x32xf32> to vector<8x32xf32>
    %27 = arith.mulf %24, %26 : vector<8x32xf32>
    %c0_12 = arith.constant 0 : index
    %c0_13 = arith.constant 0 : index
    %28 = vector.load %arg7[%c0_12, %c0_13] : memref<1x32xf32, #tpu.memory_space<vmem>>, vector<1x32xf32>
    %29 = vector.broadcast %28 : vector<1x32xf32> to vector<8x32xf32>
    %30 = arith.addf %27, %29 : vector<8x32xf32>
    %c0_14 = arith.constant 0 : index
    %c0_15 = arith.constant 0 : index
    %31 = vector.load %arg12[%c0_14, %c0_15] : memref<32x64xbf16, #tpu.memory_space<vmem>>, vector<32x64xbf16>
    %c0_16 = arith.constant 0 : index
    %c0_17 = arith.constant 0 : index
    %32 = vector.load %arg13[%c0_16, %c0_17] : memref<1x64xf32, #tpu.memory_space<vmem>>, vector<1x64xf32>
    %33 = arith.truncf %30 : vector<8x32xf32> to vector<8x32xbf16>
    %c0_18 = arith.constant 0 : index
    %c0_19 = arith.constant 0 : index
    %c0_20 = arith.constant 0 : index
    %34 = vector.load %arg8[%c0_18, %c0_19, %c0_20] : memref<3x32x256xbf16, #tpu.memory_space<vmem>>, vector<1x32x256xbf16>
    %35 = vector.shape_cast %34 : vector<1x32x256xbf16> to vector<32x256xbf16>
    %cst_21 = arith.constant dense<0.000000e+00> : vector<8x256xf32>
    %36 = tpu.matmul %33, %35, %cst_21 {dimension_numbers = #tpu.dot_dimension_numbers<[1], [0], [0], [1], [0, 0, 1, 1], [], []>} : vector<8x32xbf16>, vector<32x256xbf16>, vector<8x256xf32> -> vector<8x256xf32>
    %c0_22 = arith.constant 0 : index
    %c0_23 = arith.constant 0 : index
    %c0_24 = arith.constant 0 : index
    %37 = vector.load %arg9[%c0_22, %c0_23, %c0_24] : memref<3x1x256xf32, #tpu.memory_space<vmem>>, vector<1x1x256xf32>
    %38 = vector.shape_cast %37 : vector<1x1x256xf32> to vector<1x256xf32>
    %39 = vector.broadcast %38 : vector<1x256xf32> to vector<8x256xf32>
    %40 = arith.addf %36, %39 : vector<8x256xf32>
    %c0_25 = arith.constant 0 : index
    %c0_26 = arith.constant 0 : index
    %41 = vector.load %arg21[%c0_25, %c0_26] : memref<8x256xf32, #tpu.memory_space<vmem>>, vector<8x256xf32>
    tpu.vector_store %arg21[%c0_25, %c0_26], %40 {strides = array<i32>} : memref<8x256xf32, #tpu.memory_space<vmem>>, vector<8x256xf32>,
    %c0_27 = arith.constant 0 : index
    %c0_28 = arith.constant 0 : index
    %c0_29 = arith.constant 0 : index
    %42 = vector.load %arg10[%c0_27, %c0_28, %c0_29] : memref<3x32x96xbf16, #tpu.memory_space<vmem>>, vector<1x32x96xbf16>
    %43 = vector.shape_cast %42 : vector<1x32x96xbf16> to vector<32x96xbf16>
    %c0_30 = arith.constant 0 : index
    %c0_31 = arith.constant 0 : index
    %c0_32 = arith.constant 0 : index
    %44 = vector.load %arg11[%c0_30, %c0_31, %c0_32] : memref<3x1x96xf32, #tpu.memory_space<vmem>>, vector<1x1x96xf32>
    %45 = vector.shape_cast %44 : vector<1x1x96xf32> to vector<1x96xf32>
    %cst_33 = arith.constant 0.000000e+00 : f32
    %46 = vector.broadcast %cst_33 : f32 to vector<1x32xf32>
    %c0_34 = arith.constant 0 : index
    %c0_35 = arith.constant 0 : index
    %47 = vector.load %arg21[%c0_34, %c0_35] : memref<8x256xf32, #tpu.memory_space<vmem>>, vector<1x96xf32>
    %c7 = arith.constant 7 : index
    %c128 = arith.constant 128 : index
    %48 = vector.load %arg21[%c7, %c128] : memref<8x256xf32, #tpu.memory_space<vmem>>, vector<1x96xf32>
    %49 = arith.addf %47, %48 : vector<1x96xf32>
    %50 = arith.truncf %46 : vector<1x32xf32> to vector<1x32xbf16>
    %cst_36 = arith.constant dense<0.000000e+00> : vector<1x96xf32>
    %51 = tpu.matmul %50, %43, %cst_36 {dimension_numbers = #tpu.dot_dimension_numbers<[1], [0], [0], [1], [0, 0, 1, 1], [], []>} : vector<1x32xbf16>, vector<32x96xbf16>, vector<1x96xf32> -> vector<1x96xf32>
    %52 = arith.addf %51, %45 : vector<1x96xf32>
    %53 = vector.extract_strided_slice %49 {offsets = [0, 0], sizes = [1, 32], strides = [1, 1]} : vector<1x96xf32> to vector<1x32xf32>
    %54 = vector.extract_strided_slice %52 {offsets = [0, 0], sizes = [1, 32], strides = [1, 1]} : vector<1x96xf32> to vector<1x32xf32>
    %55 = arith.addf %53, %54 : vector<1x32xf32>
    %56 = arith.negf %55 : vector<1x32xf32>
    %57 = math.exp %56 : vector<1x32xf32>
    %cst_37 = arith.constant 1.000000e+00 : f32
    %58 = vector.broadcast %cst_37 : f32 to vector<1x32xf32>
    %59 = arith.addf %58, %57 : vector<1x32xf32>
    %60 = arith.divf %58, %59 : vector<1x32xf32>
    %61 = vector.extract_strided_slice %49 {offsets = [0, 32], sizes = [1, 32], strides = [1, 1]} : vector<1x96xf32> to vector<1x32xf32>
    %62 = vector.extract_strided_slice %52 {offsets = [0, 32], sizes = [1, 32], strides = [1, 1]} : vector<1x96xf32> to vector<1x32xf32>
    %63 = arith.addf %61, %62 : vector<1x32xf32>
    %64 = arith.negf %63 : vector<1x32xf32>
    %65 = math.exp %64 : vector<1x32xf32>
    %cst_38 = arith.constant 1.000000e+00 : f32
    %66 = vector.broadcast %cst_38 : f32 to vector<1x32xf32>
    %67 = arith.addf %66, %65 : vector<1x32xf32>
    %68 = arith.divf %66, %67 : vector<1x32xf32>
    %69 = vector.extract_strided_slice %49 {offsets = [0, 64], sizes = [1, 32], strides = [1, 1]} : vector<1x96xf32> to vector<1x32xf32>
    %70 = vector.extract_strided_slice %52 {offsets = [0, 64], sizes = [1, 32], strides = [1, 1]} : vector<1x96xf32> to vector<1x32xf32>
    %71 = arith.mulf %60, %70 : vector<1x32xf32>
    %72 = arith.addf %69, %71 : vector<1x32xf32>
    %73 = math.tanh %72 : vector<1x32xf32>
    %cst_39 = arith.constant 1.000000e+00 : f32
    %74 = vector.broadcast %cst_39 : f32 to vector<1x32xf32>
    %75 = arith.subf %74, %68 : vector<1x32xf32>
    %76 = arith.mulf %75, %73 : vector<1x32xf32>
    %77 = arith.mulf %68, %46 : vector<1x32xf32>
    %78 = arith.addf %76, %77 : vector<1x32xf32>
    %79 = vector.extract_strided_slice %78 {offsets = [0, 0], sizes = [1, 16], strides = [1, 1]} : vector<1x32xf32> to vector<1x16xf32>
    %c0_40 = arith.constant 0 : index
    %c0_41 = arith.constant 0 : index
    %80 = vector.load %arg22[%c0_40, %c0_41] : memref<8x32xf32, #tpu.memory_space<vmem>>, vector<1x16xf32>
    tpu.vector_store %arg22[%c0_40, %c0_41], %79 {strides = array<i32>} : memref<8x32xf32, #tpu.memory_space<vmem>>, vector<1x16xf32>,
    %81 = vector.extract_strided_slice %78 {offsets = [0, 16], sizes = [1, 16], strides = [1, 1]} : vector<1x32xf32> to vector<1x16xf32>
    %c7_42 = arith.constant 7 : index
    %c16 = arith.constant 16 : index
    %82 = vector.load %arg22[%c7_42, %c16] : memref<8x32xf32, #tpu.memory_space<vmem>>, vector<1x16xf32>
    tpu.vector_store %arg22[%c7_42, %c16], %81 {strides = array<i32>} : memref<8x32xf32, #tpu.memory_space<vmem>>, vector<1x16xf32>,
    %c1 = arith.constant 1 : index
    %c0_43 = arith.constant 0 : index
    %83 = vector.load %arg21[%c1, %c0_43] : memref<8x256xf32, #tpu.memory_space<vmem>>, vector<1x96xf32>
    %c6 = arith.constant 6 : index
    %c128_44 = arith.constant 128 : index
    %84 = vector.load %arg21[%c6, %c128_44] : memref<8x256xf32, #tpu.memory_space<vmem>>, vector<1x96xf32>
    %85 = arith.addf %83, %84 : vector<1x96xf32>
    %86 = arith.truncf %78 : vector<1x32xf32> to vector<1x32xbf16>
    %cst_45 = arith.constant dense<0.000000e+00> : vector<1x96xf32>
    %87 = tpu.matmul %86, %43, %cst_45 {dimension_numbers = #tpu.dot_dimension_numbers<[1], [0], [0], [1], [0, 0, 1, 1], [], []>} : vector<1x32xbf16>, vector<32x96xbf16>, vector<1x96xf32> -> vector<1x96xf32>
    %88 = arith.addf %87, %45 : vector<1x96xf32>
    %89 = vector.extract_strided_slice %85 {offsets = [0, 0], sizes = [1, 32], strides = [1, 1]} : vector<1x96xf32> to vector<1x32xf32>
    %90 = vector.extract_strided_slice %88 {offsets = [0, 0], sizes = [1, 32], strides = [1, 1]} : vector<1x96xf32> to vector<1x32xf32>
    %91 = arith.addf %89, %90 : vector<1x32xf32>
    %92 = arith.negf %91 : vector<1x32xf32>
    %93 = math.exp %92 : vector<1x32xf32>
    %cst_46 = arith.constant 1.000000e+00 : f32
    %94 = vector.broadcast %cst_46 : f32 to vector<1x32xf32>
    %95 = arith.addf %94, %93 : vector<1x32xf32>
    %96 = arith.divf %94, %95 : vector<1x32xf32>
    %97 = vector.extract_strided_slice %85 {offsets = [0, 32], sizes = [1, 32], strides = [1, 1]} : vector<1x96xf32> to vector<1x32xf32>
    %98 = vector.extract_strided_slice %88 {offsets = [0, 32], sizes = [1, 32], strides = [1, 1]} : vector<1x96xf32> to vector<1x32xf32>
    %99 = arith.addf %97, %98 : vector<1x32xf32>
    %100 = arith.negf %99 : vector<1x32xf32>
    %101 = math.exp %100 : vector<1x32xf32>
    %cst_47 = arith.constant 1.000000e+00 : f32
    %102 = vector.broadcast %cst_47 : f32 to vector<1x32xf32>
    %103 = arith.addf %102, %101 : vector<1x32xf32>
    %104 = arith.divf %102, %103 : vector<1x32xf32>
    %105 = vector.extract_strided_slice %85 {offsets = [0, 64], sizes = [1, 32], strides = [1, 1]} : vector<1x96xf32> to vector<1x32xf32>
    %106 = vector.extract_strided_slice %88 {offsets = [0, 64], sizes = [1, 32], strides = [1, 1]} : vector<1x96xf32> to vector<1x32xf32>
    %107 = arith.mulf %96, %106 : vector<1x32xf32>
    %108 = arith.addf %105, %107 : vector<1x32xf32>
    %109 = math.tanh %108 : vector<1x32xf32>
    %cst_48 = arith.constant 1.000000e+00 : f32
    %110 = vector.broadcast %cst_48 : f32 to vector<1x32xf32>
    %111 = arith.subf %110, %104 : vector<1x32xf32>
    %112 = arith.mulf %111, %109 : vector<1x32xf32>
    %113 = arith.mulf %104, %78 : vector<1x32xf32>
    %114 = arith.addf %112, %113 : vector<1x32xf32>
    %115 = vector.extract_strided_slice %114 {offsets = [0, 0], sizes = [1, 16], strides = [1, 1]} : vector<1x32xf32> to vector<1x16xf32>
    %c1_49 = arith.constant 1 : index
    %c0_50 = arith.constant 0 : index
    %116 = vector.load %arg22[%c1_49, %c0_50] : memref<8x32xf32, #tpu.memory_space<vmem>>, vector<1x16xf32>
    tpu.vector_store %arg22[%c1_49, %c0_50], %115 {strides = array<i32>} : memref<8x32xf32, #tpu.memory_space<vmem>>, vector<1x16xf32>,
    %117 = vector.extract_strided_slice %114 {offsets = [0, 16], sizes = [1, 16], strides = [1, 1]} : vector<1x32xf32> to vector<1x16xf32>
    %c6_51 = arith.constant 6 : index
    %c16_52 = arith.constant 16 : index
    %118 = vector.load %arg22[%c6_51, %c16_52] : memref<8x32xf32, #tpu.memory_space<vmem>>, vector<1x16xf32>
    tpu.vector_store %arg22[%c6_51, %c16_52], %117 {strides = array<i32>} : memref<8x32xf32, #tpu.memory_space<vmem>>, vector<1x16xf32>,
    %c2 = arith.constant 2 : index
    %c0_53 = arith.constant 0 : index
    %119 = vector.load %arg21[%c2, %c0_53] : memref<8x256xf32, #tpu.memory_space<vmem>>, vector<1x96xf32>
    %c5 = arith.constant 5 : index
    %c128_54 = arith.constant 128 : index
    %120 = vector.load %arg21[%c5, %c128_54] : memref<8x256xf32, #tpu.memory_space<vmem>>, vector<1x96xf32>
    %121 = arith.addf %119, %120 : vector<1x96xf32>
    %122 = arith.truncf %114 : vector<1x32xf32> to vector<1x32xbf16>
    %cst_55 = arith.constant dense<0.000000e+00> : vector<1x96xf32>
    %123 = tpu.matmul %122, %43, %cst_55 {dimension_numbers = #tpu.dot_dimension_numbers<[1], [0], [0], [1], [0, 0, 1, 1], [], []>} : vector<1x32xbf16>, vector<32x96xbf16>, vector<1x96xf32> -> vector<1x96xf32>
    %124 = arith.addf %123, %45 : vector<1x96xf32>
    %125 = vector.extract_strided_slice %121 {offsets = [0, 0], sizes = [1, 32], strides = [1, 1]} : vector<1x96xf32> to vector<1x32xf32>
    %126 = vector.extract_strided_slice %124 {offsets = [0, 0], sizes = [1, 32], strides = [1, 1]} : vector<1x96xf32> to vector<1x32xf32>
    %127 = arith.addf %125, %126 : vector<1x32xf32>
    %128 = arith.negf %127 : vector<1x32xf32>
    %129 = math.exp %128 : vector<1x32xf32>
    %cst_56 = arith.constant 1.000000e+00 : f32
    %130 = vector.broadcast %cst_56 : f32 to vector<1x32xf32>
    %131 = arith.addf %130, %129 : vector<1x32xf32>
    %132 = arith.divf %130, %131 : vector<1x32xf32>
    %133 = vector.extract_strided_slice %121 {offsets = [0, 32], sizes = [1, 32], strides = [1, 1]} : vector<1x96xf32> to vector<1x32xf32>
    %134 = vector.extract_strided_slice %124 {offsets = [0, 32], sizes = [1, 32], strides = [1, 1]} : vector<1x96xf32> to vector<1x32xf32>
    %135 = arith.addf %133, %134 : vector<1x32xf32>
    %136 = arith.negf %135 : vector<1x32xf32>
    %137 = math.exp %136 : vector<1x32xf32>
    %cst_57 = arith.constant 1.000000e+00 : f32
    %138 = vector.broadcast %cst_57 : f32 to vector<1x32xf32>
    %139 = arith.addf %138, %137 : vector<1x32xf32>
    %140 = arith.divf %138, %139 : vector<1x32xf32>
    %141 = vector.extract_strided_slice %121 {offsets = [0, 64], sizes = [1, 32], strides = [1, 1]} : vector<1x96xf32> to vector<1x32xf32>
    %142 = vector.extract_strided_slice %124 {offsets = [0, 64], sizes = [1, 32], strides = [1, 1]} : vector<1x96xf32> to vector<1x32xf32>
    %143 = arith.mulf %132, %142 : vector<1x32xf32>
    %144 = arith.addf %141, %143 : vector<1x32xf32>
    %145 = math.tanh %144 : vector<1x32xf32>
    %cst_58 = arith.constant 1.000000e+00 : f32
    %146 = vector.broadcast %cst_58 : f32 to vector<1x32xf32>
    %147 = arith.subf %146, %140 : vector<1x32xf32>
    %148 = arith.mulf %147, %145 : vector<1x32xf32>
    %149 = arith.mulf %140, %114 : vector<1x32xf32>
    %150 = arith.addf %148, %149 : vector<1x32xf32>
    %151 = vector.extract_strided_slice %150 {offsets = [0, 0], sizes = [1, 16], strides = [1, 1]} : vector<1x32xf32> to vector<1x16xf32>
    %c2_59 = arith.constant 2 : index
    %c0_60 = arith.constant 0 : index
    %152 = vector.load %arg22[%c2_59, %c0_60] : memref<8x32xf32, #tpu.memory_space<vmem>>, vector<1x16xf32>
    tpu.vector_store %arg22[%c2_59, %c0_60], %151 {strides = array<i32>} : memref<8x32xf32, #tpu.memory_space<vmem>>, vector<1x16xf32>,
    %153 = vector.extract_strided_slice %150 {offsets = [0, 16], sizes = [1, 16], strides = [1, 1]} : vector<1x32xf32> to vector<1x16xf32>
    %c5_61 = arith.constant 5 : index
    %c16_62 = arith.constant 16 : index
    %154 = vector.load %arg22[%c5_61, %c16_62] : memref<8x32xf32, #tpu.memory_space<vmem>>, vector<1x16xf32>
    tpu.vector_store %arg22[%c5_61, %c16_62], %153 {strides = array<i32>} : memref<8x32xf32, #tpu.memory_space<vmem>>, vector<1x16xf32>,
    %c3 = arith.constant 3 : index
    %c0_63 = arith.constant 0 : index
    %155 = vector.load %arg21[%c3, %c0_63] : memref<8x256xf32, #tpu.memory_space<vmem>>, vector<1x96xf32>
    %c4 = arith.constant 4 : index
    %c128_64 = arith.constant 128 : index
    %156 = vector.load %arg21[%c4, %c128_64] : memref<8x256xf32, #tpu.memory_space<vmem>>, vector<1x96xf32>
    %157 = arith.addf %155, %156 : vector<1x96xf32>
    %158 = arith.truncf %150 : vector<1x32xf32> to vector<1x32xbf16>
    %cst_65 = arith.constant dense<0.000000e+00> : vector<1x96xf32>
    %159 = tpu.matmul %158, %43, %cst_65 {dimension_numbers = #tpu.dot_dimension_numbers<[1], [0], [0], [1], [0, 0, 1, 1], [], []>} : vector<1x32xbf16>, vector<32x96xbf16>, vector<1x96xf32> -> vector<1x96xf32>
    %160 = arith.addf %159, %45 : vector<1x96xf32>
    %161 = vector.extract_strided_slice %157 {offsets = [0, 0], sizes = [1, 32], strides = [1, 1]} : vector<1x96xf32> to vector<1x32xf32>
    %162 = vector.extract_strided_slice %160 {offsets = [0, 0], sizes = [1, 32], strides = [1, 1]} : vector<1x96xf32> to vector<1x32xf32>
    %163 = arith.addf %161, %162 : vector<1x32xf32>
    %164 = arith.negf %163 : vector<1x32xf32>
    %165 = math.exp %164 : vector<1x32xf32>
    %cst_66 = arith.constant 1.000000e+00 : f32
    %166 = vector.broadcast %cst_66 : f32 to vector<1x32xf32>
    %167 = arith.addf %166, %165 : vector<1x32xf32>
    %168 = arith.divf %166, %167 : vector<1x32xf32>
    %169 = vector.extract_strided_slice %157 {offsets = [0, 32], sizes = [1, 32], strides = [1, 1]} : vector<1x96xf32> to vector<1x32xf32>
    %170 = vector.extract_strided_slice %160 {offsets = [0, 32], sizes = [1, 32], strides = [1, 1]} : vector<1x96xf32> to vector<1x32xf32>
    %171 = arith.addf %169, %170 : vector<1x32xf32>
    %172 = arith.negf %171 : vector<1x32xf32>
    %173 = math.exp %172 : vector<1x32xf32>
    %cst_67 = arith.constant 1.000000e+00 : f32
    %174 = vector.broadcast %cst_67 : f32 to vector<1x32xf32>
    %175 = arith.addf %174, %173 : vector<1x32xf32>
    %176 = arith.divf %174, %175 : vector<1x32xf32>
    %177 = vector.extract_strided_slice %157 {offsets = [0, 64], sizes = [1, 32], strides = [1, 1]} : vector<1x96xf32> to vector<1x32xf32>
    %178 = vector.extract_strided_slice %160 {offsets = [0, 64], sizes = [1, 32], strides = [1, 1]} : vector<1x96xf32> to vector<1x32xf32>
    %179 = arith.mulf %168, %178 : vector<1x32xf32>
    %180 = arith.addf %177, %179 : vector<1x32xf32>
    %181 = math.tanh %180 : vector<1x32xf32>
    %cst_68 = arith.constant 1.000000e+00 : f32
    %182 = vector.broadcast %cst_68 : f32 to vector<1x32xf32>
    %183 = arith.subf %182, %176 : vector<1x32xf32>
    %184 = arith.mulf %183, %181 : vector<1x32xf32>
    %185 = arith.mulf %176, %150 : vector<1x32xf32>
    %186 = arith.addf %184, %185 : vector<1x32xf32>
    %187 = vector.extract_strided_slice %186 {offsets = [0, 0], sizes = [1, 16], strides = [1, 1]} : vector<1x32xf32> to vector<1x16xf32>
    %c3_69 = arith.constant 3 : index
    %c0_70 = arith.constant 0 : index
    %188 = vector.load %arg22[%c3_69, %c0_70] : memref<8x32xf32, #tpu.memory_space<vmem>>, vector<1x16xf32>
    tpu.vector_store %arg22[%c3_69, %c0_70], %187 {strides = array<i32>} : memref<8x32xf32, #tpu.memory_space<vmem>>, vector<1x16xf32>,
    %189 = vector.extract_strided_slice %186 {offsets = [0, 16], sizes = [1, 16], strides = [1, 1]} : vector<1x32xf32> to vector<1x16xf32>
    %c4_71 = arith.constant 4 : index
    %c16_72 = arith.constant 16 : index
    %190 = vector.load %arg22[%c4_71, %c16_72] : memref<8x32xf32, #tpu.memory_space<vmem>>, vector<1x16xf32>
    tpu.vector_store %arg22[%c4_71, %c16_72], %189 {strides = array<i32>} : memref<8x32xf32, #tpu.memory_space<vmem>>, vector<1x16xf32>,
    %c4_73 = arith.constant 4 : index
    %c0_74 = arith.constant 0 : index
    %191 = vector.load %arg21[%c4_73, %c0_74] : memref<8x256xf32, #tpu.memory_space<vmem>>, vector<1x96xf32>
    %c3_75 = arith.constant 3 : index
    %c128_76 = arith.constant 128 : index
    %192 = vector.load %arg21[%c3_75, %c128_76] : memref<8x256xf32, #tpu.memory_space<vmem>>, vector<1x96xf32>
    %193 = arith.addf %191, %192 : vector<1x96xf32>
    %194 = arith.truncf %186 : vector<1x32xf32> to vector<1x32xbf16>
    %cst_77 = arith.constant dense<0.000000e+00> : vector<1x96xf32>
    %195 = tpu.matmul %194, %43, %cst_77 {dimension_numbers = #tpu.dot_dimension_numbers<[1], [0], [0], [1], [0, 0, 1, 1], [], []>} : vector<1x32xbf16>, vector<32x96xbf16>, vector<1x96xf32> -> vector<1x96xf32>
    %196 = arith.addf %195, %45 : vector<1x96xf32>
    %197 = vector.extract_strided_slice %193 {offsets = [0, 0], sizes = [1, 32], strides = [1, 1]} : vector<1x96xf32> to vector<1x32xf32>
    %198 = vector.extract_strided_slice %196 {offsets = [0, 0], sizes = [1, 32], strides = [1, 1]} : vector<1x96xf32> to vector<1x32xf32>
    %199 = arith.addf %197, %198 : vector<1x32xf32>
    %200 = arith.negf %199 : vector<1x32xf32>
    %201 = math.exp %200 : vector<1x32xf32>
    %cst_78 = arith.constant 1.000000e+00 : f32
    %202 = vector.broadcast %cst_78 : f32 to vector<1x32xf32>
    %203 = arith.addf %202, %201 : vector<1x32xf32>
    %204 = arith.divf %202, %203 : vector<1x32xf32>
    %205 = vector.extract_strided_slice %193 {offsets = [0, 32], sizes = [1, 32], strides = [1, 1]} : vector<1x96xf32> to vector<1x32xf32>
    %206 = vector.extract_strided_slice %196 {offsets = [0, 32], sizes = [1, 32], strides = [1, 1]} : vector<1x96xf32> to vector<1x32xf32>
    %207 = arith.addf %205, %206 : vector<1x32xf32>
    %208 = arith.negf %207 : vector<1x32xf32>
    %209 = math.exp %208 : vector<1x32xf32>
    %cst_79 = arith.constant 1.000000e+00 : f32
    %210 = vector.broadcast %cst_79 : f32 to vector<1x32xf32>
    %211 = arith.addf %210, %209 : vector<1x32xf32>
    %212 = arith.divf %210, %211 : vector<1x32xf32>
    %213 = vector.extract_strided_slice %193 {offsets = [0, 64], sizes = [1, 32], strides = [1, 1]} : vector<1x96xf32> to vector<1x32xf32>
    %214 = vector.extract_strided_slice %196 {offsets = [0, 64], sizes = [1, 32], strides = [1, 1]} : vector<1x96xf32> to vector<1x32xf32>
    %215 = arith.mulf %204, %214 : vector<1x32xf32>
    %216 = arith.addf %213, %215 : vector<1x32xf32>
    %217 = math.tanh %216 : vector<1x32xf32>
    %cst_80 = arith.constant 1.000000e+00 : f32
    %218 = vector.broadcast %cst_80 : f32 to vector<1x32xf32>
    %219 = arith.subf %218, %212 : vector<1x32xf32>
    %220 = arith.mulf %219, %217 : vector<1x32xf32>
    %221 = arith.mulf %212, %186 : vector<1x32xf32>
    %222 = arith.addf %220, %221 : vector<1x32xf32>
    %223 = vector.extract_strided_slice %222 {offsets = [0, 0], sizes = [1, 16], strides = [1, 1]} : vector<1x32xf32> to vector<1x16xf32>
    %c4_81 = arith.constant 4 : index
    %c0_82 = arith.constant 0 : index
    %224 = vector.load %arg22[%c4_81, %c0_82] : memref<8x32xf32, #tpu.memory_space<vmem>>, vector<1x16xf32>
    tpu.vector_store %arg22[%c4_81, %c0_82], %223 {strides = array<i32>} : memref<8x32xf32, #tpu.memory_space<vmem>>, vector<1x16xf32>,
    %225 = vector.extract_strided_slice %222 {offsets = [0, 16], sizes = [1, 16], strides = [1, 1]} : vector<1x32xf32> to vector<1x16xf32>
    %c3_83 = arith.constant 3 : index
    %c16_84 = arith.constant 16 : index
    %226 = vector.load %arg22[%c3_83, %c16_84] : memref<8x32xf32, #tpu.memory_space<vmem>>, vector<1x16xf32>
    tpu.vector_store %arg22[%c3_83, %c16_84], %225 {strides = array<i32>} : memref<8x32xf32, #tpu.memory_space<vmem>>, vector<1x16xf32>,
    %c5_85 = arith.constant 5 : index
    %c0_86 = arith.constant 0 : index
    %227 = vector.load %arg21[%c5_85, %c0_86] : memref<8x256xf32, #tpu.memory_space<vmem>>, vector<1x96xf32>
    %c2_87 = arith.constant 2 : index
    %c128_88 = arith.constant 128 : index
    %228 = vector.load %arg21[%c2_87, %c128_88] : memref<8x256xf32, #tpu.memory_space<vmem>>, vector<1x96xf32>
    %229 = arith.addf %227, %228 : vector<1x96xf32>
    %230 = arith.truncf %222 : vector<1x32xf32> to vector<1x32xbf16>
    %cst_89 = arith.constant dense<0.000000e+00> : vector<1x96xf32>
    %231 = tpu.matmul %230, %43, %cst_89 {dimension_numbers = #tpu.dot_dimension_numbers<[1], [0], [0], [1], [0, 0, 1, 1], [], []>} : vector<1x32xbf16>, vector<32x96xbf16>, vector<1x96xf32> -> vector<1x96xf32>
    %232 = arith.addf %231, %45 : vector<1x96xf32>
    %233 = vector.extract_strided_slice %229 {offsets = [0, 0], sizes = [1, 32], strides = [1, 1]} : vector<1x96xf32> to vector<1x32xf32>
    %234 = vector.extract_strided_slice %232 {offsets = [0, 0], sizes = [1, 32], strides = [1, 1]} : vector<1x96xf32> to vector<1x32xf32>
    %235 = arith.addf %233, %234 : vector<1x32xf32>
    %236 = arith.negf %235 : vector<1x32xf32>
    %237 = math.exp %236 : vector<1x32xf32>
    %cst_90 = arith.constant 1.000000e+00 : f32
    %238 = vector.broadcast %cst_90 : f32 to vector<1x32xf32>
    %239 = arith.addf %238, %237 : vector<1x32xf32>
    %240 = arith.divf %238, %239 : vector<1x32xf32>
    %241 = vector.extract_strided_slice %229 {offsets = [0, 32], sizes = [1, 32], strides = [1, 1]} : vector<1x96xf32> to vector<1x32xf32>
    %242 = vector.extract_strided_slice %232 {offsets = [0, 32], sizes = [1, 32], strides = [1, 1]} : vector<1x96xf32> to vector<1x32xf32>
    %243 = arith.addf %241, %242 : vector<1x32xf32>
    %244 = arith.negf %243 : vector<1x32xf32>
    %245 = math.exp %244 : vector<1x32xf32>
    %cst_91 = arith.constant 1.000000e+00 : f32
    %246 = vector.broadcast %cst_91 : f32 to vector<1x32xf32>
    %247 = arith.addf %246, %245 : vector<1x32xf32>
    %248 = arith.divf %246, %247 : vector<1x32xf32>
    %249 = vector.extract_strided_slice %229 {offsets = [0, 64], sizes = [1, 32], strides = [1, 1]} : vector<1x96xf32> to vector<1x32xf32>
    %250 = vector.extract_strided_slice %232 {offsets = [0, 64], sizes = [1, 32], strides = [1, 1]} : vector<1x96xf32> to vector<1x32xf32>
    %251 = arith.mulf %240, %250 : vector<1x32xf32>
    %252 = arith.addf %249, %251 : vector<1x32xf32>
    %253 = math.tanh %252 : vector<1x32xf32>
    %cst_92 = arith.constant 1.000000e+00 : f32
    %254 = vector.broadcast %cst_92 : f32 to vector<1x32xf32>
    %255 = arith.subf %254, %248 : vector<1x32xf32>
    %256 = arith.mulf %255, %253 : vector<1x32xf32>
    %257 = arith.mulf %248, %222 : vector<1x32xf32>
    %258 = arith.addf %256, %257 : vector<1x32xf32>
    %259 = vector.extract_strided_slice %258 {offsets = [0, 0], sizes = [1, 16], strides = [1, 1]} : vector<1x32xf32> to vector<1x16xf32>
    %c5_93 = arith.constant 5 : index
    %c0_94 = arith.constant 0 : index
    %260 = vector.load %arg22[%c5_93, %c0_94] : memref<8x32xf32, #tpu.memory_space<vmem>>, vector<1x16xf32>
    tpu.vector_store %arg22[%c5_93, %c0_94], %259 {strides = array<i32>} : memref<8x32xf32, #tpu.memory_space<vmem>>, vector<1x16xf32>,
    %261 = vector.extract_strided_slice %258 {offsets = [0, 16], sizes = [1, 16], strides = [1, 1]} : vector<1x32xf32> to vector<1x16xf32>
    %c2_95 = arith.constant 2 : index
    %c16_96 = arith.constant 16 : index
    %262 = vector.load %arg22[%c2_95, %c16_96] : memref<8x32xf32, #tpu.memory_space<vmem>>, vector<1x16xf32>
    tpu.vector_store %arg22[%c2_95, %c16_96], %261 {strides = array<i32>} : memref<8x32xf32, #tpu.memory_space<vmem>>, vector<1x16xf32>,
    %c6_97 = arith.constant 6 : index
    %c0_98 = arith.constant 0 : index
    %263 = vector.load %arg21[%c6_97, %c0_98] : memref<8x256xf32, #tpu.memory_space<vmem>>, vector<1x96xf32>
    %c1_99 = arith.constant 1 : index
    %c128_100 = arith.constant 128 : index
    %264 = vector.load %arg21[%c1_99, %c128_100] : memref<8x256xf32, #tpu.memory_space<vmem>>, vector<1x96xf32>
    %265 = arith.addf %263, %264 : vector<1x96xf32>
    %266 = arith.truncf %258 : vector<1x32xf32> to vector<1x32xbf16>
    %cst_101 = arith.constant dense<0.000000e+00> : vector<1x96xf32>
    %267 = tpu.matmul %266, %43, %cst_101 {dimension_numbers = #tpu.dot_dimension_numbers<[1], [0], [0], [1], [0, 0, 1, 1], [], []>} : vector<1x32xbf16>, vector<32x96xbf16>, vector<1x96xf32> -> vector<1x96xf32>
    %268 = arith.addf %267, %45 : vector<1x96xf32>
    %269 = vector.extract_strided_slice %265 {offsets = [0, 0], sizes = [1, 32], strides = [1, 1]} : vector<1x96xf32> to vector<1x32xf32>
    %270 = vector.extract_strided_slice %268 {offsets = [0, 0], sizes = [1, 32], strides = [1, 1]} : vector<1x96xf32> to vector<1x32xf32>
    %271 = arith.addf %269, %270 : vector<1x32xf32>
    %272 = arith.negf %271 : vector<1x32xf32>
    %273 = math.exp %272 : vector<1x32xf32>
    %cst_102 = arith.constant 1.000000e+00 : f32
    %274 = vector.broadcast %cst_102 : f32 to vector<1x32xf32>
    %275 = arith.addf %274, %273 : vector<1x32xf32>
    %276 = arith.divf %274, %275 : vector<1x32xf32>
    %277 = vector.extract_strided_slice %265 {offsets = [0, 32], sizes = [1, 32], strides = [1, 1]} : vector<1x96xf32> to vector<1x32xf32>
    %278 = vector.extract_strided_slice %268 {offsets = [0, 32], sizes = [1, 32], strides = [1, 1]} : vector<1x96xf32> to vector<1x32xf32>
    %279 = arith.addf %277, %278 : vector<1x32xf32>
    %280 = arith.negf %279 : vector<1x32xf32>
    %281 = math.exp %280 : vector<1x32xf32>
    %cst_103 = arith.constant 1.000000e+00 : f32
    %282 = vector.broadcast %cst_103 : f32 to vector<1x32xf32>
    %283 = arith.addf %282, %281 : vector<1x32xf32>
    %284 = arith.divf %282, %283 : vector<1x32xf32>
    %285 = vector.extract_strided_slice %265 {offsets = [0, 64], sizes = [1, 32], strides = [1, 1]} : vector<1x96xf32> to vector<1x32xf32>
    %286 = vector.extract_strided_slice %268 {offsets = [0, 64], sizes = [1, 32], strides = [1, 1]} : vector<1x96xf32> to vector<1x32xf32>
    %287 = arith.mulf %276, %286 : vector<1x32xf32>
    %288 = arith.addf %285, %287 : vector<1x32xf32>
    %289 = math.tanh %288 : vector<1x32xf32>
    %cst_104 = arith.constant 1.000000e+00 : f32
    %290 = vector.broadcast %cst_104 : f32 to vector<1x32xf32>
    %291 = arith.subf %290, %284 : vector<1x32xf32>
    %292 = arith.mulf %291, %289 : vector<1x32xf32>
    %293 = arith.mulf %284, %258 : vector<1x32xf32>
    %294 = arith.addf %292, %293 : vector<1x32xf32>
    %295 = vector.extract_strided_slice %294 {offsets = [0, 0], sizes = [1, 16], strides = [1, 1]} : vector<1x32xf32> to vector<1x16xf32>
    %c6_105 = arith.constant 6 : index
    %c0_106 = arith.constant 0 : index
    %296 = vector.load %arg22[%c6_105, %c0_106] : memref<8x32xf32, #tpu.memory_space<vmem>>, vector<1x16xf32>
    tpu.vector_store %arg22[%c6_105, %c0_106], %295 {strides = array<i32>} : memref<8x32xf32, #tpu.memory_space<vmem>>, vector<1x16xf32>,
    %297 = vector.extract_strided_slice %294 {offsets = [0, 16], sizes = [1, 16], strides = [1, 1]} : vector<1x32xf32> to vector<1x16xf32>
    %c1_107 = arith.constant 1 : index
    %c16_108 = arith.constant 16 : index
    %298 = vector.load %arg22[%c1_107, %c16_108] : memref<8x32xf32, #tpu.memory_space<vmem>>, vector<1x16xf32>
    tpu.vector_store %arg22[%c1_107, %c16_108], %297 {strides = array<i32>} : memref<8x32xf32, #tpu.memory_space<vmem>>, vector<1x16xf32>,
    %c7_109 = arith.constant 7 : index
    %c0_110 = arith.constant 0 : index
    %299 = vector.load %arg21[%c7_109, %c0_110] : memref<8x256xf32, #tpu.memory_space<vmem>>, vector<1x96xf32>
    %c0_111 = arith.constant 0 : index
    %c128_112 = arith.constant 128 : index
    %300 = vector.load %arg21[%c0_111, %c128_112] : memref<8x256xf32, #tpu.memory_space<vmem>>, vector<1x96xf32>
    %301 = arith.addf %299, %300 : vector<1x96xf32>
    %302 = arith.truncf %294 : vector<1x32xf32> to vector<1x32xbf16>
    %cst_113 = arith.constant dense<0.000000e+00> : vector<1x96xf32>
    %303 = tpu.matmul %302, %43, %cst_113 {dimension_numbers = #tpu.dot_dimension_numbers<[1], [0], [0], [1], [0, 0, 1, 1], [], []>} : vector<1x32xbf16>, vector<32x96xbf16>, vector<1x96xf32> -> vector<1x96xf32>
    %304 = arith.addf %303, %45 : vector<1x96xf32>
    %305 = vector.extract_strided_slice %301 {offsets = [0, 0], sizes = [1, 32], strides = [1, 1]} : vector<1x96xf32> to vector<1x32xf32>
    %306 = vector.extract_strided_slice %304 {offsets = [0, 0], sizes = [1, 32], strides = [1, 1]} : vector<1x96xf32> to vector<1x32xf32>
    %307 = arith.addf %305, %306 : vector<1x32xf32>
    %308 = arith.negf %307 : vector<1x32xf32>
    %309 = math.exp %308 : vector<1x32xf32>
    %cst_114 = arith.constant 1.000000e+00 : f32
    %310 = vector.broadcast %cst_114 : f32 to vector<1x32xf32>
    %311 = arith.addf %310, %309 : vector<1x32xf32>
    %312 = arith.divf %310, %311 : vector<1x32xf32>
    %313 = vector.extract_strided_slice %301 {offsets = [0, 32], sizes = [1, 32], strides = [1, 1]} : vector<1x96xf32> to vector<1x32xf32>
    %314 = vector.extract_strided_slice %304 {offsets = [0, 32], sizes = [1, 32], strides = [1, 1]} : vector<1x96xf32> to vector<1x32xf32>
    %315 = arith.addf %313, %314 : vector<1x32xf32>
    %316 = arith.negf %315 : vector<1x32xf32>
    %317 = math.exp %316 : vector<1x32xf32>
    %cst_115 = arith.constant 1.000000e+00 : f32
    %318 = vector.broadcast %cst_115 : f32 to vector<1x32xf32>
    %319 = arith.addf %318, %317 : vector<1x32xf32>
    %320 = arith.divf %318, %319 : vector<1x32xf32>
    %321 = vector.extract_strided_slice %301 {offsets = [0, 64], sizes = [1, 32], strides = [1, 1]} : vector<1x96xf32> to vector<1x32xf32>
    %322 = vector.extract_strided_slice %304 {offsets = [0, 64], sizes = [1, 32], strides = [1, 1]} : vector<1x96xf32> to vector<1x32xf32>
    %323 = arith.mulf %312, %322 : vector<1x32xf32>
    %324 = arith.addf %321, %323 : vector<1x32xf32>
    %325 = math.tanh %324 : vector<1x32xf32>
    %cst_116 = arith.constant 1.000000e+00 : f32
    %326 = vector.broadcast %cst_116 : f32 to vector<1x32xf32>
    %327 = arith.subf %326, %320 : vector<1x32xf32>
    %328 = arith.mulf %327, %325 : vector<1x32xf32>
    %329 = arith.mulf %320, %294 : vector<1x32xf32>
    %330 = arith.addf %328, %329 : vector<1x32xf32>
    %331 = vector.extract_strided_slice %330 {offsets = [0, 0], sizes = [1, 16], strides = [1, 1]} : vector<1x32xf32> to vector<1x16xf32>
    %c7_117 = arith.constant 7 : index
    %c0_118 = arith.constant 0 : index
    %332 = vector.load %arg22[%c7_117, %c0_118] : memref<8x32xf32, #tpu.memory_space<vmem>>, vector<1x16xf32>
    tpu.vector_store %arg22[%c7_117, %c0_118], %331 {strides = array<i32>} : memref<8x32xf32, #tpu.memory_space<vmem>>, vector<1x16xf32>,
    %333 = vector.extract_strided_slice %330 {offsets = [0, 16], sizes = [1, 16], strides = [1, 1]} : vector<1x32xf32> to vector<1x16xf32>
    %c0_119 = arith.constant 0 : index
    %c16_120 = arith.constant 16 : index
    %334 = vector.load %arg22[%c0_119, %c16_120] : memref<8x32xf32, #tpu.memory_space<vmem>>, vector<1x16xf32>
    tpu.vector_store %arg22[%c0_119, %c16_120], %333 {strides = array<i32>} : memref<8x32xf32, #tpu.memory_space<vmem>>, vector<1x16xf32>,
    %c0_121 = arith.constant 0 : index
    %c0_122 = arith.constant 0 : index
    %335 = vector.load %arg22[%c0_121, %c0_122] : memref<8x32xf32, #tpu.memory_space<vmem>>, vector<8x32xf32>
    %336 = arith.truncf %335 : vector<8x32xf32> to vector<8x32xbf16>
    %cst_123 = arith.constant dense<0.000000e+00> : vector<8x64xf32>
    %337 = tpu.matmul %336, %31, %cst_123 {dimension_numbers = #tpu.dot_dimension_numbers<[1], [0], [0], [1], [0, 0, 1, 1], [], []>} : vector<8x32xbf16>, vector<32x64xbf16>, vector<8x64xf32> -> vector<8x64xf32>
    %338 = vector.broadcast %32 : vector<1x64xf32> to vector<8x64xf32>
    %339 = arith.addf %337, %338 : vector<8x64xf32>
    %340 = vector.extract_strided_slice %339 {offsets = [0, 0], sizes = [8, 32], strides = [1, 1]} : vector<8x64xf32> to vector<8x32xf32>
    %341 = vector.extract_strided_slice %339 {offsets = [0, 32], sizes = [8, 32], strides = [1, 1]} : vector<8x64xf32> to vector<8x32xf32>
    %342 = arith.negf %340 : vector<8x32xf32>
    %343 = math.exp %342 : vector<8x32xf32>
    %cst_124 = arith.constant 1.000000e+00 : f32
    %344 = vector.broadcast %cst_124 : f32 to vector<8x32xf32>
    %345 = arith.addf %344, %343 : vector<8x32xf32>
    %346 = arith.divf %344, %345 : vector<8x32xf32>
    %347 = arith.mulf %340, %346 : vector<8x32xf32>
    %348 = arith.mulf %347, %341 : vector<8x32xf32>
    %349 = arith.truncf %348 : vector<8x32xf32> to vector<8x32xbf16>
    %c1_125 = arith.constant 1 : index
    %c0_126 = arith.constant 0 : index
    %c0_127 = arith.constant 0 : index
    %350 = vector.load %arg8[%c1_125, %c0_126, %c0_127] : memref<3x32x256xbf16, #tpu.memory_space<vmem>>, vector<1x32x256xbf16>
    %351 = vector.shape_cast %350 : vector<1x32x256xbf16> to vector<32x256xbf16>
    %cst_128 = arith.constant dense<0.000000e+00> : vector<8x256xf32>
    %352 = tpu.matmul %349, %351, %cst_128 {dimension_numbers = #tpu.dot_dimension_numbers<[1], [0], [0], [1], [0, 0, 1, 1], [], []>} : vector<8x32xbf16>, vector<32x256xbf16>, vector<8x256xf32> -> vector<8x256xf32>
    %c1_129 = arith.constant 1 : index
    %c0_130 = arith.constant 0 : index
    %c0_131 = arith.constant 0 : index
    %353 = vector.load %arg9[%c1_129, %c0_130, %c0_131] : memref<3x1x256xf32, #tpu.memory_space<vmem>>, vector<1x1x256xf32>
    %354 = vector.shape_cast %353 : vector<1x1x256xf32> to vector<1x256xf32>
    %355 = vector.broadcast %354 : vector<1x256xf32> to vector<8x256xf32>
    %356 = arith.addf %352, %355 : vector<8x256xf32>
    %c0_132 = arith.constant 0 : index
    %c0_133 = arith.constant 0 : index
    %357 = vector.load %arg21[%c0_132, %c0_133] : memref<8x256xf32, #tpu.memory_space<vmem>>, vector<8x256xf32>
    tpu.vector_store %arg21[%c0_132, %c0_133], %356 {strides = array<i32>} : memref<8x256xf32, #tpu.memory_space<vmem>>, vector<8x256xf32>,
    %c1_134 = arith.constant 1 : index
    %c0_135 = arith.constant 0 : index
    %c0_136 = arith.constant 0 : index
    %358 = vector.load %arg10[%c1_134, %c0_135, %c0_136] : memref<3x32x96xbf16, #tpu.memory_space<vmem>>, vector<1x32x96xbf16>
    %359 = vector.shape_cast %358 : vector<1x32x96xbf16> to vector<32x96xbf16>
    %c1_137 = arith.constant 1 : index
    %c0_138 = arith.constant 0 : index
    %c0_139 = arith.constant 0 : index
    %360 = vector.load %arg11[%c1_137, %c0_138, %c0_139] : memref<3x1x96xf32, #tpu.memory_space<vmem>>, vector<1x1x96xf32>
    %361 = vector.shape_cast %360 : vector<1x1x96xf32> to vector<1x96xf32>
    %cst_140 = arith.constant 0.000000e+00 : f32
    %362 = vector.broadcast %cst_140 : f32 to vector<1x32xf32>
    %c0_141 = arith.constant 0 : index
    %c0_142 = arith.constant 0 : index
    %363 = vector.load %arg21[%c0_141, %c0_142] : memref<8x256xf32, #tpu.memory_space<vmem>>, vector<1x96xf32>
    %c7_143 = arith.constant 7 : index
    %c128_144 = arith.constant 128 : index
    %364 = vector.load %arg21[%c7_143, %c128_144] : memref<8x256xf32, #tpu.memory_space<vmem>>, vector<1x96xf32>
    %365 = arith.addf %363, %364 : vector<1x96xf32>
    %366 = arith.truncf %362 : vector<1x32xf32> to vector<1x32xbf16>
    %cst_145 = arith.constant dense<0.000000e+00> : vector<1x96xf32>
    %367 = tpu.matmul %366, %359, %cst_145 {dimension_numbers = #tpu.dot_dimension_numbers<[1], [0], [0], [1], [0, 0, 1, 1], [], []>} : vector<1x32xbf16>, vector<32x96xbf16>, vector<1x96xf32> -> vector<1x96xf32>
    %368 = arith.addf %367, %361 : vector<1x96xf32>
    %369 = vector.extract_strided_slice %365 {offsets = [0, 0], sizes = [1, 32], strides = [1, 1]} : vector<1x96xf32> to vector<1x32xf32>
    %370 = vector.extract_strided_slice %368 {offsets = [0, 0], sizes = [1, 32], strides = [1, 1]} : vector<1x96xf32> to vector<1x32xf32>
    %371 = arith.addf %369, %370 : vector<1x32xf32>
    %372 = arith.negf %371 : vector<1x32xf32>
    %373 = math.exp %372 : vector<1x32xf32>
    %cst_146 = arith.constant 1.000000e+00 : f32
    %374 = vector.broadcast %cst_146 : f32 to vector<1x32xf32>
    %375 = arith.addf %374, %373 : vector<1x32xf32>
    %376 = arith.divf %374, %375 : vector<1x32xf32>
    %377 = vector.extract_strided_slice %365 {offsets = [0, 32], sizes = [1, 32], strides = [1, 1]} : vector<1x96xf32> to vector<1x32xf32>
    %378 = vector.extract_strided_slice %368 {offsets = [0, 32], sizes = [1, 32], strides = [1, 1]} : vector<1x96xf32> to vector<1x32xf32>
    %379 = arith.addf %377, %378 : vector<1x32xf32>
    %380 = arith.negf %379 : vector<1x32xf32>
    %381 = math.exp %380 : vector<1x32xf32>
    %cst_147 = arith.constant 1.000000e+00 : f32
    %382 = vector.broadcast %cst_147 : f32 to vector<1x32xf32>
    %383 = arith.addf %382, %381 : vector<1x32xf32>
    %384 = arith.divf %382, %383 : vector<1x32xf32>
    %385 = vector.extract_strided_slice %365 {offsets = [0, 64], sizes = [1, 32], strides = [1, 1]} : vector<1x96xf32> to vector<1x32xf32>
    %386 = vector.extract_strided_slice %368 {offsets = [0, 64], sizes = [1, 32], strides = [1, 1]} : vector<1x96xf32> to vector<1x32xf32>
    %387 = arith.mulf %376, %386 : vector<1x32xf32>
    %388 = arith.addf %385, %387 : vector<1x32xf32>
    %389 = math.tanh %388 : vector<1x32xf32>
    %cst_148 = arith.constant 1.000000e+00 : f32
    %390 = vector.broadcast %cst_148 : f32 to vector<1x32xf32>
    %391 = arith.subf %390, %384 : vector<1x32xf32>
    %392 = arith.mulf %391, %389 : vector<1x32xf32>
    %393 = arith.mulf %384, %362 : vector<1x32xf32>
    %394 = arith.addf %392, %393 : vector<1x32xf32>
    %395 = vector.extract_strided_slice %394 {offsets = [0, 0], sizes = [1, 16], strides = [1, 1]} : vector<1x32xf32> to vector<1x16xf32>
    %c0_149 = arith.constant 0 : index
    %c0_150 = arith.constant 0 : index
    %396 = vector.load %arg22[%c0_149, %c0_150] : memref<8x32xf32, #tpu.memory_space<vmem>>, vector<1x16xf32>
    tpu.vector_store %arg22[%c0_149, %c0_150], %395 {strides = array<i32>} : memref<8x32xf32, #tpu.memory_space<vmem>>, vector<1x16xf32>,
    %397 = vector.extract_strided_slice %394 {offsets = [0, 16], sizes = [1, 16], strides = [1, 1]} : vector<1x32xf32> to vector<1x16xf32>
    %c7_151 = arith.constant 7 : index
    %c16_152 = arith.constant 16 : index
    %398 = vector.load %arg22[%c7_151, %c16_152] : memref<8x32xf32, #tpu.memory_space<vmem>>, vector<1x16xf32>
    tpu.vector_store %arg22[%c7_151, %c16_152], %397 {strides = array<i32>} : memref<8x32xf32, #tpu.memory_space<vmem>>, vector<1x16xf32>,
    %c1_153 = arith.constant 1 : index
    %c0_154 = arith.constant 0 : index
    %399 = vector.load %arg21[%c1_153, %c0_154] : memref<8x256xf32, #tpu.memory_space<vmem>>, vector<1x96xf32>
    %c6_155 = arith.constant 6 : index
    %c128_156 = arith.constant 128 : index
    %400 = vector.load %arg21[%c6_155, %c128_156] : memref<8x256xf32, #tpu.memory_space<vmem>>, vector<1x96xf32>
    %401 = arith.addf %399, %400 : vector<1x96xf32>
    %402 = arith.truncf %394 : vector<1x32xf32> to vector<1x32xbf16>
    %cst_157 = arith.constant dense<0.000000e+00> : vector<1x96xf32>
    %403 = tpu.matmul %402, %359, %cst_157 {dimension_numbers = #tpu.dot_dimension_numbers<[1], [0], [0], [1], [0, 0, 1, 1], [], []>} : vector<1x32xbf16>, vector<32x96xbf16>, vector<1x96xf32> -> vector<1x96xf32>
    %404 = arith.addf %403, %361 : vector<1x96xf32>
    %405 = vector.extract_strided_slice %401 {offsets = [0, 0], sizes = [1, 32], strides = [1, 1]} : vector<1x96xf32> to vector<1x32xf32>
    %406 = vector.extract_strided_slice %404 {offsets = [0, 0], sizes = [1, 32], strides = [1, 1]} : vector<1x96xf32> to vector<1x32xf32>
    %407 = arith.addf %405, %406 : vector<1x32xf32>
    %408 = arith.negf %407 : vector<1x32xf32>
    %409 = math.exp %408 : vector<1x32xf32>
    %cst_158 = arith.constant 1.000000e+00 : f32
    %410 = vector.broadcast %cst_158 : f32 to vector<1x32xf32>
    %411 = arith.addf %410, %409 : vector<1x32xf32>
    %412 = arith.divf %410, %411 : vector<1x32xf32>
    %413 = vector.extract_strided_slice %401 {offsets = [0, 32], sizes = [1, 32], strides = [1, 1]} : vector<1x96xf32> to vector<1x32xf32>
    %414 = vector.extract_strided_slice %404 {offsets = [0, 32], sizes = [1, 32], strides = [1, 1]} : vector<1x96xf32> to vector<1x32xf32>
    %415 = arith.addf %413, %414 : vector<1x32xf32>
    %416 = arith.negf %415 : vector<1x32xf32>
    %417 = math.exp %416 : vector<1x32xf32>
    %cst_159 = arith.constant 1.000000e+00 : f32
    %418 = vector.broadcast %cst_159 : f32 to vector<1x32xf32>
    %419 = arith.addf %418, %417 : vector<1x32xf32>
    %420 = arith.divf %418, %419 : vector<1x32xf32>
    %421 = vector.extract_strided_slice %401 {offsets = [0, 64], sizes = [1, 32], strides = [1, 1]} : vector<1x96xf32> to vector<1x32xf32>
    %422 = vector.extract_strided_slice %404 {offsets = [0, 64], sizes = [1, 32], strides = [1, 1]} : vector<1x96xf32> to vector<1x32xf32>
    %423 = arith.mulf %412, %422 : vector<1x32xf32>
    %424 = arith.addf %421, %423 : vector<1x32xf32>
    %425 = math.tanh %424 : vector<1x32xf32>
    %cst_160 = arith.constant 1.000000e+00 : f32
    %426 = vector.broadcast %cst_160 : f32 to vector<1x32xf32>
    %427 = arith.subf %426, %420 : vector<1x32xf32>
    %428 = arith.mulf %427, %425 : vector<1x32xf32>
    %429 = arith.mulf %420, %394 : vector<1x32xf32>
    %430 = arith.addf %428, %429 : vector<1x32xf32>
    %431 = vector.extract_strided_slice %430 {offsets = [0, 0], sizes = [1, 16], strides = [1, 1]} : vector<1x32xf32> to vector<1x16xf32>
    %c1_161 = arith.constant 1 : index
    %c0_162 = arith.constant 0 : index
    %432 = vector.load %arg22[%c1_161, %c0_162] : memref<8x32xf32, #tpu.memory_space<vmem>>, vector<1x16xf32>
    tpu.vector_store %arg22[%c1_161, %c0_162], %431 {strides = array<i32>} : memref<8x32xf32, #tpu.memory_space<vmem>>, vector<1x16xf32>,
    %433 = vector.extract_strided_slice %430 {offsets = [0, 16], sizes = [1, 16], strides = [1, 1]} : vector<1x32xf32> to vector<1x16xf32>
    %c6_163 = arith.constant 6 : index
    %c16_164 = arith.constant 16 : index
    %434 = vector.load %arg22[%c6_163, %c16_164] : memref<8x32xf32, #tpu.memory_space<vmem>>, vector<1x16xf32>
    tpu.vector_store %arg22[%c6_163, %c16_164], %433 {strides = array<i32>} : memref<8x32xf32, #tpu.memory_space<vmem>>, vector<1x16xf32>,
    %c2_165 = arith.constant 2 : index
    %c0_166 = arith.constant 0 : index
    %435 = vector.load %arg21[%c2_165, %c0_166] : memref<8x256xf32, #tpu.memory_space<vmem>>, vector<1x96xf32>
    %c5_167 = arith.constant 5 : index
    %c128_168 = arith.constant 128 : index
    %436 = vector.load %arg21[%c5_167, %c128_168] : memref<8x256xf32, #tpu.memory_space<vmem>>, vector<1x96xf32>
    %437 = arith.addf %435, %436 : vector<1x96xf32>
    %438 = arith.truncf %430 : vector<1x32xf32> to vector<1x32xbf16>
    %cst_169 = arith.constant dense<0.000000e+00> : vector<1x96xf32>
    %439 = tpu.matmul %438, %359, %cst_169 {dimension_numbers = #tpu.dot_dimension_numbers<[1], [0], [0], [1], [0, 0, 1, 1], [], []>} : vector<1x32xbf16>, vector<32x96xbf16>, vector<1x96xf32> -> vector<1x96xf32>
    %440 = arith.addf %439, %361 : vector<1x96xf32>
    %441 = vector.extract_strided_slice %437 {offsets = [0, 0], sizes = [1, 32], strides = [1, 1]} : vector<1x96xf32> to vector<1x32xf32>
    %442 = vector.extract_strided_slice %440 {offsets = [0, 0], sizes = [1, 32], strides = [1, 1]} : vector<1x96xf32> to vector<1x32xf32>
    %443 = arith.addf %441, %442 : vector<1x32xf32>
    %444 = arith.negf %443 : vector<1x32xf32>
    %445 = math.exp %444 : vector<1x32xf32>
    %cst_170 = arith.constant 1.000000e+00 : f32
    %446 = vector.broadcast %cst_170 : f32 to vector<1x32xf32>
    %447 = arith.addf %446, %445 : vector<1x32xf32>
    %448 = arith.divf %446, %447 : vector<1x32xf32>
    %449 = vector.extract_strided_slice %437 {offsets = [0, 32], sizes = [1, 32], strides = [1, 1]} : vector<1x96xf32> to vector<1x32xf32>
    %450 = vector.extract_strided_slice %440 {offsets = [0, 32], sizes = [1, 32], strides = [1, 1]} : vector<1x96xf32> to vector<1x32xf32>
    %451 = arith.addf %449, %450 : vector<1x32xf32>
    %452 = arith.negf %451 : vector<1x32xf32>
    %453 = math.exp %452 : vector<1x32xf32>
    %cst_171 = arith.constant 1.000000e+00 : f32
    %454 = vector.broadcast %cst_171 : f32 to vector<1x32xf32>
    %455 = arith.addf %454, %453 : vector<1x32xf32>
    %456 = arith.divf %454, %455 : vector<1x32xf32>
    %457 = vector.extract_strided_slice %437 {offsets = [0, 64], sizes = [1, 32], strides = [1, 1]} : vector<1x96xf32> to vector<1x32xf32>
    %458 = vector.extract_strided_slice %440 {offsets = [0, 64], sizes = [1, 32], strides = [1, 1]} : vector<1x96xf32> to vector<1x32xf32>
    %459 = arith.mulf %448, %458 : vector<1x32xf32>
    %460 = arith.addf %457, %459 : vector<1x32xf32>
    %461 = math.tanh %460 : vector<1x32xf32>
    %cst_172 = arith.constant 1.000000e+00 : f32
    %462 = vector.broadcast %cst_172 : f32 to vector<1x32xf32>
    %463 = arith.subf %462, %456 : vector<1x32xf32>
    %464 = arith.mulf %463, %461 : vector<1x32xf32>
    %465 = arith.mulf %456, %430 : vector<1x32xf32>
    %466 = arith.addf %464, %465 : vector<1x32xf32>
    %467 = vector.extract_strided_slice %466 {offsets = [0, 0], sizes = [1, 16], strides = [1, 1]} : vector<1x32xf32> to vector<1x16xf32>
    %c2_173 = arith.constant 2 : index
    %c0_174 = arith.constant 0 : index
    %468 = vector.load %arg22[%c2_173, %c0_174] : memref<8x32xf32, #tpu.memory_space<vmem>>, vector<1x16xf32>
    tpu.vector_store %arg22[%c2_173, %c0_174], %467 {strides = array<i32>} : memref<8x32xf32, #tpu.memory_space<vmem>>, vector<1x16xf32>,
    %469 = vector.extract_strided_slice %466 {offsets = [0, 16], sizes = [1, 16], strides = [1, 1]} : vector<1x32xf32> to vector<1x16xf32>
    %c5_175 = arith.constant 5 : index
    %c16_176 = arith.constant 16 : index
    %470 = vector.load %arg22[%c5_175, %c16_176] : memref<8x32xf32, #tpu.memory_space<vmem>>, vector<1x16xf32>
    tpu.vector_store %arg22[%c5_175, %c16_176], %469 {strides = array<i32>} : memref<8x32xf32, #tpu.memory_space<vmem>>, vector<1x16xf32>,
    %c3_177 = arith.constant 3 : index
    %c0_178 = arith.constant 0 : index
    %471 = vector.load %arg21[%c3_177, %c0_178] : memref<8x256xf32, #tpu.memory_space<vmem>>, vector<1x96xf32>
    %c4_179 = arith.constant 4 : index
    %c128_180 = arith.constant 128 : index
    %472 = vector.load %arg21[%c4_179, %c128_180] : memref<8x256xf32, #tpu.memory_space<vmem>>, vector<1x96xf32>
    %473 = arith.addf %471, %472 : vector<1x96xf32>
    %474 = arith.truncf %466 : vector<1x32xf32> to vector<1x32xbf16>
    %cst_181 = arith.constant dense<0.000000e+00> : vector<1x96xf32>
    %475 = tpu.matmul %474, %359, %cst_181 {dimension_numbers = #tpu.dot_dimension_numbers<[1], [0], [0], [1], [0, 0, 1, 1], [], []>} : vector<1x32xbf16>, vector<32x96xbf16>, vector<1x96xf32> -> vector<1x96xf32>
    %476 = arith.addf %475, %361 : vector<1x96xf32>
    %477 = vector.extract_strided_slice %473 {offsets = [0, 0], sizes = [1, 32], strides = [1, 1]} : vector<1x96xf32> to vector<1x32xf32>
    %478 = vector.extract_strided_slice %476 {offsets = [0, 0], sizes = [1, 32], strides = [1, 1]} : vector<1x96xf32> to vector<1x32xf32>
    %479 = arith.addf %477, %478 : vector<1x32xf32>
    %480 = arith.negf %479 : vector<1x32xf32>
    %481 = math.exp %480 : vector<1x32xf32>
    %cst_182 = arith.constant 1.000000e+00 : f32
    %482 = vector.broadcast %cst_182 : f32 to vector<1x32xf32>
    %483 = arith.addf %482, %481 : vector<1x32xf32>
    %484 = arith.divf %482, %483 : vector<1x32xf32>
    %485 = vector.extract_strided_slice %473 {offsets = [0, 32], sizes = [1, 32], strides = [1, 1]} : vector<1x96xf32> to vector<1x32xf32>
    %486 = vector.extract_strided_slice %476 {offsets = [0, 32], sizes = [1, 32], strides = [1, 1]} : vector<1x96xf32> to vector<1x32xf32>
    %487 = arith.addf %485, %486 : vector<1x32xf32>
    %488 = arith.negf %487 : vector<1x32xf32>
    %489 = math.exp %488 : vector<1x32xf32>
    %cst_183 = arith.constant 1.000000e+00 : f32
    %490 = vector.broadcast %cst_183 : f32 to vector<1x32xf32>
    %491 = arith.addf %490, %489 : vector<1x32xf32>
    %492 = arith.divf %490, %491 : vector<1x32xf32>
    %493 = vector.extract_strided_slice %473 {offsets = [0, 64], sizes = [1, 32], strides = [1, 1]} : vector<1x96xf32> to vector<1x32xf32>
    %494 = vector.extract_strided_slice %476 {offsets = [0, 64], sizes = [1, 32], strides = [1, 1]} : vector<1x96xf32> to vector<1x32xf32>
    %495 = arith.mulf %484, %494 : vector<1x32xf32>
    %496 = arith.addf %493, %495 : vector<1x32xf32>
    %497 = math.tanh %496 : vector<1x32xf32>
    %cst_184 = arith.constant 1.000000e+00 : f32
    %498 = vector.broadcast %cst_184 : f32 to vector<1x32xf32>
    %499 = arith.subf %498, %492 : vector<1x32xf32>
    %500 = arith.mulf %499, %497 : vector<1x32xf32>
    %501 = arith.mulf %492, %466 : vector<1x32xf32>
    %502 = arith.addf %500, %501 : vector<1x32xf32>
    %503 = vector.extract_strided_slice %502 {offsets = [0, 0], sizes = [1, 16], strides = [1, 1]} : vector<1x32xf32> to vector<1x16xf32>
    %c3_185 = arith.constant 3 : index
    %c0_186 = arith.constant 0 : index
    %504 = vector.load %arg22[%c3_185, %c0_186] : memref<8x32xf32, #tpu.memory_space<vmem>>, vector<1x16xf32>
    tpu.vector_store %arg22[%c3_185, %c0_186], %503 {strides = array<i32>} : memref<8x32xf32, #tpu.memory_space<vmem>>, vector<1x16xf32>,
    %505 = vector.extract_strided_slice %502 {offsets = [0, 16], sizes = [1, 16], strides = [1, 1]} : vector<1x32xf32> to vector<1x16xf32>
    %c4_187 = arith.constant 4 : index
    %c16_188 = arith.constant 16 : index
    %506 = vector.load %arg22[%c4_187, %c16_188] : memref<8x32xf32, #tpu.memory_space<vmem>>, vector<1x16xf32>
    tpu.vector_store %arg22[%c4_187, %c16_188], %505 {strides = array<i32>} : memref<8x32xf32, #tpu.memory_space<vmem>>, vector<1x16xf32>,
    %c4_189 = arith.constant 4 : index
    %c0_190 = arith.constant 0 : index
    %507 = vector.load %arg21[%c4_189, %c0_190] : memref<8x256xf32, #tpu.memory_space<vmem>>, vector<1x96xf32>
    %c3_191 = arith.constant 3 : index
    %c128_192 = arith.constant 128 : index
    %508 = vector.load %arg21[%c3_191, %c128_192] : memref<8x256xf32, #tpu.memory_space<vmem>>, vector<1x96xf32>
    %509 = arith.addf %507, %508 : vector<1x96xf32>
    %510 = arith.truncf %502 : vector<1x32xf32> to vector<1x32xbf16>
    %cst_193 = arith.constant dense<0.000000e+00> : vector<1x96xf32>
    %511 = tpu.matmul %510, %359, %cst_193 {dimension_numbers = #tpu.dot_dimension_numbers<[1], [0], [0], [1], [0, 0, 1, 1], [], []>} : vector<1x32xbf16>, vector<32x96xbf16>, vector<1x96xf32> -> vector<1x96xf32>
    %512 = arith.addf %511, %361 : vector<1x96xf32>
    %513 = vector.extract_strided_slice %509 {offsets = [0, 0], sizes = [1, 32], strides = [1, 1]} : vector<1x96xf32> to vector<1x32xf32>
    %514 = vector.extract_strided_slice %512 {offsets = [0, 0], sizes = [1, 32], strides = [1, 1]} : vector<1x96xf32> to vector<1x32xf32>
    %515 = arith.addf %513, %514 : vector<1x32xf32>
    %516 = arith.negf %515 : vector<1x32xf32>
    %517 = math.exp %516 : vector<1x32xf32>
    %cst_194 = arith.constant 1.000000e+00 : f32
    %518 = vector.broadcast %cst_194 : f32 to vector<1x32xf32>
    %519 = arith.addf %518, %517 : vector<1x32xf32>
    %520 = arith.divf %518, %519 : vector<1x32xf32>
    %521 = vector.extract_strided_slice %509 {offsets = [0, 32], sizes = [1, 32], strides = [1, 1]} : vector<1x96xf32> to vector<1x32xf32>
    %522 = vector.extract_strided_slice %512 {offsets = [0, 32], sizes = [1, 32], strides = [1, 1]} : vector<1x96xf32> to vector<1x32xf32>
    %523 = arith.addf %521, %522 : vector<1x32xf32>
    %524 = arith.negf %523 : vector<1x32xf32>
    %525 = math.exp %524 : vector<1x32xf32>
    %cst_195 = arith.constant 1.000000e+00 : f32
    %526 = vector.broadcast %cst_195 : f32 to vector<1x32xf32>
    %527 = arith.addf %526, %525 : vector<1x32xf32>
    %528 = arith.divf %526, %527 : vector<1x32xf32>
    %529 = vector.extract_strided_slice %509 {offsets = [0, 64], sizes = [1, 32], strides = [1, 1]} : vector<1x96xf32> to vector<1x32xf32>
    %530 = vector.extract_strided_slice %512 {offsets = [0, 64], sizes = [1, 32], strides = [1, 1]} : vector<1x96xf32> to vector<1x32xf32>
    %531 = arith.mulf %520, %530 : vector<1x32xf32>
    %532 = arith.addf %529, %531 : vector<1x32xf32>
    %533 = math.tanh %532 : vector<1x32xf32>
    %cst_196 = arith.constant 1.000000e+00 : f32
    %534 = vector.broadcast %cst_196 : f32 to vector<1x32xf32>
    %535 = arith.subf %534, %528 : vector<1x32xf32>
    %536 = arith.mulf %535, %533 : vector<1x32xf32>
    %537 = arith.mulf %528, %502 : vector<1x32xf32>
    %538 = arith.addf %536, %537 : vector<1x32xf32>
    %539 = vector.extract_strided_slice %538 {offsets = [0, 0], sizes = [1, 16], strides = [1, 1]} : vector<1x32xf32> to vector<1x16xf32>
    %c4_197 = arith.constant 4 : index
    %c0_198 = arith.constant 0 : index
    %540 = vector.load %arg22[%c4_197, %c0_198] : memref<8x32xf32, #tpu.memory_space<vmem>>, vector<1x16xf32>
    tpu.vector_store %arg22[%c4_197, %c0_198], %539 {strides = array<i32>} : memref<8x32xf32, #tpu.memory_space<vmem>>, vector<1x16xf32>,
    %541 = vector.extract_strided_slice %538 {offsets = [0, 16], sizes = [1, 16], strides = [1, 1]} : vector<1x32xf32> to vector<1x16xf32>
    %c3_199 = arith.constant 3 : index
    %c16_200 = arith.constant 16 : index
    %542 = vector.load %arg22[%c3_199, %c16_200] : memref<8x32xf32, #tpu.memory_space<vmem>>, vector<1x16xf32>
    tpu.vector_store %arg22[%c3_199, %c16_200], %541 {strides = array<i32>} : memref<8x32xf32, #tpu.memory_space<vmem>>, vector<1x16xf32>,
    %c5_201 = arith.constant 5 : index
    %c0_202 = arith.constant 0 : index
    %543 = vector.load %arg21[%c5_201, %c0_202] : memref<8x256xf32, #tpu.memory_space<vmem>>, vector<1x96xf32>
    %c2_203 = arith.constant 2 : index
    %c128_204 = arith.constant 128 : index
    %544 = vector.load %arg21[%c2_203, %c128_204] : memref<8x256xf32, #tpu.memory_space<vmem>>, vector<1x96xf32>
    %545 = arith.addf %543, %544 : vector<1x96xf32>
    %546 = arith.truncf %538 : vector<1x32xf32> to vector<1x32xbf16>
    %cst_205 = arith.constant dense<0.000000e+00> : vector<1x96xf32>
    %547 = tpu.matmul %546, %359, %cst_205 {dimension_numbers = #tpu.dot_dimension_numbers<[1], [0], [0], [1], [0, 0, 1, 1], [], []>} : vector<1x32xbf16>, vector<32x96xbf16>, vector<1x96xf32> -> vector<1x96xf32>
    %548 = arith.addf %547, %361 : vector<1x96xf32>
    %549 = vector.extract_strided_slice %545 {offsets = [0, 0], sizes = [1, 32], strides = [1, 1]} : vector<1x96xf32> to vector<1x32xf32>
    %550 = vector.extract_strided_slice %548 {offsets = [0, 0], sizes = [1, 32], strides = [1, 1]} : vector<1x96xf32> to vector<1x32xf32>
    %551 = arith.addf %549, %550 : vector<1x32xf32>
    %552 = arith.negf %551 : vector<1x32xf32>
    %553 = math.exp %552 : vector<1x32xf32>
    %cst_206 = arith.constant 1.000000e+00 : f32
    %554 = vector.broadcast %cst_206 : f32 to vector<1x32xf32>
    %555 = arith.addf %554, %553 : vector<1x32xf32>
    %556 = arith.divf %554, %555 : vector<1x32xf32>
    %557 = vector.extract_strided_slice %545 {offsets = [0, 32], sizes = [1, 32], strides = [1, 1]} : vector<1x96xf32> to vector<1x32xf32>
    %558 = vector.extract_strided_slice %548 {offsets = [0, 32], sizes = [1, 32], strides = [1, 1]} : vector<1x96xf32> to vector<1x32xf32>
    %559 = arith.addf %557, %558 : vector<1x32xf32>
    %560 = arith.negf %559 : vector<1x32xf32>
    %561 = math.exp %560 : vector<1x32xf32>
    %cst_207 = arith.constant 1.000000e+00 : f32
    %562 = vector.broadcast %cst_207 : f32 to vector<1x32xf32>
    %563 = arith.addf %562, %561 : vector<1x32xf32>
    %564 = arith.divf %562, %563 : vector<1x32xf32>
    %565 = vector.extract_strided_slice %545 {offsets = [0, 64], sizes = [1, 32], strides = [1, 1]} : vector<1x96xf32> to vector<1x32xf32>
    %566 = vector.extract_strided_slice %548 {offsets = [0, 64], sizes = [1, 32], strides = [1, 1]} : vector<1x96xf32> to vector<1x32xf32>
    %567 = arith.mulf %556, %566 : vector<1x32xf32>
    %568 = arith.addf %565, %567 : vector<1x32xf32>
    %569 = math.tanh %568 : vector<1x32xf32>
    %cst_208 = arith.constant 1.000000e+00 : f32
    %570 = vector.broadcast %cst_208 : f32 to vector<1x32xf32>
    %571 = arith.subf %570, %564 : vector<1x32xf32>
    %572 = arith.mulf %571, %569 : vector<1x32xf32>
    %573 = arith.mulf %564, %538 : vector<1x32xf32>
    %574 = arith.addf %572, %573 : vector<1x32xf32>
    %575 = vector.extract_strided_slice %574 {offsets = [0, 0], sizes = [1, 16], strides = [1, 1]} : vector<1x32xf32> to vector<1x16xf32>
    %c5_209 = arith.constant 5 : index
    %c0_210 = arith.constant 0 : index
    %576 = vector.load %arg22[%c5_209, %c0_210] : memref<8x32xf32, #tpu.memory_space<vmem>>, vector<1x16xf32>
    tpu.vector_store %arg22[%c5_209, %c0_210], %575 {strides = array<i32>} : memref<8x32xf32, #tpu.memory_space<vmem>>, vector<1x16xf32>,
    %577 = vector.extract_strided_slice %574 {offsets = [0, 16], sizes = [1, 16], strides = [1, 1]} : vector<1x32xf32> to vector<1x16xf32>
    %c2_211 = arith.constant 2 : index
    %c16_212 = arith.constant 16 : index
    %578 = vector.load %arg22[%c2_211, %c16_212] : memref<8x32xf32, #tpu.memory_space<vmem>>, vector<1x16xf32>
    tpu.vector_store %arg22[%c2_211, %c16_212], %577 {strides = array<i32>} : memref<8x32xf32, #tpu.memory_space<vmem>>, vector<1x16xf32>,
    %c6_213 = arith.constant 6 : index
    %c0_214 = arith.constant 0 : index
    %579 = vector.load %arg21[%c6_213, %c0_214] : memref<8x256xf32, #tpu.memory_space<vmem>>, vector<1x96xf32>
    %c1_215 = arith.constant 1 : index
    %c128_216 = arith.constant 128 : index
    %580 = vector.load %arg21[%c1_215, %c128_216] : memref<8x256xf32, #tpu.memory_space<vmem>>, vector<1x96xf32>
    %581 = arith.addf %579, %580 : vector<1x96xf32>
    %582 = arith.truncf %574 : vector<1x32xf32> to vector<1x32xbf16>
    %cst_217 = arith.constant dense<0.000000e+00> : vector<1x96xf32>
    %583 = tpu.matmul %582, %359, %cst_217 {dimension_numbers = #tpu.dot_dimension_numbers<[1], [0], [0], [1], [0, 0, 1, 1], [], []>} : vector<1x32xbf16>, vector<32x96xbf16>, vector<1x96xf32> -> vector<1x96xf32>
    %584 = arith.addf %583, %361 : vector<1x96xf32>
    %585 = vector.extract_strided_slice %581 {offsets = [0, 0], sizes = [1, 32], strides = [1, 1]} : vector<1x96xf32> to vector<1x32xf32>
    %586 = vector.extract_strided_slice %584 {offsets = [0, 0], sizes = [1, 32], strides = [1, 1]} : vector<1x96xf32> to vector<1x32xf32>
    %587 = arith.addf %585, %586 : vector<1x32xf32>
    %588 = arith.negf %587 : vector<1x32xf32>
    %589 = math.exp %588 : vector<1x32xf32>
    %cst_218 = arith.constant 1.000000e+00 : f32
    %590 = vector.broadcast %cst_218 : f32 to vector<1x32xf32>
    %591 = arith.addf %590, %589 : vector<1x32xf32>
    %592 = arith.divf %590, %591 : vector<1x32xf32>
    %593 = vector.extract_strided_slice %581 {offsets = [0, 32], sizes = [1, 32], strides = [1, 1]} : vector<1x96xf32> to vector<1x32xf32>
    %594 = vector.extract_strided_slice %584 {offsets = [0, 32], sizes = [1, 32], strides = [1, 1]} : vector<1x96xf32> to vector<1x32xf32>
    %595 = arith.addf %593, %594 : vector<1x32xf32>
    %596 = arith.negf %595 : vector<1x32xf32>
    %597 = math.exp %596 : vector<1x32xf32>
    %cst_219 = arith.constant 1.000000e+00 : f32
    %598 = vector.broadcast %cst_219 : f32 to vector<1x32xf32>
    %599 = arith.addf %598, %597 : vector<1x32xf32>
    %600 = arith.divf %598, %599 : vector<1x32xf32>
    %601 = vector.extract_strided_slice %581 {offsets = [0, 64], sizes = [1, 32], strides = [1, 1]} : vector<1x96xf32> to vector<1x32xf32>
    %602 = vector.extract_strided_slice %584 {offsets = [0, 64], sizes = [1, 32], strides = [1, 1]} : vector<1x96xf32> to vector<1x32xf32>
    %603 = arith.mulf %592, %602 : vector<1x32xf32>
    %604 = arith.addf %601, %603 : vector<1x32xf32>
    %605 = math.tanh %604 : vector<1x32xf32>
    %cst_220 = arith.constant 1.000000e+00 : f32
    %606 = vector.broadcast %cst_220 : f32 to vector<1x32xf32>
    %607 = arith.subf %606, %600 : vector<1x32xf32>
    %608 = arith.mulf %607, %605 : vector<1x32xf32>
    %609 = arith.mulf %600, %574 : vector<1x32xf32>
    %610 = arith.addf %608, %609 : vector<1x32xf32>
    %611 = vector.extract_strided_slice %610 {offsets = [0, 0], sizes = [1, 16], strides = [1, 1]} : vector<1x32xf32> to vector<1x16xf32>
    %c6_221 = arith.constant 6 : index
    %c0_222 = arith.constant 0 : index
    %612 = vector.load %arg22[%c6_221, %c0_222] : memref<8x32xf32, #tpu.memory_space<vmem>>, vector<1x16xf32>
    tpu.vector_store %arg22[%c6_221, %c0_222], %611 {strides = array<i32>} : memref<8x32xf32, #tpu.memory_space<vmem>>, vector<1x16xf32>,
    %613 = vector.extract_strided_slice %610 {offsets = [0, 16], sizes = [1, 16], strides = [1, 1]} : vector<1x32xf32> to vector<1x16xf32>
    %c1_223 = arith.constant 1 : index
    %c16_224 = arith.constant 16 : index
    %614 = vector.load %arg22[%c1_223, %c16_224] : memref<8x32xf32, #tpu.memory_space<vmem>>, vector<1x16xf32>
    tpu.vector_store %arg22[%c1_223, %c16_224], %613 {strides = array<i32>} : memref<8x32xf32, #tpu.memory_space<vmem>>, vector<1x16xf32>,
    %c7_225 = arith.constant 7 : index
    %c0_226 = arith.constant 0 : index
    %615 = vector.load %arg21[%c7_225, %c0_226] : memref<8x256xf32, #tpu.memory_space<vmem>>, vector<1x96xf32>
    %c0_227 = arith.constant 0 : index
    %c128_228 = arith.constant 128 : index
    %616 = vector.load %arg21[%c0_227, %c128_228] : memref<8x256xf32, #tpu.memory_space<vmem>>, vector<1x96xf32>
    %617 = arith.addf %615, %616 : vector<1x96xf32>
    %618 = arith.truncf %610 : vector<1x32xf32> to vector<1x32xbf16>
    %cst_229 = arith.constant dense<0.000000e+00> : vector<1x96xf32>
    %619 = tpu.matmul %618, %359, %cst_229 {dimension_numbers = #tpu.dot_dimension_numbers<[1], [0], [0], [1], [0, 0, 1, 1], [], []>} : vector<1x32xbf16>, vector<32x96xbf16>, vector<1x96xf32> -> vector<1x96xf32>
    %620 = arith.addf %619, %361 : vector<1x96xf32>
    %621 = vector.extract_strided_slice %617 {offsets = [0, 0], sizes = [1, 32], strides = [1, 1]} : vector<1x96xf32> to vector<1x32xf32>
    %622 = vector.extract_strided_slice %620 {offsets = [0, 0], sizes = [1, 32], strides = [1, 1]} : vector<1x96xf32> to vector<1x32xf32>
    %623 = arith.addf %621, %622 : vector<1x32xf32>
    %624 = arith.negf %623 : vector<1x32xf32>
    %625 = math.exp %624 : vector<1x32xf32>
    %cst_230 = arith.constant 1.000000e+00 : f32
    %626 = vector.broadcast %cst_230 : f32 to vector<1x32xf32>
    %627 = arith.addf %626, %625 : vector<1x32xf32>
    %628 = arith.divf %626, %627 : vector<1x32xf32>
    %629 = vector.extract_strided_slice %617 {offsets = [0, 32], sizes = [1, 32], strides = [1, 1]} : vector<1x96xf32> to vector<1x32xf32>
    %630 = vector.extract_strided_slice %620 {offsets = [0, 32], sizes = [1, 32], strides = [1, 1]} : vector<1x96xf32> to vector<1x32xf32>
    %631 = arith.addf %629, %630 : vector<1x32xf32>
    %632 = arith.negf %631 : vector<1x32xf32>
    %633 = math.exp %632 : vector<1x32xf32>
    %cst_231 = arith.constant 1.000000e+00 : f32
    %634 = vector.broadcast %cst_231 : f32 to vector<1x32xf32>
    %635 = arith.addf %634, %633 : vector<1x32xf32>
    %636 = arith.divf %634, %635 : vector<1x32xf32>
    %637 = vector.extract_strided_slice %617 {offsets = [0, 64], sizes = [1, 32], strides = [1, 1]} : vector<1x96xf32> to vector<1x32xf32>
    %638 = vector.extract_strided_slice %620 {offsets = [0, 64], sizes = [1, 32], strides = [1, 1]} : vector<1x96xf32> to vector<1x32xf32>
    %639 = arith.mulf %628, %638 : vector<1x32xf32>
    %640 = arith.addf %637, %639 : vector<1x32xf32>
    %641 = math.tanh %640 : vector<1x32xf32>
    %cst_232 = arith.constant 1.000000e+00 : f32
    %642 = vector.broadcast %cst_232 : f32 to vector<1x32xf32>
    %643 = arith.subf %642, %636 : vector<1x32xf32>
    %644 = arith.mulf %643, %641 : vector<1x32xf32>
    %645 = arith.mulf %636, %610 : vector<1x32xf32>
    %646 = arith.addf %644, %645 : vector<1x32xf32>
    %647 = vector.extract_strided_slice %646 {offsets = [0, 0], sizes = [1, 16], strides = [1, 1]} : vector<1x32xf32> to vector<1x16xf32>
    %c7_233 = arith.constant 7 : index
    %c0_234 = arith.constant 0 : index
    %648 = vector.load %arg22[%c7_233, %c0_234] : memref<8x32xf32, #tpu.memory_space<vmem>>, vector<1x16xf32>
    tpu.vector_store %arg22[%c7_233, %c0_234], %647 {strides = array<i32>} : memref<8x32xf32, #tpu.memory_space<vmem>>, vector<1x16xf32>,
    %649 = vector.extract_strided_slice %646 {offsets = [0, 16], sizes = [1, 16], strides = [1, 1]} : vector<1x32xf32> to vector<1x16xf32>
    %c0_235 = arith.constant 0 : index
    %c16_236 = arith.constant 16 : index
    %650 = vector.load %arg22[%c0_235, %c16_236] : memref<8x32xf32, #tpu.memory_space<vmem>>, vector<1x16xf32>
    tpu.vector_store %arg22[%c0_235, %c16_236], %649 {strides = array<i32>} : memref<8x32xf32, #tpu.memory_space<vmem>>, vector<1x16xf32>,
    %c0_237 = arith.constant 0 : index
    %c0_238 = arith.constant 0 : index
    %651 = vector.load %arg22[%c0_237, %c0_238] : memref<8x32xf32, #tpu.memory_space<vmem>>, vector<8x32xf32>
    %652 = arith.truncf %651 : vector<8x32xf32> to vector<8x32xbf16>
    %cst_239 = arith.constant dense<0.000000e+00> : vector<8x64xf32>
    %653 = tpu.matmul %652, %31, %cst_239 {dimension_numbers = #tpu.dot_dimension_numbers<[1], [0], [0], [1], [0, 0, 1, 1], [], []>} : vector<8x32xbf16>, vector<32x64xbf16>, vector<8x64xf32> -> vector<8x64xf32>
    %654 = vector.broadcast %32 : vector<1x64xf32> to vector<8x64xf32>
    %655 = arith.addf %653, %654 : vector<8x64xf32>
    %656 = vector.extract_strided_slice %655 {offsets = [0, 0], sizes = [8, 32], strides = [1, 1]} : vector<8x64xf32> to vector<8x32xf32>
    %657 = vector.extract_strided_slice %655 {offsets = [0, 32], sizes = [8, 32], strides = [1, 1]} : vector<8x64xf32> to vector<8x32xf32>
    %658 = arith.negf %656 : vector<8x32xf32>
    %659 = math.exp %658 : vector<8x32xf32>
    %cst_240 = arith.constant 1.000000e+00 : f32
    %660 = vector.broadcast %cst_240 : f32 to vector<8x32xf32>
    %661 = arith.addf %660, %659 : vector<8x32xf32>
    %662 = arith.divf %660, %661 : vector<8x32xf32>
    %663 = arith.mulf %656, %662 : vector<8x32xf32>
    %664 = arith.mulf %663, %657 : vector<8x32xf32>
    %665 = arith.truncf %664 : vector<8x32xf32> to vector<8x32xbf16>
    %c2_241 = arith.constant 2 : index
    %c0_242 = arith.constant 0 : index
    %c0_243 = arith.constant 0 : index
    %666 = vector.load %arg8[%c2_241, %c0_242, %c0_243] : memref<3x32x256xbf16, #tpu.memory_space<vmem>>, vector<1x32x256xbf16>
    %667 = vector.shape_cast %666 : vector<1x32x256xbf16> to vector<32x256xbf16>
    %cst_244 = arith.constant dense<0.000000e+00> : vector<8x256xf32>
    %668 = tpu.matmul %665, %667, %cst_244 {dimension_numbers = #tpu.dot_dimension_numbers<[1], [0], [0], [1], [0, 0, 1, 1], [], []>} : vector<8x32xbf16>, vector<32x256xbf16>, vector<8x256xf32> -> vector<8x256xf32>
    %c2_245 = arith.constant 2 : index
    %c0_246 = arith.constant 0 : index
    %c0_247 = arith.constant 0 : index
    %669 = vector.load %arg9[%c2_245, %c0_246, %c0_247] : memref<3x1x256xf32, #tpu.memory_space<vmem>>, vector<1x1x256xf32>
    %670 = vector.shape_cast %669 : vector<1x1x256xf32> to vector<1x256xf32>
    %671 = vector.broadcast %670 : vector<1x256xf32> to vector<8x256xf32>
    %672 = arith.addf %668, %671 : vector<8x256xf32>
    %c0_248 = arith.constant 0 : index
    %c0_249 = arith.constant 0 : index
    %673 = vector.load %arg21[%c0_248, %c0_249] : memref<8x256xf32, #tpu.memory_space<vmem>>, vector<8x256xf32>
    tpu.vector_store %arg21[%c0_248, %c0_249], %672 {strides = array<i32>} : memref<8x256xf32, #tpu.memory_space<vmem>>, vector<8x256xf32>,
    %c2_250 = arith.constant 2 : index
    %c0_251 = arith.constant 0 : index
    %c0_252 = arith.constant 0 : index
    %674 = vector.load %arg10[%c2_250, %c0_251, %c0_252] : memref<3x32x96xbf16, #tpu.memory_space<vmem>>, vector<1x32x96xbf16>
    %675 = vector.shape_cast %674 : vector<1x32x96xbf16> to vector<32x96xbf16>
    %c2_253 = arith.constant 2 : index
    %c0_254 = arith.constant 0 : index
    %c0_255 = arith.constant 0 : index
    %676 = vector.load %arg11[%c2_253, %c0_254, %c0_255] : memref<3x1x96xf32, #tpu.memory_space<vmem>>, vector<1x1x96xf32>
    %677 = vector.shape_cast %676 : vector<1x1x96xf32> to vector<1x96xf32>
    %cst_256 = arith.constant 0.000000e+00 : f32
    %678 = vector.broadcast %cst_256 : f32 to vector<1x32xf32>
    %c0_257 = arith.constant 0 : index
    %c0_258 = arith.constant 0 : index
    %679 = vector.load %arg21[%c0_257, %c0_258] : memref<8x256xf32, #tpu.memory_space<vmem>>, vector<1x96xf32>
    %c7_259 = arith.constant 7 : index
    %c128_260 = arith.constant 128 : index
    %680 = vector.load %arg21[%c7_259, %c128_260] : memref<8x256xf32, #tpu.memory_space<vmem>>, vector<1x96xf32>
    %681 = arith.addf %679, %680 : vector<1x96xf32>
    %682 = arith.truncf %678 : vector<1x32xf32> to vector<1x32xbf16>
    %cst_261 = arith.constant dense<0.000000e+00> : vector<1x96xf32>
    %683 = tpu.matmul %682, %675, %cst_261 {dimension_numbers = #tpu.dot_dimension_numbers<[1], [0], [0], [1], [0, 0, 1, 1], [], []>} : vector<1x32xbf16>, vector<32x96xbf16>, vector<1x96xf32> -> vector<1x96xf32>
    %684 = arith.addf %683, %677 : vector<1x96xf32>
    %685 = vector.extract_strided_slice %681 {offsets = [0, 0], sizes = [1, 32], strides = [1, 1]} : vector<1x96xf32> to vector<1x32xf32>
    %686 = vector.extract_strided_slice %684 {offsets = [0, 0], sizes = [1, 32], strides = [1, 1]} : vector<1x96xf32> to vector<1x32xf32>
    %687 = arith.addf %685, %686 : vector<1x32xf32>
    %688 = arith.negf %687 : vector<1x32xf32>
    %689 = math.exp %688 : vector<1x32xf32>
    %cst_262 = arith.constant 1.000000e+00 : f32
    %690 = vector.broadcast %cst_262 : f32 to vector<1x32xf32>
    %691 = arith.addf %690, %689 : vector<1x32xf32>
    %692 = arith.divf %690, %691 : vector<1x32xf32>
    %693 = vector.extract_strided_slice %681 {offsets = [0, 32], sizes = [1, 32], strides = [1, 1]} : vector<1x96xf32> to vector<1x32xf32>
    %694 = vector.extract_strided_slice %684 {offsets = [0, 32], sizes = [1, 32], strides = [1, 1]} : vector<1x96xf32> to vector<1x32xf32>
    %695 = arith.addf %693, %694 : vector<1x32xf32>
    %696 = arith.negf %695 : vector<1x32xf32>
    %697 = math.exp %696 : vector<1x32xf32>
    %cst_263 = arith.constant 1.000000e+00 : f32
    %698 = vector.broadcast %cst_263 : f32 to vector<1x32xf32>
    %699 = arith.addf %698, %697 : vector<1x32xf32>
    %700 = arith.divf %698, %699 : vector<1x32xf32>
    %701 = vector.extract_strided_slice %681 {offsets = [0, 64], sizes = [1, 32], strides = [1, 1]} : vector<1x96xf32> to vector<1x32xf32>
    %702 = vector.extract_strided_slice %684 {offsets = [0, 64], sizes = [1, 32], strides = [1, 1]} : vector<1x96xf32> to vector<1x32xf32>
    %703 = arith.mulf %692, %702 : vector<1x32xf32>
    %704 = arith.addf %701, %703 : vector<1x32xf32>
    %705 = math.tanh %704 : vector<1x32xf32>
    %cst_264 = arith.constant 1.000000e+00 : f32
    %706 = vector.broadcast %cst_264 : f32 to vector<1x32xf32>
    %707 = arith.subf %706, %700 : vector<1x32xf32>
    %708 = arith.mulf %707, %705 : vector<1x32xf32>
    %709 = arith.mulf %700, %678 : vector<1x32xf32>
    %710 = arith.addf %708, %709 : vector<1x32xf32>
    %711 = vector.extract_strided_slice %710 {offsets = [0, 0], sizes = [1, 16], strides = [1, 1]} : vector<1x32xf32> to vector<1x16xf32>
    %c0_265 = arith.constant 0 : index
    %c0_266 = arith.constant 0 : index
    %712 = vector.load %arg22[%c0_265, %c0_266] : memref<8x32xf32, #tpu.memory_space<vmem>>, vector<1x16xf32>
    tpu.vector_store %arg22[%c0_265, %c0_266], %711 {strides = array<i32>} : memref<8x32xf32, #tpu.memory_space<vmem>>, vector<1x16xf32>,
    %713 = vector.extract_strided_slice %710 {offsets = [0, 16], sizes = [1, 16], strides = [1, 1]} : vector<1x32xf32> to vector<1x16xf32>
    %c7_267 = arith.constant 7 : index
    %c16_268 = arith.constant 16 : index
    %714 = vector.load %arg22[%c7_267, %c16_268] : memref<8x32xf32, #tpu.memory_space<vmem>>, vector<1x16xf32>
    tpu.vector_store %arg22[%c7_267, %c16_268], %713 {strides = array<i32>} : memref<8x32xf32, #tpu.memory_space<vmem>>, vector<1x16xf32>,
    %c1_269 = arith.constant 1 : index
    %c0_270 = arith.constant 0 : index
    %715 = vector.load %arg21[%c1_269, %c0_270] : memref<8x256xf32, #tpu.memory_space<vmem>>, vector<1x96xf32>
    %c6_271 = arith.constant 6 : index
    %c128_272 = arith.constant 128 : index
    %716 = vector.load %arg21[%c6_271, %c128_272] : memref<8x256xf32, #tpu.memory_space<vmem>>, vector<1x96xf32>
    %717 = arith.addf %715, %716 : vector<1x96xf32>
    %718 = arith.truncf %710 : vector<1x32xf32> to vector<1x32xbf16>
    %cst_273 = arith.constant dense<0.000000e+00> : vector<1x96xf32>
    %719 = tpu.matmul %718, %675, %cst_273 {dimension_numbers = #tpu.dot_dimension_numbers<[1], [0], [0], [1], [0, 0, 1, 1], [], []>} : vector<1x32xbf16>, vector<32x96xbf16>, vector<1x96xf32> -> vector<1x96xf32>
    %720 = arith.addf %719, %677 : vector<1x96xf32>
    %721 = vector.extract_strided_slice %717 {offsets = [0, 0], sizes = [1, 32], strides = [1, 1]} : vector<1x96xf32> to vector<1x32xf32>
    %722 = vector.extract_strided_slice %720 {offsets = [0, 0], sizes = [1, 32], strides = [1, 1]} : vector<1x96xf32> to vector<1x32xf32>
    %723 = arith.addf %721, %722 : vector<1x32xf32>
    %724 = arith.negf %723 : vector<1x32xf32>
    %725 = math.exp %724 : vector<1x32xf32>
    %cst_274 = arith.constant 1.000000e+00 : f32
    %726 = vector.broadcast %cst_274 : f32 to vector<1x32xf32>
    %727 = arith.addf %726, %725 : vector<1x32xf32>
    %728 = arith.divf %726, %727 : vector<1x32xf32>
    %729 = vector.extract_strided_slice %717 {offsets = [0, 32], sizes = [1, 32], strides = [1, 1]} : vector<1x96xf32> to vector<1x32xf32>
    %730 = vector.extract_strided_slice %720 {offsets = [0, 32], sizes = [1, 32], strides = [1, 1]} : vector<1x96xf32> to vector<1x32xf32>
    %731 = arith.addf %729, %730 : vector<1x32xf32>
    %732 = arith.negf %731 : vector<1x32xf32>
    %733 = math.exp %732 : vector<1x32xf32>
    %cst_275 = arith.constant 1.000000e+00 : f32
    %734 = vector.broadcast %cst_275 : f32 to vector<1x32xf32>
    %735 = arith.addf %734, %733 : vector<1x32xf32>
    %736 = arith.divf %734, %735 : vector<1x32xf32>
    %737 = vector.extract_strided_slice %717 {offsets = [0, 64], sizes = [1, 32], strides = [1, 1]} : vector<1x96xf32> to vector<1x32xf32>
    %738 = vector.extract_strided_slice %720 {offsets = [0, 64], sizes = [1, 32], strides = [1, 1]} : vector<1x96xf32> to vector<1x32xf32>
    %739 = arith.mulf %728, %738 : vector<1x32xf32>
    %740 = arith.addf %737, %739 : vector<1x32xf32>
    %741 = math.tanh %740 : vector<1x32xf32>
    %cst_276 = arith.constant 1.000000e+00 : f32
    %742 = vector.broadcast %cst_276 : f32 to vector<1x32xf32>
    %743 = arith.subf %742, %736 : vector<1x32xf32>
    %744 = arith.mulf %743, %741 : vector<1x32xf32>
    %745 = arith.mulf %736, %710 : vector<1x32xf32>
    %746 = arith.addf %744, %745 : vector<1x32xf32>
    %747 = vector.extract_strided_slice %746 {offsets = [0, 0], sizes = [1, 16], strides = [1, 1]} : vector<1x32xf32> to vector<1x16xf32>
    %c1_277 = arith.constant 1 : index
    %c0_278 = arith.constant 0 : index
    %748 = vector.load %arg22[%c1_277, %c0_278] : memref<8x32xf32, #tpu.memory_space<vmem>>, vector<1x16xf32>
    tpu.vector_store %arg22[%c1_277, %c0_278], %747 {strides = array<i32>} : memref<8x32xf32, #tpu.memory_space<vmem>>, vector<1x16xf32>,
    %749 = vector.extract_strided_slice %746 {offsets = [0, 16], sizes = [1, 16], strides = [1, 1]} : vector<1x32xf32> to vector<1x16xf32>
    %c6_279 = arith.constant 6 : index
    %c16_280 = arith.constant 16 : index
    %750 = vector.load %arg22[%c6_279, %c16_280] : memref<8x32xf32, #tpu.memory_space<vmem>>, vector<1x16xf32>
    tpu.vector_store %arg22[%c6_279, %c16_280], %749 {strides = array<i32>} : memref<8x32xf32, #tpu.memory_space<vmem>>, vector<1x16xf32>,
    %c2_281 = arith.constant 2 : index
    %c0_282 = arith.constant 0 : index
    %751 = vector.load %arg21[%c2_281, %c0_282] : memref<8x256xf32, #tpu.memory_space<vmem>>, vector<1x96xf32>
    %c5_283 = arith.constant 5 : index
    %c128_284 = arith.constant 128 : index
    %752 = vector.load %arg21[%c5_283, %c128_284] : memref<8x256xf32, #tpu.memory_space<vmem>>, vector<1x96xf32>
    %753 = arith.addf %751, %752 : vector<1x96xf32>
    %754 = arith.truncf %746 : vector<1x32xf32> to vector<1x32xbf16>
    %cst_285 = arith.constant dense<0.000000e+00> : vector<1x96xf32>
    %755 = tpu.matmul %754, %675, %cst_285 {dimension_numbers = #tpu.dot_dimension_numbers<[1], [0], [0], [1], [0, 0, 1, 1], [], []>} : vector<1x32xbf16>, vector<32x96xbf16>, vector<1x96xf32> -> vector<1x96xf32>
    %756 = arith.addf %755, %677 : vector<1x96xf32>
    %757 = vector.extract_strided_slice %753 {offsets = [0, 0], sizes = [1, 32], strides = [1, 1]} : vector<1x96xf32> to vector<1x32xf32>
    %758 = vector.extract_strided_slice %756 {offsets = [0, 0], sizes = [1, 32], strides = [1, 1]} : vector<1x96xf32> to vector<1x32xf32>
    %759 = arith.addf %757, %758 : vector<1x32xf32>
    %760 = arith.negf %759 : vector<1x32xf32>
    %761 = math.exp %760 : vector<1x32xf32>
    %cst_286 = arith.constant 1.000000e+00 : f32
    %762 = vector.broadcast %cst_286 : f32 to vector<1x32xf32>
    %763 = arith.addf %762, %761 : vector<1x32xf32>
    %764 = arith.divf %762, %763 : vector<1x32xf32>
    %765 = vector.extract_strided_slice %753 {offsets = [0, 32], sizes = [1, 32], strides = [1, 1]} : vector<1x96xf32> to vector<1x32xf32>
    %766 = vector.extract_strided_slice %756 {offsets = [0, 32], sizes = [1, 32], strides = [1, 1]} : vector<1x96xf32> to vector<1x32xf32>
    %767 = arith.addf %765, %766 : vector<1x32xf32>
    %768 = arith.negf %767 : vector<1x32xf32>
    %769 = math.exp %768 : vector<1x32xf32>
    %cst_287 = arith.constant 1.000000e+00 : f32
    %770 = vector.broadcast %cst_287 : f32 to vector<1x32xf32>
    %771 = arith.addf %770, %769 : vector<1x32xf32>
    %772 = arith.divf %770, %771 : vector<1x32xf32>
    %773 = vector.extract_strided_slice %753 {offsets = [0, 64], sizes = [1, 32], strides = [1, 1]} : vector<1x96xf32> to vector<1x32xf32>
    %774 = vector.extract_strided_slice %756 {offsets = [0, 64], sizes = [1, 32], strides = [1, 1]} : vector<1x96xf32> to vector<1x32xf32>
    %775 = arith.mulf %764, %774 : vector<1x32xf32>
    %776 = arith.addf %773, %775 : vector<1x32xf32>
    %777 = math.tanh %776 : vector<1x32xf32>
    %cst_288 = arith.constant 1.000000e+00 : f32
    %778 = vector.broadcast %cst_288 : f32 to vector<1x32xf32>
    %779 = arith.subf %778, %772 : vector<1x32xf32>
    %780 = arith.mulf %779, %777 : vector<1x32xf32>
    %781 = arith.mulf %772, %746 : vector<1x32xf32>
    %782 = arith.addf %780, %781 : vector<1x32xf32>
    %783 = vector.extract_strided_slice %782 {offsets = [0, 0], sizes = [1, 16], strides = [1, 1]} : vector<1x32xf32> to vector<1x16xf32>
    %c2_289 = arith.constant 2 : index
    %c0_290 = arith.constant 0 : index
    %784 = vector.load %arg22[%c2_289, %c0_290] : memref<8x32xf32, #tpu.memory_space<vmem>>, vector<1x16xf32>
    tpu.vector_store %arg22[%c2_289, %c0_290], %783 {strides = array<i32>} : memref<8x32xf32, #tpu.memory_space<vmem>>, vector<1x16xf32>,
    %785 = vector.extract_strided_slice %782 {offsets = [0, 16], sizes = [1, 16], strides = [1, 1]} : vector<1x32xf32> to vector<1x16xf32>
    %c5_291 = arith.constant 5 : index
    %c16_292 = arith.constant 16 : index
    %786 = vector.load %arg22[%c5_291, %c16_292] : memref<8x32xf32, #tpu.memory_space<vmem>>, vector<1x16xf32>
    tpu.vector_store %arg22[%c5_291, %c16_292], %785 {strides = array<i32>} : memref<8x32xf32, #tpu.memory_space<vmem>>, vector<1x16xf32>,
    %c3_293 = arith.constant 3 : index
    %c0_294 = arith.constant 0 : index
    %787 = vector.load %arg21[%c3_293, %c0_294] : memref<8x256xf32, #tpu.memory_space<vmem>>, vector<1x96xf32>
    %c4_295 = arith.constant 4 : index
    %c128_296 = arith.constant 128 : index
    %788 = vector.load %arg21[%c4_295, %c128_296] : memref<8x256xf32, #tpu.memory_space<vmem>>, vector<1x96xf32>
    %789 = arith.addf %787, %788 : vector<1x96xf32>
    %790 = arith.truncf %782 : vector<1x32xf32> to vector<1x32xbf16>
    %cst_297 = arith.constant dense<0.000000e+00> : vector<1x96xf32>
    %791 = tpu.matmul %790, %675, %cst_297 {dimension_numbers = #tpu.dot_dimension_numbers<[1], [0], [0], [1], [0, 0, 1, 1], [], []>} : vector<1x32xbf16>, vector<32x96xbf16>, vector<1x96xf32> -> vector<1x96xf32>
    %792 = arith.addf %791, %677 : vector<1x96xf32>
    %793 = vector.extract_strided_slice %789 {offsets = [0, 0], sizes = [1, 32], strides = [1, 1]} : vector<1x96xf32> to vector<1x32xf32>
    %794 = vector.extract_strided_slice %792 {offsets = [0, 0], sizes = [1, 32], strides = [1, 1]} : vector<1x96xf32> to vector<1x32xf32>
    %795 = arith.addf %793, %794 : vector<1x32xf32>
    %796 = arith.negf %795 : vector<1x32xf32>
    %797 = math.exp %796 : vector<1x32xf32>
    %cst_298 = arith.constant 1.000000e+00 : f32
    %798 = vector.broadcast %cst_298 : f32 to vector<1x32xf32>
    %799 = arith.addf %798, %797 : vector<1x32xf32>
    %800 = arith.divf %798, %799 : vector<1x32xf32>
    %801 = vector.extract_strided_slice %789 {offsets = [0, 32], sizes = [1, 32], strides = [1, 1]} : vector<1x96xf32> to vector<1x32xf32>
    %802 = vector.extract_strided_slice %792 {offsets = [0, 32], sizes = [1, 32], strides = [1, 1]} : vector<1x96xf32> to vector<1x32xf32>
    %803 = arith.addf %801, %802 : vector<1x32xf32>
    %804 = arith.negf %803 : vector<1x32xf32>
    %805 = math.exp %804 : vector<1x32xf32>
    %cst_299 = arith.constant 1.000000e+00 : f32
    %806 = vector.broadcast %cst_299 : f32 to vector<1x32xf32>
    %807 = arith.addf %806, %805 : vector<1x32xf32>
    %808 = arith.divf %806, %807 : vector<1x32xf32>
    %809 = vector.extract_strided_slice %789 {offsets = [0, 64], sizes = [1, 32], strides = [1, 1]} : vector<1x96xf32> to vector<1x32xf32>
    %810 = vector.extract_strided_slice %792 {offsets = [0, 64], sizes = [1, 32], strides = [1, 1]} : vector<1x96xf32> to vector<1x32xf32>
    %811 = arith.mulf %800, %810 : vector<1x32xf32>
    %812 = arith.addf %809, %811 : vector<1x32xf32>
    %813 = math.tanh %812 : vector<1x32xf32>
    %cst_300 = arith.constant 1.000000e+00 : f32
    %814 = vector.broadcast %cst_300 : f32 to vector<1x32xf32>
    %815 = arith.subf %814, %808 : vector<1x32xf32>
    %816 = arith.mulf %815, %813 : vector<1x32xf32>
    %817 = arith.mulf %808, %782 : vector<1x32xf32>
    %818 = arith.addf %816, %817 : vector<1x32xf32>
    %819 = vector.extract_strided_slice %818 {offsets = [0, 0], sizes = [1, 16], strides = [1, 1]} : vector<1x32xf32> to vector<1x16xf32>
    %c3_301 = arith.constant 3 : index
    %c0_302 = arith.constant 0 : index
    %820 = vector.load %arg22[%c3_301, %c0_302] : memref<8x32xf32, #tpu.memory_space<vmem>>, vector<1x16xf32>
    tpu.vector_store %arg22[%c3_301, %c0_302], %819 {strides = array<i32>} : memref<8x32xf32, #tpu.memory_space<vmem>>, vector<1x16xf32>,
    %821 = vector.extract_strided_slice %818 {offsets = [0, 16], sizes = [1, 16], strides = [1, 1]} : vector<1x32xf32> to vector<1x16xf32>
    %c4_303 = arith.constant 4 : index
    %c16_304 = arith.constant 16 : index
    %822 = vector.load %arg22[%c4_303, %c16_304] : memref<8x32xf32, #tpu.memory_space<vmem>>, vector<1x16xf32>
    tpu.vector_store %arg22[%c4_303, %c16_304], %821 {strides = array<i32>} : memref<8x32xf32, #tpu.memory_space<vmem>>, vector<1x16xf32>,
    %c4_305 = arith.constant 4 : index
    %c0_306 = arith.constant 0 : index
    %823 = vector.load %arg21[%c4_305, %c0_306] : memref<8x256xf32, #tpu.memory_space<vmem>>, vector<1x96xf32>
    %c3_307 = arith.constant 3 : index
    %c128_308 = arith.constant 128 : index
    %824 = vector.load %arg21[%c3_307, %c128_308] : memref<8x256xf32, #tpu.memory_space<vmem>>, vector<1x96xf32>
    %825 = arith.addf %823, %824 : vector<1x96xf32>
    %826 = arith.truncf %818 : vector<1x32xf32> to vector<1x32xbf16>
    %cst_309 = arith.constant dense<0.000000e+00> : vector<1x96xf32>
    %827 = tpu.matmul %826, %675, %cst_309 {dimension_numbers = #tpu.dot_dimension_numbers<[1], [0], [0], [1], [0, 0, 1, 1], [], []>} : vector<1x32xbf16>, vector<32x96xbf16>, vector<1x96xf32> -> vector<1x96xf32>
    %828 = arith.addf %827, %677 : vector<1x96xf32>
    %829 = vector.extract_strided_slice %825 {offsets = [0, 0], sizes = [1, 32], strides = [1, 1]} : vector<1x96xf32> to vector<1x32xf32>
    %830 = vector.extract_strided_slice %828 {offsets = [0, 0], sizes = [1, 32], strides = [1, 1]} : vector<1x96xf32> to vector<1x32xf32>
    %831 = arith.addf %829, %830 : vector<1x32xf32>
    %832 = arith.negf %831 : vector<1x32xf32>
    %833 = math.exp %832 : vector<1x32xf32>
    %cst_310 = arith.constant 1.000000e+00 : f32
    %834 = vector.broadcast %cst_310 : f32 to vector<1x32xf32>
    %835 = arith.addf %834, %833 : vector<1x32xf32>
    %836 = arith.divf %834, %835 : vector<1x32xf32>
    %837 = vector.extract_strided_slice %825 {offsets = [0, 32], sizes = [1, 32], strides = [1, 1]} : vector<1x96xf32> to vector<1x32xf32>
    %838 = vector.extract_strided_slice %828 {offsets = [0, 32], sizes = [1, 32], strides = [1, 1]} : vector<1x96xf32> to vector<1x32xf32>
    %839 = arith.addf %837, %838 : vector<1x32xf32>
    %840 = arith.negf %839 : vector<1x32xf32>
    %841 = math.exp %840 : vector<1x32xf32>
    %cst_311 = arith.constant 1.000000e+00 : f32
    %842 = vector.broadcast %cst_311 : f32 to vector<1x32xf32>
    %843 = arith.addf %842, %841 : vector<1x32xf32>
    %844 = arith.divf %842, %843 : vector<1x32xf32>
    %845 = vector.extract_strided_slice %825 {offsets = [0, 64], sizes = [1, 32], strides = [1, 1]} : vector<1x96xf32> to vector<1x32xf32>
    %846 = vector.extract_strided_slice %828 {offsets = [0, 64], sizes = [1, 32], strides = [1, 1]} : vector<1x96xf32> to vector<1x32xf32>
    %847 = arith.mulf %836, %846 : vector<1x32xf32>
    %848 = arith.addf %845, %847 : vector<1x32xf32>
    %849 = math.tanh %848 : vector<1x32xf32>
    %cst_312 = arith.constant 1.000000e+00 : f32
    %850 = vector.broadcast %cst_312 : f32 to vector<1x32xf32>
    %851 = arith.subf %850, %844 : vector<1x32xf32>
    %852 = arith.mulf %851, %849 : vector<1x32xf32>
    %853 = arith.mulf %844, %818 : vector<1x32xf32>
    %854 = arith.addf %852, %853 : vector<1x32xf32>
    %855 = vector.extract_strided_slice %854 {offsets = [0, 0], sizes = [1, 16], strides = [1, 1]} : vector<1x32xf32> to vector<1x16xf32>
    %c4_313 = arith.constant 4 : index
    %c0_314 = arith.constant 0 : index
    %856 = vector.load %arg22[%c4_313, %c0_314] : memref<8x32xf32, #tpu.memory_space<vmem>>, vector<1x16xf32>
    tpu.vector_store %arg22[%c4_313, %c0_314], %855 {strides = array<i32>} : memref<8x32xf32, #tpu.memory_space<vmem>>, vector<1x16xf32>,
    %857 = vector.extract_strided_slice %854 {offsets = [0, 16], sizes = [1, 16], strides = [1, 1]} : vector<1x32xf32> to vector<1x16xf32>
    %c3_315 = arith.constant 3 : index
    %c16_316 = arith.constant 16 : index
    %858 = vector.load %arg22[%c3_315, %c16_316] : memref<8x32xf32, #tpu.memory_space<vmem>>, vector<1x16xf32>
    tpu.vector_store %arg22[%c3_315, %c16_316], %857 {strides = array<i32>} : memref<8x32xf32, #tpu.memory_space<vmem>>, vector<1x16xf32>,
    %c5_317 = arith.constant 5 : index
    %c0_318 = arith.constant 0 : index
    %859 = vector.load %arg21[%c5_317, %c0_318] : memref<8x256xf32, #tpu.memory_space<vmem>>, vector<1x96xf32>
    %c2_319 = arith.constant 2 : index
    %c128_320 = arith.constant 128 : index
    %860 = vector.load %arg21[%c2_319, %c128_320] : memref<8x256xf32, #tpu.memory_space<vmem>>, vector<1x96xf32>
    %861 = arith.addf %859, %860 : vector<1x96xf32>
    %862 = arith.truncf %854 : vector<1x32xf32> to vector<1x32xbf16>
    %cst_321 = arith.constant dense<0.000000e+00> : vector<1x96xf32>
    %863 = tpu.matmul %862, %675, %cst_321 {dimension_numbers = #tpu.dot_dimension_numbers<[1], [0], [0], [1], [0, 0, 1, 1], [], []>} : vector<1x32xbf16>, vector<32x96xbf16>, vector<1x96xf32> -> vector<1x96xf32>
    %864 = arith.addf %863, %677 : vector<1x96xf32>
    %865 = vector.extract_strided_slice %861 {offsets = [0, 0], sizes = [1, 32], strides = [1, 1]} : vector<1x96xf32> to vector<1x32xf32>
    %866 = vector.extract_strided_slice %864 {offsets = [0, 0], sizes = [1, 32], strides = [1, 1]} : vector<1x96xf32> to vector<1x32xf32>
    %867 = arith.addf %865, %866 : vector<1x32xf32>
    %868 = arith.negf %867 : vector<1x32xf32>
    %869 = math.exp %868 : vector<1x32xf32>
    %cst_322 = arith.constant 1.000000e+00 : f32
    %870 = vector.broadcast %cst_322 : f32 to vector<1x32xf32>
    %871 = arith.addf %870, %869 : vector<1x32xf32>
    %872 = arith.divf %870, %871 : vector<1x32xf32>
    %873 = vector.extract_strided_slice %861 {offsets = [0, 32], sizes = [1, 32], strides = [1, 1]} : vector<1x96xf32> to vector<1x32xf32>
    %874 = vector.extract_strided_slice %864 {offsets = [0, 32], sizes = [1, 32], strides = [1, 1]} : vector<1x96xf32> to vector<1x32xf32>
    %875 = arith.addf %873, %874 : vector<1x32xf32>
    %876 = arith.negf %875 : vector<1x32xf32>
    %877 = math.exp %876 : vector<1x32xf32>
    %cst_323 = arith.constant 1.000000e+00 : f32
    %878 = vector.broadcast %cst_323 : f32 to vector<1x32xf32>
    %879 = arith.addf %878, %877 : vector<1x32xf32>
    %880 = arith.divf %878, %879 : vector<1x32xf32>
    %881 = vector.extract_strided_slice %861 {offsets = [0, 64], sizes = [1, 32], strides = [1, 1]} : vector<1x96xf32> to vector<1x32xf32>
    %882 = vector.extract_strided_slice %864 {offsets = [0, 64], sizes = [1, 32], strides = [1, 1]} : vector<1x96xf32> to vector<1x32xf32>
    %883 = arith.mulf %872, %882 : vector<1x32xf32>
    %884 = arith.addf %881, %883 : vector<1x32xf32>
    %885 = math.tanh %884 : vector<1x32xf32>
    %cst_324 = arith.constant 1.000000e+00 : f32
    %886 = vector.broadcast %cst_324 : f32 to vector<1x32xf32>
    %887 = arith.subf %886, %880 : vector<1x32xf32>
    %888 = arith.mulf %887, %885 : vector<1x32xf32>
    %889 = arith.mulf %880, %854 : vector<1x32xf32>
    %890 = arith.addf %888, %889 : vector<1x32xf32>
    %891 = vector.extract_strided_slice %890 {offsets = [0, 0], sizes = [1, 16], strides = [1, 1]} : vector<1x32xf32> to vector<1x16xf32>
    %c5_325 = arith.constant 5 : index
    %c0_326 = arith.constant 0 : index
    %892 = vector.load %arg22[%c5_325, %c0_326] : memref<8x32xf32, #tpu.memory_space<vmem>>, vector<1x16xf32>
    tpu.vector_store %arg22[%c5_325, %c0_326], %891 {strides = array<i32>} : memref<8x32xf32, #tpu.memory_space<vmem>>, vector<1x16xf32>,
    %893 = vector.extract_strided_slice %890 {offsets = [0, 16], sizes = [1, 16], strides = [1, 1]} : vector<1x32xf32> to vector<1x16xf32>
    %c2_327 = arith.constant 2 : index
    %c16_328 = arith.constant 16 : index
    %894 = vector.load %arg22[%c2_327, %c16_328] : memref<8x32xf32, #tpu.memory_space<vmem>>, vector<1x16xf32>
    tpu.vector_store %arg22[%c2_327, %c16_328], %893 {strides = array<i32>} : memref<8x32xf32, #tpu.memory_space<vmem>>, vector<1x16xf32>,
    %c6_329 = arith.constant 6 : index
    %c0_330 = arith.constant 0 : index
    %895 = vector.load %arg21[%c6_329, %c0_330] : memref<8x256xf32, #tpu.memory_space<vmem>>, vector<1x96xf32>
    %c1_331 = arith.constant 1 : index
    %c128_332 = arith.constant 128 : index
    %896 = vector.load %arg21[%c1_331, %c128_332] : memref<8x256xf32, #tpu.memory_space<vmem>>, vector<1x96xf32>
    %897 = arith.addf %895, %896 : vector<1x96xf32>
    %898 = arith.truncf %890 : vector<1x32xf32> to vector<1x32xbf16>
    %cst_333 = arith.constant dense<0.000000e+00> : vector<1x96xf32>
    %899 = tpu.matmul %898, %675, %cst_333 {dimension_numbers = #tpu.dot_dimension_numbers<[1], [0], [0], [1], [0, 0, 1, 1], [], []>} : vector<1x32xbf16>, vector<32x96xbf16>, vector<1x96xf32> -> vector<1x96xf32>
    %900 = arith.addf %899, %677 : vector<1x96xf32>
    %901 = vector.extract_strided_slice %897 {offsets = [0, 0], sizes = [1, 32], strides = [1, 1]} : vector<1x96xf32> to vector<1x32xf32>
    %902 = vector.extract_strided_slice %900 {offsets = [0, 0], sizes = [1, 32], strides = [1, 1]} : vector<1x96xf32> to vector<1x32xf32>
    %903 = arith.addf %901, %902 : vector<1x32xf32>
    %904 = arith.negf %903 : vector<1x32xf32>
    %905 = math.exp %904 : vector<1x32xf32>
    %cst_334 = arith.constant 1.000000e+00 : f32
    %906 = vector.broadcast %cst_334 : f32 to vector<1x32xf32>
    %907 = arith.addf %906, %905 : vector<1x32xf32>
    %908 = arith.divf %906, %907 : vector<1x32xf32>
    %909 = vector.extract_strided_slice %897 {offsets = [0, 32], sizes = [1, 32], strides = [1, 1]} : vector<1x96xf32> to vector<1x32xf32>
    %910 = vector.extract_strided_slice %900 {offsets = [0, 32], sizes = [1, 32], strides = [1, 1]} : vector<1x96xf32> to vector<1x32xf32>
    %911 = arith.addf %909, %910 : vector<1x32xf32>
    %912 = arith.negf %911 : vector<1x32xf32>
    %913 = math.exp %912 : vector<1x32xf32>
    %cst_335 = arith.constant 1.000000e+00 : f32
    %914 = vector.broadcast %cst_335 : f32 to vector<1x32xf32>
    %915 = arith.addf %914, %913 : vector<1x32xf32>
    %916 = arith.divf %914, %915 : vector<1x32xf32>
    %917 = vector.extract_strided_slice %897 {offsets = [0, 64], sizes = [1, 32], strides = [1, 1]} : vector<1x96xf32> to vector<1x32xf32>
    %918 = vector.extract_strided_slice %900 {offsets = [0, 64], sizes = [1, 32], strides = [1, 1]} : vector<1x96xf32> to vector<1x32xf32>
    %919 = arith.mulf %908, %918 : vector<1x32xf32>
    %920 = arith.addf %917, %919 : vector<1x32xf32>
    %921 = math.tanh %920 : vector<1x32xf32>
    %cst_336 = arith.constant 1.000000e+00 : f32
    %922 = vector.broadcast %cst_336 : f32 to vector<1x32xf32>
    %923 = arith.subf %922, %916 : vector<1x32xf32>
    %924 = arith.mulf %923, %921 : vector<1x32xf32>
    %925 = arith.mulf %916, %890 : vector<1x32xf32>
    %926 = arith.addf %924, %925 : vector<1x32xf32>
    %927 = vector.extract_strided_slice %926 {offsets = [0, 0], sizes = [1, 16], strides = [1, 1]} : vector<1x32xf32> to vector<1x16xf32>
    %c6_337 = arith.constant 6 : index
    %c0_338 = arith.constant 0 : index
    %928 = vector.load %arg22[%c6_337, %c0_338] : memref<8x32xf32, #tpu.memory_space<vmem>>, vector<1x16xf32>
    tpu.vector_store %arg22[%c6_337, %c0_338], %927 {strides = array<i32>} : memref<8x32xf32, #tpu.memory_space<vmem>>, vector<1x16xf32>,
    %929 = vector.extract_strided_slice %926 {offsets = [0, 16], sizes = [1, 16], strides = [1, 1]} : vector<1x32xf32> to vector<1x16xf32>
    %c1_339 = arith.constant 1 : index
    %c16_340 = arith.constant 16 : index
    %930 = vector.load %arg22[%c1_339, %c16_340] : memref<8x32xf32, #tpu.memory_space<vmem>>, vector<1x16xf32>
    tpu.vector_store %arg22[%c1_339, %c16_340], %929 {strides = array<i32>} : memref<8x32xf32, #tpu.memory_space<vmem>>, vector<1x16xf32>,
    %c7_341 = arith.constant 7 : index
    %c0_342 = arith.constant 0 : index
    %931 = vector.load %arg21[%c7_341, %c0_342] : memref<8x256xf32, #tpu.memory_space<vmem>>, vector<1x96xf32>
    %c0_343 = arith.constant 0 : index
    %c128_344 = arith.constant 128 : index
    %932 = vector.load %arg21[%c0_343, %c128_344] : memref<8x256xf32, #tpu.memory_space<vmem>>, vector<1x96xf32>
    %933 = arith.addf %931, %932 : vector<1x96xf32>
    %934 = arith.truncf %926 : vector<1x32xf32> to vector<1x32xbf16>
    %cst_345 = arith.constant dense<0.000000e+00> : vector<1x96xf32>
    %935 = tpu.matmul %934, %675, %cst_345 {dimension_numbers = #tpu.dot_dimension_numbers<[1], [0], [0], [1], [0, 0, 1, 1], [], []>} : vector<1x32xbf16>, vector<32x96xbf16>, vector<1x96xf32> -> vector<1x96xf32>
    %936 = arith.addf %935, %677 : vector<1x96xf32>
    %937 = vector.extract_strided_slice %933 {offsets = [0, 0], sizes = [1, 32], strides = [1, 1]} : vector<1x96xf32> to vector<1x32xf32>
    %938 = vector.extract_strided_slice %936 {offsets = [0, 0], sizes = [1, 32], strides = [1, 1]} : vector<1x96xf32> to vector<1x32xf32>
    %939 = arith.addf %937, %938 : vector<1x32xf32>
    %940 = arith.negf %939 : vector<1x32xf32>
    %941 = math.exp %940 : vector<1x32xf32>
    %cst_346 = arith.constant 1.000000e+00 : f32
    %942 = vector.broadcast %cst_346 : f32 to vector<1x32xf32>
    %943 = arith.addf %942, %941 : vector<1x32xf32>
    %944 = arith.divf %942, %943 : vector<1x32xf32>
    %945 = vector.extract_strided_slice %933 {offsets = [0, 32], sizes = [1, 32], strides = [1, 1]} : vector<1x96xf32> to vector<1x32xf32>
    %946 = vector.extract_strided_slice %936 {offsets = [0, 32], sizes = [1, 32], strides = [1, 1]} : vector<1x96xf32> to vector<1x32xf32>
    %947 = arith.addf %945, %946 : vector<1x32xf32>
    %948 = arith.negf %947 : vector<1x32xf32>
    %949 = math.exp %948 : vector<1x32xf32>
    %cst_347 = arith.constant 1.000000e+00 : f32
    %950 = vector.broadcast %cst_347 : f32 to vector<1x32xf32>
    %951 = arith.addf %950, %949 : vector<1x32xf32>
    %952 = arith.divf %950, %951 : vector<1x32xf32>
    %953 = vector.extract_strided_slice %933 {offsets = [0, 64], sizes = [1, 32], strides = [1, 1]} : vector<1x96xf32> to vector<1x32xf32>
    %954 = vector.extract_strided_slice %936 {offsets = [0, 64], sizes = [1, 32], strides = [1, 1]} : vector<1x96xf32> to vector<1x32xf32>
    %955 = arith.mulf %944, %954 : vector<1x32xf32>
    %956 = arith.addf %953, %955 : vector<1x32xf32>
    %957 = math.tanh %956 : vector<1x32xf32>
    %cst_348 = arith.constant 1.000000e+00 : f32
    %958 = vector.broadcast %cst_348 : f32 to vector<1x32xf32>
    %959 = arith.subf %958, %952 : vector<1x32xf32>
    %960 = arith.mulf %959, %957 : vector<1x32xf32>
    %961 = arith.mulf %952, %926 : vector<1x32xf32>
    %962 = arith.addf %960, %961 : vector<1x32xf32>
    %963 = vector.extract_strided_slice %962 {offsets = [0, 0], sizes = [1, 16], strides = [1, 1]} : vector<1x32xf32> to vector<1x16xf32>
    %c7_349 = arith.constant 7 : index
    %c0_350 = arith.constant 0 : index
    %964 = vector.load %arg22[%c7_349, %c0_350] : memref<8x32xf32, #tpu.memory_space<vmem>>, vector<1x16xf32>
    tpu.vector_store %arg22[%c7_349, %c0_350], %963 {strides = array<i32>} : memref<8x32xf32, #tpu.memory_space<vmem>>, vector<1x16xf32>,
    %965 = vector.extract_strided_slice %962 {offsets = [0, 16], sizes = [1, 16], strides = [1, 1]} : vector<1x32xf32> to vector<1x16xf32>
    %c0_351 = arith.constant 0 : index
    %c16_352 = arith.constant 16 : index
    %966 = vector.load %arg22[%c0_351, %c16_352] : memref<8x32xf32, #tpu.memory_space<vmem>>, vector<1x16xf32>
    tpu.vector_store %arg22[%c0_351, %c16_352], %965 {strides = array<i32>} : memref<8x32xf32, #tpu.memory_space<vmem>>, vector<1x16xf32>,
    %c0_353 = arith.constant 0 : index
    %c0_354 = arith.constant 0 : index
    %967 = vector.load %arg22[%c0_353, %c0_354] : memref<8x32xf32, #tpu.memory_space<vmem>>, vector<8x32xf32>
    %968 = arith.truncf %967 : vector<8x32xf32> to vector<8x32xbf16>
    %cst_355 = arith.constant dense<0.000000e+00> : vector<8x64xf32>
    %969 = tpu.matmul %968, %31, %cst_355 {dimension_numbers = #tpu.dot_dimension_numbers<[1], [0], [0], [1], [0, 0, 1, 1], [], []>} : vector<8x32xbf16>, vector<32x64xbf16>, vector<8x64xf32> -> vector<8x64xf32>
    %970 = vector.broadcast %32 : vector<1x64xf32> to vector<8x64xf32>
    %971 = arith.addf %969, %970 : vector<8x64xf32>
    %972 = vector.extract_strided_slice %971 {offsets = [0, 0], sizes = [8, 32], strides = [1, 1]} : vector<8x64xf32> to vector<8x32xf32>
    %973 = vector.extract_strided_slice %971 {offsets = [0, 32], sizes = [8, 32], strides = [1, 1]} : vector<8x64xf32> to vector<8x32xf32>
    %974 = arith.negf %972 : vector<8x32xf32>
    %975 = math.exp %974 : vector<8x32xf32>
    %cst_356 = arith.constant 1.000000e+00 : f32
    %976 = vector.broadcast %cst_356 : f32 to vector<8x32xf32>
    %977 = arith.addf %976, %975 : vector<8x32xf32>
    %978 = arith.divf %976, %977 : vector<8x32xf32>
    %979 = arith.mulf %972, %978 : vector<8x32xf32>
    %980 = arith.mulf %979, %973 : vector<8x32xf32>
    %c0_357 = arith.constant 0 : index
    %c0_358 = arith.constant 0 : index
    %981 = vector.load %arg1[%c0_357, %c0_358] : memref<8x8xf32, #tpu.memory_space<vmem>>, vector<8x8xf32>
    %982 = arith.truncf %981 : vector<8x8xf32> to vector<8x8xbf16>
    %cst_359 = arith.constant dense<0.000000e+00> : vector<8xf32>
    %983 = vector.multi_reduction <add>, %981, %cst_359 [1] : vector<8x8xf32> to vector<8xf32>
    %984 = vector.shape_cast %983 : vector<8xf32> to vector<8x1xf32>
    %985 = arith.truncf %980 : vector<8x32xf32> to vector<8x32xbf16>
    %cst_360 = arith.constant dense<0.000000e+00> : vector<8x32xf32>
    %986 = tpu.matmul %982, %985, %cst_360 {dimension_numbers = #tpu.dot_dimension_numbers<[1], [0], [0], [1], [0, 0, 1, 1], [], []>} : vector<8x8xbf16>, vector<8x32xbf16>, vector<8x32xf32> -> vector<8x32xf32>
    %987 = arith.truncf %986 : vector<8x32xf32> to vector<8x32xbf16>
    %988 = tpu.concatenate %987, %985 in 1 : vector<8x32xbf16>, vector<8x32xbf16> -> vector<8x64xbf16>
    %c0_361 = arith.constant 0 : index
    %c0_362 = arith.constant 0 : index
    %c0_363 = arith.constant 0 : index
    %989 = vector.load %arg14[%c0_361, %c0_362, %c0_363] : memref<3x64x256xbf16, #tpu.memory_space<vmem>>, vector<1x64x256xbf16>
    %990 = vector.shape_cast %989 : vector<1x64x256xbf16> to vector<64x256xbf16>
    %cst_364 = arith.constant dense<0.000000e+00> : vector<8x256xf32>
    %991 = tpu.matmul %988, %990, %cst_364 {dimension_numbers = #tpu.dot_dimension_numbers<[1], [0], [0], [1], [0, 0, 1, 1], [], []>} : vector<8x64xbf16>, vector<64x256xbf16>, vector<8x256xf32> -> vector<8x256xf32>
    %992 = vector.extract_strided_slice %991 {offsets = [0, 0], sizes = [8, 96], strides = [1, 1]} : vector<8x256xf32> to vector<8x96xf32>
    %c0_365 = arith.constant 0 : index
    %c0_366 = arith.constant 0 : index
    %c0_367 = arith.constant 0 : index
    %993 = vector.load %arg17[%c0_365, %c0_366, %c0_367] : memref<3x1x96xf32, #tpu.memory_space<vmem>>, vector<1x1x96xf32>
    %994 = vector.shape_cast %993 : vector<1x1x96xf32> to vector<1x96xf32>
    %995 = vector.broadcast %984 : vector<8x1xf32> to vector<8x96xf32>
    %996 = vector.broadcast %994 : vector<1x96xf32> to vector<8x96xf32>
    %997 = arith.mulf %995, %996 : vector<8x96xf32>
    %998 = arith.addf %992, %997 : vector<8x96xf32>
    %c0_368 = arith.constant 0 : index
    %c0_369 = arith.constant 0 : index
    %c0_370 = arith.constant 0 : index
    %999 = vector.load %arg15[%c0_368, %c0_369, %c0_370] : memref<3x1x96xf32, #tpu.memory_space<vmem>>, vector<1x1x96xf32>
    %1000 = vector.shape_cast %999 : vector<1x1x96xf32> to vector<1x96xf32>
    %1001 = vector.broadcast %1000 : vector<1x96xf32> to vector<8x96xf32>
    %1002 = arith.addf %998, %1001 : vector<8x96xf32>
    %1003 = vector.extract_strided_slice %991 {offsets = [0, 128], sizes = [8, 96], strides = [1, 1]} : vector<8x256xf32> to vector<8x96xf32>
    %c0_371 = arith.constant 0 : index
    %c0_372 = arith.constant 0 : index
    %c0_373 = arith.constant 0 : index
    %1004 = vector.load %arg16[%c0_371, %c0_372, %c0_373] : memref<3x1x96xf32, #tpu.memory_space<vmem>>, vector<1x1x96xf32>
    %1005 = vector.shape_cast %1004 : vector<1x1x96xf32> to vector<1x96xf32>
    %1006 = vector.broadcast %1005 : vector<1x96xf32> to vector<8x96xf32>
    %1007 = arith.addf %1003, %1006 : vector<8x96xf32>
    %1008 = vector.extract_strided_slice %1002 {offsets = [0, 0], sizes = [8, 32], strides = [1, 1]} : vector<8x96xf32> to vector<8x32xf32>
    %1009 = vector.extract_strided_slice %1007 {offsets = [0, 0], sizes = [8, 32], strides = [1, 1]} : vector<8x96xf32> to vector<8x32xf32>
    %1010 = arith.addf %1008, %1009 : vector<8x32xf32>
    %1011 = arith.negf %1010 : vector<8x32xf32>
    %1012 = math.exp %1011 : vector<8x32xf32>
    %cst_374 = arith.constant 1.000000e+00 : f32
    %1013 = vector.broadcast %cst_374 : f32 to vector<8x32xf32>
    %1014 = arith.addf %1013, %1012 : vector<8x32xf32>
    %1015 = arith.divf %1013, %1014 : vector<8x32xf32>
    %1016 = vector.extract_strided_slice %1002 {offsets = [0, 32], sizes = [8, 32], strides = [1, 1]} : vector<8x96xf32> to vector<8x32xf32>
    %1017 = vector.extract_strided_slice %1007 {offsets = [0, 32], sizes = [8, 32], strides = [1, 1]} : vector<8x96xf32> to vector<8x32xf32>
    %1018 = arith.addf %1016, %1017 : vector<8x32xf32>
    %1019 = arith.negf %1018 : vector<8x32xf32>
    %1020 = math.exp %1019 : vector<8x32xf32>
    %cst_375 = arith.constant 1.000000e+00 : f32
    %1021 = vector.broadcast %cst_375 : f32 to vector<8x32xf32>
    %1022 = arith.addf %1021, %1020 : vector<8x32xf32>
    %1023 = arith.divf %1021, %1022 : vector<8x32xf32>
    %1024 = vector.extract_strided_slice %1002 {offsets = [0, 64], sizes = [8, 32], strides = [1, 1]} : vector<8x96xf32> to vector<8x32xf32>
    %1025 = vector.extract_strided_slice %1007 {offsets = [0, 64], sizes = [8, 32], strides = [1, 1]} : vector<8x96xf32> to vector<8x32xf32>
    %1026 = arith.mulf %1015, %1025 : vector<8x32xf32>
    %1027 = arith.addf %1024, %1026 : vector<8x32xf32>
    %1028 = math.tanh %1027 : vector<8x32xf32>
    %cst_376 = arith.constant 1.000000e+00 : f32
    %1029 = vector.broadcast %cst_376 : f32 to vector<8x32xf32>
    %1030 = arith.subf %1029, %1023 : vector<8x32xf32>
    %1031 = arith.mulf %1030, %1028 : vector<8x32xf32>
    %1032 = arith.mulf %1023, %980 : vector<8x32xf32>
    %1033 = arith.addf %1031, %1032 : vector<8x32xf32>
    %1034 = arith.truncf %1033 : vector<8x32xf32> to vector<8x32xbf16>
    %cst_377 = arith.constant dense<0.000000e+00> : vector<8x32xf32>
    %1035 = tpu.matmul %982, %1034, %cst_377 {dimension_numbers = #tpu.dot_dimension_numbers<[1], [0], [0], [1], [0, 0, 1, 1], [], []>} : vector<8x8xbf16>, vector<8x32xbf16>, vector<8x32xf32> -> vector<8x32xf32>
    %1036 = arith.truncf %1035 : vector<8x32xf32> to vector<8x32xbf16>
    %1037 = tpu.concatenate %1036, %1034 in 1 : vector<8x32xbf16>, vector<8x32xbf16> -> vector<8x64xbf16>
    %c1_378 = arith.constant 1 : index
    %c0_379 = arith.constant 0 : index
    %c0_380 = arith.constant 0 : index
    %1038 = vector.load %arg14[%c1_378, %c0_379, %c0_380] : memref<3x64x256xbf16, #tpu.memory_space<vmem>>, vector<1x64x256xbf16>
    %1039 = vector.shape_cast %1038 : vector<1x64x256xbf16> to vector<64x256xbf16>
    %cst_381 = arith.constant dense<0.000000e+00> : vector<8x256xf32>
    %1040 = tpu.matmul %1037, %1039, %cst_381 {dimension_numbers = #tpu.dot_dimension_numbers<[1], [0], [0], [1], [0, 0, 1, 1], [], []>} : vector<8x64xbf16>, vector<64x256xbf16>, vector<8x256xf32> -> vector<8x256xf32>
    %1041 = vector.extract_strided_slice %1040 {offsets = [0, 0], sizes = [8, 96], strides = [1, 1]} : vector<8x256xf32> to vector<8x96xf32>
    %c1_382 = arith.constant 1 : index
    %c0_383 = arith.constant 0 : index
    %c0_384 = arith.constant 0 : index
    %1042 = vector.load %arg17[%c1_382, %c0_383, %c0_384] : memref<3x1x96xf32, #tpu.memory_space<vmem>>, vector<1x1x96xf32>
    %1043 = vector.shape_cast %1042 : vector<1x1x96xf32> to vector<1x96xf32>
    %1044 = vector.broadcast %984 : vector<8x1xf32> to vector<8x96xf32>
    %1045 = vector.broadcast %1043 : vector<1x96xf32> to vector<8x96xf32>
    %1046 = arith.mulf %1044, %1045 : vector<8x96xf32>
    %1047 = arith.addf %1041, %1046 : vector<8x96xf32>
    %c1_385 = arith.constant 1 : index
    %c0_386 = arith.constant 0 : index
    %c0_387 = arith.constant 0 : index
    %1048 = vector.load %arg15[%c1_385, %c0_386, %c0_387] : memref<3x1x96xf32, #tpu.memory_space<vmem>>, vector<1x1x96xf32>
    %1049 = vector.shape_cast %1048 : vector<1x1x96xf32> to vector<1x96xf32>
    %1050 = vector.broadcast %1049 : vector<1x96xf32> to vector<8x96xf32>
    %1051 = arith.addf %1047, %1050 : vector<8x96xf32>
    %1052 = vector.extract_strided_slice %1040 {offsets = [0, 128], sizes = [8, 96], strides = [1, 1]} : vector<8x256xf32> to vector<8x96xf32>
    %c1_388 = arith.constant 1 : index
    %c0_389 = arith.constant 0 : index
    %c0_390 = arith.constant 0 : index
    %1053 = vector.load %arg16[%c1_388, %c0_389, %c0_390] : memref<3x1x96xf32, #tpu.memory_space<vmem>>, vector<1x1x96xf32>
    %1054 = vector.shape_cast %1053 : vector<1x1x96xf32> to vector<1x96xf32>
    %1055 = vector.broadcast %1054 : vector<1x96xf32> to vector<8x96xf32>
    %1056 = arith.addf %1052, %1055 : vector<8x96xf32>
    %1057 = vector.extract_strided_slice %1051 {offsets = [0, 0], sizes = [8, 32], strides = [1, 1]} : vector<8x96xf32> to vector<8x32xf32>
    %1058 = vector.extract_strided_slice %1056 {offsets = [0, 0], sizes = [8, 32], strides = [1, 1]} : vector<8x96xf32> to vector<8x32xf32>
    %1059 = arith.addf %1057, %1058 : vector<8x32xf32>
    %1060 = arith.negf %1059 : vector<8x32xf32>
    %1061 = math.exp %1060 : vector<8x32xf32>
    %cst_391 = arith.constant 1.000000e+00 : f32
    %1062 = vector.broadcast %cst_391 : f32 to vector<8x32xf32>
    %1063 = arith.addf %1062, %1061 : vector<8x32xf32>
    %1064 = arith.divf %1062, %1063 : vector<8x32xf32>
    %1065 = vector.extract_strided_slice %1051 {offsets = [0, 32], sizes = [8, 32], strides = [1, 1]} : vector<8x96xf32> to vector<8x32xf32>
    %1066 = vector.extract_strided_slice %1056 {offsets = [0, 32], sizes = [8, 32], strides = [1, 1]} : vector<8x96xf32> to vector<8x32xf32>
    %1067 = arith.addf %1065, %1066 : vector<8x32xf32>
    %1068 = arith.negf %1067 : vector<8x32xf32>
    %1069 = math.exp %1068 : vector<8x32xf32>
    %cst_392 = arith.constant 1.000000e+00 : f32
    %1070 = vector.broadcast %cst_392 : f32 to vector<8x32xf32>
    %1071 = arith.addf %1070, %1069 : vector<8x32xf32>
    %1072 = arith.divf %1070, %1071 : vector<8x32xf32>
    %1073 = vector.extract_strided_slice %1051 {offsets = [0, 64], sizes = [8, 32], strides = [1, 1]} : vector<8x96xf32> to vector<8x32xf32>
    %1074 = vector.extract_strided_slice %1056 {offsets = [0, 64], sizes = [8, 32], strides = [1, 1]} : vector<8x96xf32> to vector<8x32xf32>
    %1075 = arith.mulf %1064, %1074 : vector<8x32xf32>
    %1076 = arith.addf %1073, %1075 : vector<8x32xf32>
    %1077 = math.tanh %1076 : vector<8x32xf32>
    %cst_393 = arith.constant 1.000000e+00 : f32
    %1078 = vector.broadcast %cst_393 : f32 to vector<8x32xf32>
    %1079 = arith.subf %1078, %1072 : vector<8x32xf32>
    %1080 = arith.mulf %1079, %1077 : vector<8x32xf32>
    %1081 = arith.mulf %1072, %1033 : vector<8x32xf32>
    %1082 = arith.addf %1080, %1081 : vector<8x32xf32>
    %1083 = arith.truncf %1082 : vector<8x32xf32> to vector<8x32xbf16>
    %cst_394 = arith.constant dense<0.000000e+00> : vector<8x32xf32>
    %1084 = tpu.matmul %982, %1083, %cst_394 {dimension_numbers = #tpu.dot_dimension_numbers<[1], [0], [0], [1], [0, 0, 1, 1], [], []>} : vector<8x8xbf16>, vector<8x32xbf16>, vector<8x32xf32> -> vector<8x32xf32>
    %1085 = arith.truncf %1084 : vector<8x32xf32> to vector<8x32xbf16>
    %1086 = tpu.concatenate %1085, %1083 in 1 : vector<8x32xbf16>, vector<8x32xbf16> -> vector<8x64xbf16>
    %c2_395 = arith.constant 2 : index
    %c0_396 = arith.constant 0 : index
    %c0_397 = arith.constant 0 : index
    %1087 = vector.load %arg14[%c2_395, %c0_396, %c0_397] : memref<3x64x256xbf16, #tpu.memory_space<vmem>>, vector<1x64x256xbf16>
    %1088 = vector.shape_cast %1087 : vector<1x64x256xbf16> to vector<64x256xbf16>
    %cst_398 = arith.constant dense<0.000000e+00> : vector<8x256xf32>
    %1089 = tpu.matmul %1086, %1088, %cst_398 {dimension_numbers = #tpu.dot_dimension_numbers<[1], [0], [0], [1], [0, 0, 1, 1], [], []>} : vector<8x64xbf16>, vector<64x256xbf16>, vector<8x256xf32> -> vector<8x256xf32>
    %1090 = vector.extract_strided_slice %1089 {offsets = [0, 0], sizes = [8, 96], strides = [1, 1]} : vector<8x256xf32> to vector<8x96xf32>
    %c2_399 = arith.constant 2 : index
    %c0_400 = arith.constant 0 : index
    %c0_401 = arith.constant 0 : index
    %1091 = vector.load %arg17[%c2_399, %c0_400, %c0_401] : memref<3x1x96xf32, #tpu.memory_space<vmem>>, vector<1x1x96xf32>
    %1092 = vector.shape_cast %1091 : vector<1x1x96xf32> to vector<1x96xf32>
    %1093 = vector.broadcast %984 : vector<8x1xf32> to vector<8x96xf32>
    %1094 = vector.broadcast %1092 : vector<1x96xf32> to vector<8x96xf32>
    %1095 = arith.mulf %1093, %1094 : vector<8x96xf32>
    %1096 = arith.addf %1090, %1095 : vector<8x96xf32>
    %c2_402 = arith.constant 2 : index
    %c0_403 = arith.constant 0 : index
    %c0_404 = arith.constant 0 : index
    %1097 = vector.load %arg15[%c2_402, %c0_403, %c0_404] : memref<3x1x96xf32, #tpu.memory_space<vmem>>, vector<1x1x96xf32>
    %1098 = vector.shape_cast %1097 : vector<1x1x96xf32> to vector<1x96xf32>
    %1099 = vector.broadcast %1098 : vector<1x96xf32> to vector<8x96xf32>
    %1100 = arith.addf %1096, %1099 : vector<8x96xf32>
    %1101 = vector.extract_strided_slice %1089 {offsets = [0, 128], sizes = [8, 96], strides = [1, 1]} : vector<8x256xf32> to vector<8x96xf32>
    %c2_405 = arith.constant 2 : index
    %c0_406 = arith.constant 0 : index
    %c0_407 = arith.constant 0 : index
    %1102 = vector.load %arg16[%c2_405, %c0_406, %c0_407] : memref<3x1x96xf32, #tpu.memory_space<vmem>>, vector<1x1x96xf32>
    %1103 = vector.shape_cast %1102 : vector<1x1x96xf32> to vector<1x96xf32>
    %1104 = vector.broadcast %1103 : vector<1x96xf32> to vector<8x96xf32>
    %1105 = arith.addf %1101, %1104 : vector<8x96xf32>
    %1106 = vector.extract_strided_slice %1100 {offsets = [0, 0], sizes = [8, 32], strides = [1, 1]} : vector<8x96xf32> to vector<8x32xf32>
    %1107 = vector.extract_strided_slice %1105 {offsets = [0, 0], sizes = [8, 32], strides = [1, 1]} : vector<8x96xf32> to vector<8x32xf32>
    %1108 = arith.addf %1106, %1107 : vector<8x32xf32>
    %1109 = arith.negf %1108 : vector<8x32xf32>
    %1110 = math.exp %1109 : vector<8x32xf32>
    %cst_408 = arith.constant 1.000000e+00 : f32
    %1111 = vector.broadcast %cst_408 : f32 to vector<8x32xf32>
    %1112 = arith.addf %1111, %1110 : vector<8x32xf32>
    %1113 = arith.divf %1111, %1112 : vector<8x32xf32>
    %1114 = vector.extract_strided_slice %1100 {offsets = [0, 32], sizes = [8, 32], strides = [1, 1]} : vector<8x96xf32> to vector<8x32xf32>
    %1115 = vector.extract_strided_slice %1105 {offsets = [0, 32], sizes = [8, 32], strides = [1, 1]} : vector<8x96xf32> to vector<8x32xf32>
    %1116 = arith.addf %1114, %1115 : vector<8x32xf32>
    %1117 = arith.negf %1116 : vector<8x32xf32>
    %1118 = math.exp %1117 : vector<8x32xf32>
    %cst_409 = arith.constant 1.000000e+00 : f32
    %1119 = vector.broadcast %cst_409 : f32 to vector<8x32xf32>
    %1120 = arith.addf %1119, %1118 : vector<8x32xf32>
    %1121 = arith.divf %1119, %1120 : vector<8x32xf32>
    %1122 = vector.extract_strided_slice %1100 {offsets = [0, 64], sizes = [8, 32], strides = [1, 1]} : vector<8x96xf32> to vector<8x32xf32>
    %1123 = vector.extract_strided_slice %1105 {offsets = [0, 64], sizes = [8, 32], strides = [1, 1]} : vector<8x96xf32> to vector<8x32xf32>
    %1124 = arith.mulf %1113, %1123 : vector<8x32xf32>
    %1125 = arith.addf %1122, %1124 : vector<8x32xf32>
    %1126 = math.tanh %1125 : vector<8x32xf32>
    %cst_410 = arith.constant 1.000000e+00 : f32
    %1127 = vector.broadcast %cst_410 : f32 to vector<8x32xf32>
    %1128 = arith.subf %1127, %1121 : vector<8x32xf32>
    %1129 = arith.mulf %1128, %1126 : vector<8x32xf32>
    %1130 = arith.mulf %1121, %1082 : vector<8x32xf32>
    %1131 = arith.addf %1129, %1130 : vector<8x32xf32>
    %c0_411 = arith.constant 0 : index
    %c0_412 = arith.constant 0 : index
    %1132 = vector.load %arg2[%c0_411, %c0_412] : memref<1x8xi32, #tpu.memory_space<vmem>>, vector<1x8xi32>
    %c0_413 = arith.constant 0 : index
    %c0_414 = arith.constant 0 : index
    %1133 = vector.load %arg3[%c0_413, %c0_414] : memref<8x1xi32, #tpu.memory_space<vmem>>, vector<8x1xi32>
    %1134 = tpu.iota {dimensions = array<i32: 0>} : vector<2x8xi32>
    %1135 = vector.broadcast %1132 : vector<1x8xi32> to vector<2x8xi32>
    %1136 = arith.cmpi eq, %1134, %1135 : vector<2x8xi32>
    %1137 = arith.extui %1136 : vector<2x8xi1> to vector<2x8xi32>
    %1138 = arith.sitofp %1137 : vector<2x8xi32> to vector<2x8xf32>
    %1139 = tpu.iota {dimensions = array<i32: 1>} : vector<8x2xi32>
    %1140 = vector.broadcast %1133 : vector<8x1xi32> to vector<8x2xi32>
    %1141 = arith.cmpi eq, %1139, %1140 : vector<8x2xi32>
    %1142 = arith.extui %1141 : vector<8x2xi1> to vector<8x2xi32>
    %1143 = arith.sitofp %1142 : vector<8x2xi32> to vector<8x2xf32>
    %cst_415 = arith.constant dense<0.000000e+00> : vector<2xf32>
    %1144 = vector.multi_reduction <add>, %1138, %cst_415 [1] : vector<2x8xf32> to vector<2xf32>
    %1145 = vector.shape_cast %1144 : vector<2xf32> to vector<2x1xf32>
    %cst_416 = arith.constant 1.000000e+00 : f32
    %1146 = vector.broadcast %cst_416 : f32 to vector<2x1xf32>
    %1147 = arith.maximumf %1145, %1146 : vector<2x1xf32>
    %cst_417 = arith.constant 1.000000e+00 : f32
    %1148 = vector.broadcast %cst_417 : f32 to vector<2x1xf32>
    %1149 = arith.divf %1148, %1147 : vector<2x1xf32>
    %cst_418 = arith.constant dense<0.000000e+00> : vector<2x32xf32>
    %1150 = tpu.matmul %1138, %1131, %cst_418 {dimension_numbers = #tpu.dot_dimension_numbers<[1], [0], [0], [1], [0, 0, 1, 1], [], []>} : vector<2x8xf32>, vector<8x32xf32>, vector<2x32xf32> -> vector<2x32xf32>
    %1151 = vector.broadcast %1149 : vector<2x1xf32> to vector<2x32xf32>
    %1152 = arith.mulf %1150, %1151 : vector<2x32xf32>
    %1153 = vector.extract_strided_slice %1143 {offsets = [0, 0], sizes = [8, 1], strides = [1, 1]} : vector<8x2xf32> to vector<8x1xf32>
    %cst_419 = arith.constant 1.000000e+00 : f32
    %1154 = vector.broadcast %cst_419 : f32 to vector<8x1xf32>
    %1155 = arith.subf %1153, %1154 : vector<8x1xf32>
    %cst_420 = arith.constant 1.000000e+30 : f32
    %1156 = vector.broadcast %cst_420 : f32 to vector<8x1xf32>
    %1157 = arith.mulf %1155, %1156 : vector<8x1xf32>
    %1158 = vector.broadcast %1157 : vector<8x1xf32> to vector<8x32xf32>
    %1159 = arith.addf %1131, %1158 : vector<8x32xf32>
    %cst_421 = arith.constant dense<0xFF800000> : vector<32xf32>
    %1160 = vector.multi_reduction <maximumf>, %1159, %cst_421 [0] : vector<8x32xf32> to vector<32xf32>
    %1161 = vector.shape_cast %1160 : vector<32xf32> to vector<1x32xf32>
    %1162 = vector.extract_strided_slice %1143 {offsets = [0, 1], sizes = [8, 1], strides = [1, 1]} : vector<8x2xf32> to vector<8x1xf32>
    %cst_422 = arith.constant 1.000000e+00 : f32
    %1163 = vector.broadcast %cst_422 : f32 to vector<8x1xf32>
    %1164 = arith.subf %1162, %1163 : vector<8x1xf32>
    %cst_423 = arith.constant 1.000000e+30 : f32
    %1165 = vector.broadcast %cst_423 : f32 to vector<8x1xf32>
    %1166 = arith.mulf %1164, %1165 : vector<8x1xf32>
    %1167 = vector.broadcast %1166 : vector<8x1xf32> to vector<8x32xf32>
    %1168 = arith.addf %1131, %1167 : vector<8x32xf32>
    %cst_424 = arith.constant dense<0xFF800000> : vector<32xf32>
    %1169 = vector.multi_reduction <maximumf>, %1168, %cst_424 [0] : vector<8x32xf32> to vector<32xf32>
    %1170 = vector.shape_cast %1169 : vector<32xf32> to vector<1x32xf32>
    %1171 = tpu.concatenate %1161, %1170 in 0 : vector<1x32xf32>, vector<1x32xf32> -> vector<2x32xf32>
    %cst_425 = arith.constant 0.000000e+00 : f32
    %1172 = vector.broadcast %cst_425 : f32 to vector<2x1xf32>
    %1173 = arith.cmpf ogt, %1145, %1172 : vector<2x1xf32>
    %cst_426 = arith.constant 0.000000e+00 : f32
    %1174 = vector.shape_cast %1173 : vector<2x1xi1> to vector<2x1xi1>
    %1175 = vector.broadcast %1174 : vector<2x1xi1> to vector<2x32xi1>
    %1176 = vector.broadcast %cst_426 : f32 to vector<2x32xf32>
    %1177 = arith.select %1175, %1171, %1176 : vector<2x32xi1>, vector<2x32xf32>
    %1178 = tpu.concatenate %1152, %1177 in 1 : vector<2x32xf32>, vector<2x32xf32> -> vector<2x64xf32>
    %1179 = arith.truncf %1178 : vector<2x64xf32> to vector<2x64xbf16>
    %c0_427 = arith.constant 0 : index
    %c0_428 = arith.constant 0 : index
    %1180 = vector.load %arg18[%c0_427, %c0_428] : memref<64x8xbf16, #tpu.memory_space<vmem>>, vector<64x8xbf16>
    %cst_429 = arith.constant dense<0.000000e+00> : vector<2x8xf32>
    %1181 = tpu.matmul %1179, %1180, %cst_429 {dimension_numbers = #tpu.dot_dimension_numbers<[1], [0], [0], [1], [0, 0, 1, 1], [], []>} : vector<2x64xbf16>, vector<64x8xbf16>, vector<2x8xf32> -> vector<2x8xf32>
    %c0_430 = arith.constant 0 : index
    %c0_431 = arith.constant 0 : index
    %1182 = vector.load %arg19[%c0_430, %c0_431] : memref<1x8xf32, #tpu.memory_space<vmem>>, vector<1x8xf32>
    %1183 = vector.broadcast %1182 : vector<1x8xf32> to vector<2x8xf32>
    %1184 = arith.addf %1181, %1183 : vector<2x8xf32>
    %c0_432 = arith.constant 0 : index
    %c0_433 = arith.constant 0 : index
    %1185 = vector.load %arg20[%c0_432, %c0_433] : memref<2x8xf32, #tpu.memory_space<vmem>>, vector<2x8xf32>
    tpu.vector_store %arg20[%c0_432, %c0_433], %1184 {strides = array<i32>} : memref<2x8xf32, #tpu.memory_space<vmem>>, vector<2x8xf32>,
    return
  }
}

</mosaic_0001>

<bundles_post_ra>
// kernel: sentence_graph_forward.1
= control target key start
LH: loop header
LB: loop body
LE: loop exit
PB: predicated region body
PF: predicated region fallthrough
CT: control target
= control target key end

     0   :  { %s5249_s0 = inlined_call_operand.vmem [shape: f32[8,16], index: 0, kind: input, shape index: {}]   ;;  %s5250_s1 = inlined_call_operand.hbm [shape: f32[8,8], index: 1, kind: input, shape index: {}]   ;;  %s5251_s2 = inlined_call_operand.vmem [shape: s32[1,8], index: 2, kind: input, shape index: {}]   ;;  %s5252_s3 = inlined_call_operand.vmem [shape: s32[8,1], index: 3, kind: input, shape index: {}]   ;;  %s5253_s4 = inlined_call_operand.vmem [shape: bf16[16,32], index: 4, kind: input, shape index: {}]   ;;  %s5254_s5 = inlined_call_operand.vmem [shape: f32[1,32], index: 5, kind: input, shape index: {}]   ;;  %s5255_s6 = inlined_call_operand.vmem [shape: f32[1,32], index: 6, kind: input, shape index: {}]   ;;  %s5256_s7 = inlined_call_operand.vmem [shape: f32[1,32], index: 7, kind: input, shape index: {}]   ;;  %s5257_s8 = inlined_call_operand.vmem [shape: bf16[3,32,256], index: 8, kind: input, shape index: {}]   ;;  %s5258_s9 = inlined_call_operand.vmem [shape: f32[3,1,256], index: 9, kind: input, shape index: {}]   ;;  %s5259_s10 = inlined_call_operand.vmem [shape: bf16[3,32,96], index: 10, kind: input, shape index: {}]   ;;  %s5260_s11 = inlined_call_operand.vmem [shape: f32[3,1,96], index: 11, kind: input, shape index: {}]   ;;  %s5261_s12 = inlined_call_operand.vmem [shape: bf16[32,64], index: 12, kind: input, shape index: {}]   ;;  %s5262_s13 = inlined_call_operand.vmem [shape: f32[1,64], index: 13, kind: input, shape index: {}]   ;;  %s5263_s14 = inlined_call_operand.vmem [shape: bf16[3,64,256], index: 14, kind: input, shape index: {}]   ;;  %s5264_s15 = inlined_call_operand.vmem [shape: f32[3,1,96], index: 15, kind: input, shape index: {}]   ;;  %s5265_s16 = inlined_call_operand.vmem [shape: f32[3,1,96], index: 16, kind: input, shape index: {}]   ;;  %s5266_s17 = inlined_call_operand.vmem [shape: f32[3,1,96], index: 17, kind: input, shape index: {}]   ;;  %s5267_s18 = inlined_call_operand.vmem [shape: bf16[64,8], index: 18, kind: input, shape index: {}]   ;;  %s5268_s19 = inlined_call_operand.vmem [shape: f32[1,8], index: 19, kind: input, shape index: {}]   ;;  %s5269_s20 = inlined_call_operand.hbm [shape: f32[2,8], index: 20, kind: output, shape index: {}]  }
   0x1   :  { %5270 = sst [smem:[#allocation10_spill]] %s5249_s0 }
   0x2   :  { %5271 = sst [smem:[#allocation11_spill]] %s5250_s1 }
   0x3   :  { %5272 = sst [smem:[#allocation12_spill]] %s5251_s2 }
   0x4   :  { %5273 = sst [smem:[#allocation13_spill]] %s5252_s3 }
   0x5   :  { %5274 = sst [smem:[#allocation14_spill]] %s5253_s4 }
   0x6   :  { %25 = vsyncpa [#allocation5], 0 }
   0x7   :  { %26 = vsyncpa [#allocation6], 0  ;;  %s4297_s1 = smov [#allocation4]  }
   0x8   :  { %s35_s22 = sshll.u32 %s4297_s1, 4  ;;  %s36_s22 = int_to_ptr.vmem [resolvable:$true] %s35_s22 }
   0x9   :  { %s4261_s23 = scalar_lea.vmem %s36_s22, 128  ;;  %p4266_p1 = scmp.lt.s32.totalorder %s36_s22, %s36_s22 }
   0xa   :  { %p4262_p0 = scmp.ne.s32.totalorder %s36_s22, %s4261_s23  ;;  %p4267_p2 = scmp.lt.s32.totalorder %s4261_s23, %s4261_s23 }
   0xc   :  { %p4268_p3 = por %p4267_p2, %p4266_p1 }
   0xe   :  { %p4269_p4 = pnand %p4268_p3, %p4262_p0 }
  0x10   :  { %4272 = shalt.err (!%p4269_p4)
}
  0x11   :  { %s5275_s25 = sld [smem:[#allocation11_spill]] }
  0x17   :  { %38 = dma.hbm_to_vmem [thread:$0]  %s5275_s25, 128, %s36_s22, [#allocation5]  }
  0x18   :  { %4293 = dma.done.wait [#allocation5], 128  }
  0x19   :  { %4294 = vsyncadd [#allocation5], 4294967168  ;;  %v4298_v0 = vmov 0.0   ;;  %vm4299_vm0 = vmmov 0   ;;  %s5276_s27 = sld [smem:[#allocation14_spill]]  ;;  %vm96_vm1 = vcmask 130048   ;;  %v183_v39 = vlaneseq }
  0x1a   :  { %3736 = vmatprep.subr.bf16.mxu0 %v4298_v0  ;;  %3738 = vmatprep.mubr.msk.bf16.mxu0 %vm4299_vm0, %v4298_v0  ;;  %s5277_s29 = sld [smem:[#allocation10_spill]]  ;;  %v3465_v4 = vld [vmem:[%s5254_s5] ss:$0 sm:$0xff]  ;;  %vm140_vm2 = vcmask 261120   ;;  %v4433_v11 = vld [vmem:[%s5259_s10 + $0x8] sm:$0xff]   ;;  %v4300_v12 = vmov 0  }
  0x1b   :  { %248 = vmatprep.mubr.bf16.mxu1 %v4300_v12  ;;  %4002 = vset.pattern.permute.xlu1 %v4300_v12  ;;  %v4441_v13 = vld [vmem:[%s5259_s10] sm:$0xff]   ;;  %v4008_v19 = vld [vmem:[%s5257_s8 + $0x14] ss:$8 sps:$4 sm:$0xff]   ;;  %v4010_v20 = vld [vmem:[%s5257_s8 + $0x10] ss:$8 sps:$4 sm:$0xff]   ;;  %s4301_s30 = smov 64  }
  0x1c   :  { %v4011_v21 = vld [vmem:[%s5257_s8 + $0x4] ss:$8 sps:$4 sm:$0xff]   ;;  %228 = vmatprep.subr.bf16.mxu1 %v4008_v19  ;;  %v4013_v22 = vld [vmem:[%s5257_s8] ss:$8 sps:$4 sm:$0xff]   ;;  %v4488_v40 = vshrl.u32 %v183_v39, 7  ;;  %s4302_s22 = smov 96  }
  0x1d   :  { %229 = vmatpush1.bf16.msra.mxu1 %v4010_v20  ;;  %v4470_v23 = vld [vmem:[%s5260_s11] sm:$0x1]  ;;  %vm352_vm3 = vcmask 122880   ;;  %vm354_vm4 = vcmask 254080   ;;  %vm2635_vm5 = vcmask 1043456   ;;  %s4303_s24 = smov 32  }
  0x1e   :  { %230 = vmatprep.subr.bf16.mxu1 %v4011_v21  ;;  %v3468_v33 = vld [vmem:[%s5255_s6] ss:$0 sm:$0xff]  ;;  %v4491_v41 = vsub.s32 0, %v4488_v40  ;;  %v4497_v43 = vsub.s32 1, %v4488_v40  ;;  %vm2627_vm6 = vcmask 64512   ;;  %vm2734_vm7 = vcmask 523264  }
  0x1f   :  { %v4005_v1 = vld [vmem:[%s5276_s27] sm:$0xff]   ;;  %s5279_s4 = sld [smem:[#allocation12_spill]]  ;;  %vm3246_vm9 = vcmask 58368   ;;  %vm3339_vm11 = vcmask 523520   ;;  %vm3359_vm12 = vcmask 1040384  }
  0x20   :  { %v79_v2 = vld [vmem:[%s5277_s29] sm:$0xff]  ;;  %3737 = vmatpush3.bf16.msra.mxu0 %v4005_v1 }
  0x21   :  { %v80_v3 = vpack.c.bf16 %v79_v2, %v79_v2  ;;  %3742 = vmatprep.subr.bf16.mxu0 %v4298_v0  ;;  %231 = vmatpush1.bf16.msra.mxu1 %v4013_v22  ;;  %v3469_v35 = vld [vmem:[%s5256_s7] ss:$0 sm:$0xff]  ;;  %s4305_s7 = smov [#allocation7]  }
  0x22   :  { %3750 = vmatprep.subr.bf16.mxu1 %v4298_v0  ;;  %v181_v42 = vld [vmem:[%s5258_s9] sm:$0x3]  ;;  %s3456_s23 = sshll.u32 %s4305_s7, 4  ;;  %s3457_s23 = int_to_ptr.vmem [resolvable:$true] %s3456_s23 }
  0x23   :  { %3739 = vmatmul.mubr.msk.bf16.vlgmr.msra.gmra.mxu0 %vm96_vm1, %v80_v3  ;;  %v186_v44 = vrot.slane %v181_v42, %v4491_v41  ;;  %v190_v45 = vrot.slane %v181_v42, %v4497_v43  ;;  %p4278_p6 = scmp.lt.s32.totalorder %s3457_s23, %s3457_s23 }
  0x24   :  { %3746 = vmatprep.mubr.msk.bf16.mxu0 %vm4299_vm0, %v4298_v0  ;;  %3743 = vmatpush3.bf16.msra.mxu0 %v4433_v11 }
  0x25   :  { %3744 = vmatprep.subr.bf16.mxu0 %v4298_v0 }
  0x28   :  { %3745 = vmatpush3.bf16.msra.mxu0 %v4441_v13 }
  0x29   :  { %3758 = vmatprep.subr.bf16.mxu0 %v4298_v0 }
  0x2b   :  { %3747 = vmatmul.mubr.bf16.vlgmr.msra.gmra.mxu0 %v4300_v12 }
  0x2c   :  { %3759 = vmatpush3.bf16.msra.mxu0 %v4433_v11  ;;  %3762 = vmatprep.mubr.msk.bf16.mxu0 %vm4299_vm0, %v4298_v0 }
  0x2d   :  { %3760 = vmatprep.subr.bf16.mxu0 %v4298_v0 }
  0x30   :  { %3761 = vmatpush3.bf16.msra.mxu0 %v4441_v13 }
  0x31   :  { %3774 = vmatprep.subr.bf16.mxu0 %v4298_v0 }
  0xe3   :  { %v134_v5 = vpop.f32.mrf.mxu0 }
  0xe4   :  { %v135_v6 = vadd.f32 %v3465_v4, %v134_v5 }
  0xe5   :  { %v3740_v7 = vpop.f32.mrf.mxu0 }
  0xe6   :  { %v141_v8 = vsel %vm140_vm2, %v135_v6, 0.0 }
  0xe7   :  { %142 = vadd.xlane.f32.xlu0 %v141_v8  ;;  %v137_v9 = vpop.f32.mrf.mxu0 }
  0xe9   :  { %v3741_v10 = vpop.f32.mrf.mxu0 }
  0xeb   :  { %v316_v24 = vpop.f32.mrf.mxu0 }
  0xec   :  { %v317_v25 = vadd.f32 %v316_v24, %v4470_v23 }
  0xed   :  { %v3748_v26 = vpop.f32.mrf.mxu0 }
  0xee   :  { %330 = vrot.lane.b32.xlu1 %v317_v25, %s4301_s30 }
  0xef   :  { %v319_v27 = vpop.f32.mrf.mxu0 }
  0xf1   :  { %v3749_v28 = vpop.f32.mrf.mxu0 }
 0x160   :  { %v331_v59 = vpop.permute.xlu1 %330 }
 0x170   :  { %v143_v14 = vpop.xlane.xlu0 %142 }
 0x171   :  { %v145_v15 = vmul.f32 0.03125, %v143_v14 }
 0x173   :  { %v146_v16 = vsub.f32 %v135_v6, %v145_v15 }
 0x175   :  { %v147_v17 = vmul.f32 %v146_v16, %v146_v16 }
 0x177   :  { %v148_v18 = vsel %vm140_vm2, %v147_v17, 0.0 }
 0x178   :  { %149 = vadd.xlane.f32.xlu0 %v148_v18 }
 0x201   :  { %v150_v29 = vpop.xlane.xlu0 %149 }
 0x202   :  { %v151_v30 = vmul.f32 0.03125, %v150_v29 }
 0x204   :  { %v152_v31 = vadd.f32 1e-06, %v151_v30 }
 0x206   :  { %4072 = vrsqrt.f32 %v152_v31 }
 0x213   :  { %v4073_v32 = vpop.eup %4072 }
 0x214   :  { %v154_v34 = vmul.f32 %v4073_v32, %v146_v16 }
 0x216   :  { %v162_v36 = vmul.f32 %v3468_v33, %v154_v34 }
 0x218   :  { %v170_v37 = vadd.f32 %v3469_v35, %v162_v36 }
 0x21a   :  { %v176_v38 = vpack.c.bf16 %v170_v37, %v170_v37 }
 0x21c   :  { %3474 = vmatmul.mubr.msk.bf16.vlgmr.msra.gmra.mxu1 %vm140_vm2, %v176_v38 }
 0x21d   :  { %3751 = vmatpush3.bf16.msra.mxu1 %v4433_v11  ;;  %3754 = vmatprep.mubr.msk.bf16.mxu1 %vm4299_vm0, %v4298_v0 }
 0x21e   :  { %3752 = vmatprep.subr.bf16.mxu1 %v4298_v0 }
 0x221   :  { %3753 = vmatpush3.bf16.msra.mxu1 %v4441_v13 }
 0x222   :  { %3766 = vmatprep.subr.bf16.mxu1 %v4298_v0 }
 0x2dc   :  { %v250_v46 = vpop.f32.mrf.mxu1 }
 0x2dd   :  { %v251_v47 = vadd.f32 %v250_v46, %v186_v44 }
 0x2de   :  { %v252_v48 = vpop.f32.mrf.mxu1 }
 0x2df   :  { %257 = vst [vmem:[#allocation2] sm:$0xff] %v251_v47  ;;  %v253_v49 = vadd.f32 %v252_v48, %v190_v45 }
 0x2e0   :  { %v254_v50 = vpop.f32.mrf.mxu1 }
 0x2e1   :  { %258 = vst [vmem:[#allocation2 + $0x8] sm:$0xff] %v253_v49 }
 0x2e2   :  { %v255_v51 = vpop.f32.mrf.mxu1 }
 0x2e6   :  { %v264_v52 = vld [vmem:[#allocation2] ss:$0 sm:$0xff]  ;;  %v356_v18 = vld [vmem:[#allocation2 + $0x1] ss:$0 sm:$0xff]  ;;  %v438_v48 = vld [vmem:[#allocation2 + $0x2] ss:$0 sm:$0xff] }
 0x2e8   :  { %v265_v53 = vld [vmem:[#allocation2 + $0xf] ss:$0 sm:$0xff]  ;;  %v357_v17 = vld [vmem:[#allocation2 + $0xe] ss:$0 sm:$0xff]  ;;  %v439_v47 = vld [vmem:[#allocation2 + $0xd] ss:$0 sm:$0xff] }
 0x2e9   :  { %v266_v54 = vadd.f32 %v265_v53, %v264_v52  ;;  %v358_v19 = vadd.f32 %v357_v17, %v356_v18  ;;  %v440_v49 = vadd.f32 %v439_v47, %v438_v48 }
 0x2eb   :  { %v322_v55 = vadd.f32 %v317_v25, %v266_v54 }
 0x2ed   :  { %v3477_v56 = vmul.f32 -1.442695, %v322_v55 }
 0x2ef   :  { %4074 = vpow2.f32 %v3477_v56 }
 0x2fc   :  { %v4075_v57 = vpop.eup %4074 }
 0x2fd   :  { %v326_v58 = vadd.f32 1.0, %v4075_v57 }
 0x2ff   :  { %4076 = vrcp.f32 %v326_v58 }
 0x30c   :  { %v4077_v60 = vpop.eup %4076 }
 0x30d   :  { %v333_v61 = vmul.f32 %v4077_v60, %v331_v59  ;;  %v340_v2 = vsub.f32 1.0, %v4077_v60  ;;  %v346_v4 = vmul.f32 0.0, %v4077_v60 }
 0x30f   :  { %335 = vrot.lane.b32.xlu1 %v333_v61, %s4301_s30 }
 0x381   :  { %v336_v62 = vpop.permute.xlu1 %335 }
 0x382   :  { %v338_v63 = vadd.f32 %v336_v62, %v266_v54 }
 0x384   :  { %4078 = vtanh.f32 %v338_v63 }
 0x391   :  { %v4079_v1 = vpop.eup %4078 }
 0x392   :  { %342 = vrot.lane.b32.xlu0 %v4079_v1, %s4302_s22 }
 0x404   :  { %v343_v3 = vpop.permute.xlu0 %342 }
 0x405   :  { %v345_v5 = vmul.f32 %v343_v3, %v340_v2 }
 0x407   :  { %v4503_v6 = vadd.f32 %v346_v4, %v345_v5 }
 0x409   :  { %v359_v7 = vpack.c.bf16 %v4503_v6, %v4503_v6 }
 0x40b   :  { %361 = vrot.lane.b32.xlu1 %v359_v7, %s4302_s22 }
 0x47d   :  { %v362_v8 = vpop.permute.xlu1 %361 }
 0x47e   :  { %3755 = vmatmul.mubr.msk.bf16.vlgmr.msra.gmra.mxu1 %vm140_vm2, %v362_v8 }
 0x47f   :  { %3767 = vmatpush3.bf16.msra.mxu1 %v4433_v11  ;;  %3770 = vmatprep.mubr.msk.bf16.mxu1 %vm4299_vm0, %v4298_v0 }
 0x480   :  { %3768 = vmatprep.subr.bf16.mxu1 %v4298_v0 }
 0x483   :  { %3769 = vmatpush3.bf16.msra.mxu1 %v4441_v13 }
 0x484   :  { %3782 = vmatprep.subr.bf16.mxu1 %v4298_v0 }
 0x53e   :  { %v400_v9 = vpop.f32.mrf.mxu1 }
 0x53f   :  { %v401_v10 = vadd.f32 %v400_v9, %v4470_v23 }
 0x540   :  { %v3756_v14 = vpop.f32.mrf.mxu1 }
 0x541   :  { %414 = vrot.lane.b32.xlu1 %v401_v10, %s4301_s30  ;;  %v406_v20 = vadd.f32 %v401_v10, %v358_v19  ;;  %v521_v10 = vld [vmem:[#allocation2 + $0xc] ss:$0 sm:$0xff]  ;;  %v520_v14 = vld [vmem:[#allocation2 + $0x3] ss:$0 sm:$0xff] }
 0x542   :  { %v403_v15 = vpop.f32.mrf.mxu1 }
 0x543   :  { %v3479_v21 = vmul.f32 -1.442695, %v406_v20  ;;  %v522_v15 = vadd.f32 %v521_v10, %v520_v14 }
 0x544   :  { %v3757_v16 = vpop.f32.mrf.mxu1 }
 0x545   :  { %4080 = vpow2.f32 %v3479_v21 }
 0x552   :  { %v4081_v22 = vpop.eup %4080 }
 0x553   :  { %v410_v24 = vadd.f32 1.0, %v4081_v22 }
 0x555   :  { %4082 = vrcp.f32 %v410_v24 }
 0x562   :  { %v4083_v25 = vpop.eup %4082 }
 0x563   :  { %v424_v31 = vsub.f32 1.0, %v4083_v25  ;;  %v430_v33 = vmul.f32 %v4083_v25, %v4503_v6 }
 0x5b3   :  { %v415_v26 = vpop.permute.xlu1 %414 }
 0x5b4   :  { %v417_v27 = vmul.f32 %v4083_v25, %v415_v26 }
 0x5b6   :  { %419 = vrot.lane.b32.xlu1 %v417_v27, %s4301_s30 }
 0x628   :  { %v420_v28 = vpop.permute.xlu1 %419 }
 0x629   :  { %v422_v29 = vadd.f32 %v420_v28, %v358_v19 }
 0x62b   :  { %4084 = vtanh.f32 %v422_v29 }
 0x638   :  { %v4085_v30 = vpop.eup %4084 }
 0x639   :  { %426 = vrot.lane.b32.xlu1 %v4085_v30, %s4302_s22 }
 0x6ab   :  { %v427_v32 = vpop.permute.xlu1 %426 }
 0x6ac   :  { %v429_v34 = vmul.f32 %v427_v32, %v424_v31 }
 0x6ae   :  { %v4520_v35 = vadd.f32 %v430_v33, %v429_v34 }
 0x6b0   :  { %v441_v36 = vpack.c.bf16 %v4520_v35, %v4520_v35 }
 0x6b2   :  { %443 = vrot.lane.b32.xlu1 %v441_v36, %s4302_s22 }
 0x724   :  { %v444_v37 = vpop.permute.xlu1 %443 }
 0x725   :  { %3763 = vmatmul.mubr.msk.bf16.vlgmr.msra.gmra.mxu0 %vm140_vm2, %v444_v37 }
 0x726   :  { %3775 = vmatpush3.bf16.msra.mxu0 %v4433_v11  ;;  %3778 = vmatprep.mubr.msk.bf16.mxu0 %vm4299_vm0, %v4298_v0 }
 0x727   :  { %3776 = vmatprep.subr.bf16.mxu0 %v4298_v0 }
 0x72a   :  { %3777 = vmatpush3.bf16.msra.mxu0 %v4441_v13 }
 0x72b   :  { %3790 = vmatprep.subr.bf16.mxu0 %v4298_v0 }
 0x7e5   :  { %v482_v38 = vpop.f32.mrf.mxu0 }
 0x7e6   :  { %v483_v42 = vadd.f32 %v482_v38, %v4470_v23 }
 0x7e7   :  { %v3764_v44 = vpop.f32.mrf.mxu0 }
 0x7e8   :  { %496 = vrot.lane.b32.xlu1 %v483_v42, %s4301_s30  ;;  %v488_v50 = vadd.f32 %v483_v42, %v440_v49  ;;  %v603_v44 = vld [vmem:[#allocation2 + $0xb] ss:$0 sm:$0xff] }
 0x7e9   :  { %v485_v45 = vpop.f32.mrf.mxu0 }
 0x7ea   :  { %v3481_v51 = vmul.f32 -1.442695, %v488_v50  ;;  %v602_v45 = vld [vmem:[#allocation2 + $0x4] ss:$0 sm:$0xff] }
 0x7eb   :  { %v3765_v46 = vpop.f32.mrf.mxu0 }
 0x7ec   :  { %4086 = vpow2.f32 %v3481_v51  ;;  %v604_v46 = vadd.f32 %v603_v44, %v602_v45 }
 0x7f9   :  { %v4087_v52 = vpop.eup %4086 }
 0x7fa   :  { %v492_v53 = vadd.f32 1.0, %v4087_v52 }
 0x7fc   :  { %4088 = vrcp.f32 %v492_v53 }
 0x809   :  { %v4089_v54 = vpop.eup %4088 }
 0x80a   :  { %v506_v60 = vsub.f32 1.0, %v4089_v54  ;;  %v512_v62 = vmul.f32 %v4089_v54, %v4520_v35 }
 0x85a   :  { %v497_v55 = vpop.permute.xlu1 %496 }
 0x85b   :  { %v499_v56 = vmul.f32 %v4089_v54, %v497_v55 }
 0x85d   :  { %501 = vrot.lane.b32.xlu0 %v499_v56, %s4301_s30 }
 0x8cf   :  { %v502_v57 = vpop.permute.xlu0 %501 }
 0x8d0   :  { %v504_v58 = vadd.f32 %v502_v57, %v440_v49 }
 0x8d2   :  { %4090 = vtanh.f32 %v504_v58 }
 0x8df   :  { %v4091_v59 = vpop.eup %4090 }
 0x8e0   :  { %508 = vrot.lane.b32.xlu1 %v4091_v59, %s4302_s22 }
 0x952   :  { %v509_v61 = vpop.permute.xlu1 %508 }
 0x953   :  { %v511_v63 = vmul.f32 %v509_v61, %v506_v60 }
 0x955   :  { %v4537_v1 = vadd.f32 %v512_v62, %v511_v63 }
 0x957   :  { %v523_v2 = vpack.c.bf16 %v4537_v1, %v4537_v1 }
 0x959   :  { %525 = vrot.lane.b32.xlu0 %v523_v2, %s4302_s22 }
 0x9cb   :  { %v526_v3 = vpop.permute.xlu0 %525 }
 0x9cc   :  { %3771 = vmatmul.mubr.msk.bf16.vlgmr.msra.gmra.mxu1 %vm140_vm2, %v526_v3 }
 0x9cd   :  { %3783 = vmatpush3.bf16.msra.mxu1 %v4433_v11  ;;  %3786 = vmatprep.mubr.msk.bf16.mxu1 %vm4299_vm0, %v4298_v0 }
 0x9ce   :  { %3784 = vmatprep.subr.bf16.mxu1 %v4298_v0 }
 0x9d1   :  { %3785 = vmatpush3.bf16.msra.mxu1 %v4441_v13 }
 0x9d2   :  { %3798 = vmatprep.subr.bf16.mxu1 %v4298_v0 }
 0xa8c   :  { %v564_v4 = vpop.f32.mrf.mxu1 }
 0xa8d   :  { %v565_v5 = vadd.f32 %v564_v4, %v4470_v23 }
 0xa8e   :  { %v3772_v7 = vpop.f32.mrf.mxu1 }
 0xa8f   :  { %578 = vrot.lane.b32.xlu1 %v565_v5, %s4301_s30  ;;  %v570_v16 = vadd.f32 %v565_v5, %v522_v15 }
 0xa90   :  { %v567_v8 = vpop.f32.mrf.mxu1 }
 0xa91   :  { %v3483_v17 = vmul.f32 -1.442695, %v570_v16  ;;  %v685_v8 = vld [vmem:[#allocation2 + $0xa] ss:$0 sm:$0xff] }
 0xa92   :  { %v3773_v9 = vpop.f32.mrf.mxu1 }
 0xa93   :  { %4092 = vpow2.f32 %v3483_v17  ;;  %v684_v9 = vld [vmem:[#allocation2 + $0x5] ss:$0 sm:$0xff] }
 0xa94   :  { %v686_v10 = vadd.f32 %v685_v8, %v684_v9 }
 0xaa0   :  { %v4093_v18 = vpop.eup %4092 }
 0xaa1   :  { %v574_v19 = vadd.f32 1.0, %v4093_v18 }
 0xaa3   :  { %4094 = vrcp.f32 %v574_v19 }
 0xab0   :  { %v4095_v20 = vpop.eup %4094 }
 0xab1   :  { %v588_v27 = vsub.f32 1.0, %v4095_v20  ;;  %v594_v29 = vmul.f32 %v4095_v20, %v4537_v1 }
 0xb01   :  { %v579_v21 = vpop.permute.xlu1 %578 }
 0xb02   :  { %v581_v22 = vmul.f32 %v4095_v20, %v579_v21 }
 0xb04   :  { %583 = vrot.lane.b32.xlu0 %v581_v22, %s4301_s30 }
 0xb76   :  { %v584_v24 = vpop.permute.xlu0 %583 }
 0xb77   :  { %v586_v25 = vadd.f32 %v584_v24, %v522_v15 }
 0xb79   :  { %4096 = vtanh.f32 %v586_v25 }
 0xb86   :  { %v4097_v26 = vpop.eup %4096 }
 0xb87   :  { %590 = vrot.lane.b32.xlu1 %v4097_v26, %s4302_s22 }
 0xbf9   :  { %v591_v28 = vpop.permute.xlu1 %590 }
 0xbfa   :  { %v593_v30 = vmul.f32 %v591_v28, %v588_v27 }
 0xbfc   :  { %v4554_v31 = vadd.f32 %v594_v29, %v593_v30 }
 0xbfe   :  { %v605_v32 = vpack.c.bf16 %v4554_v31, %v4554_v31 }
 0xc00   :  { %607 = vrot.lane.b32.xlu0 %v605_v32, %s4302_s22 }
 0xc72   :  { %v608_v33 = vpop.permute.xlu0 %607 }
 0xc73   :  { %3779 = vmatmul.mubr.msk.bf16.vlgmr.msra.gmra.mxu0 %vm140_vm2, %v608_v33 }
 0xc74   :  { %3791 = vmatpush3.bf16.msra.mxu0 %v4433_v11  ;;  %3794 = vmatprep.mubr.msk.bf16.mxu0 %vm4299_vm0, %v4298_v0 }
 0xc75   :  { %3792 = vmatprep.subr.bf16.mxu0 %v4298_v0 }
 0xc78   :  { %3793 = vmatpush3.bf16.msra.mxu0 %v4441_v13 }
 0xc79   :  { %3806 = vmatprep.subr.bf16.mxu0 %v4298_v0 }
 0xd33   :  { %v646_v34 = vpop.f32.mrf.mxu0 }
 0xd34   :  { %v647_v36 = vadd.f32 %v646_v34, %v4470_v23 }
 0xd35   :  { %v3780_v37 = vpop.f32.mrf.mxu0 }
 0xd36   :  { %660 = vrot.lane.b32.xlu1 %v647_v36, %s4301_s30  ;;  %v652_v47 = vadd.f32 %v647_v36, %v604_v46  ;;  %v767_v37 = vld [vmem:[#allocation2 + $0x9] ss:$0 sm:$0xff] }
 0xd37   :  { %v649_v38 = vpop.f32.mrf.mxu0 }
 0xd38   :  { %v3485_v48 = vmul.f32 -1.442695, %v652_v47  ;;  %v766_v38 = vld [vmem:[#allocation2 + $0x6] ss:$0 sm:$0xff] }
 0xd39   :  { %v3781_v42 = vpop.f32.mrf.mxu0 }
 0xd3a   :  { %4098 = vpow2.f32 %v3485_v48  ;;  %v768_v42 = vadd.f32 %v767_v37, %v766_v38  ;;  %v4669_v37 = vld [vmem:[%s5259_s10 + $0x10] sm:$0xff]   ;;  %v4021_v38 = vld [vmem:[%s5257_s8 + $0x20] ss:$8 sps:$4 sm:$0xff]  }
 0xd47   :  { %v4099_v49 = vpop.eup %4098 }
 0xd48   :  { %v656_v50 = vadd.f32 1.0, %v4099_v49 }
 0xd4a   :  { %4100 = vrcp.f32 %v656_v50 }
 0xd57   :  { %v4101_v51 = vpop.eup %4100 }
 0xd58   :  { %v670_v57 = vsub.f32 1.0, %v4101_v51  ;;  %v676_v59 = vmul.f32 %v4101_v51, %v4554_v31 }
 0xda8   :  { %v661_v52 = vpop.permute.xlu1 %660 }
 0xda9   :  { %v663_v53 = vmul.f32 %v4101_v51, %v661_v52 }
 0xdab   :  { %665 = vrot.lane.b32.xlu0 %v663_v53, %s4301_s30 }
 0xe1d   :  { %v666_v54 = vpop.permute.xlu0 %665 }
 0xe1e   :  { %v668_v55 = vadd.f32 %v666_v54, %v604_v46 }
 0xe20   :  { %4102 = vtanh.f32 %v668_v55 }
 0xe2d   :  { %v4103_v56 = vpop.eup %4102 }
 0xe2e   :  { %672 = vrot.lane.b32.xlu1 %v4103_v56, %s4302_s22 }
 0xea0   :  { %v673_v58 = vpop.permute.xlu1 %672 }
 0xea1   :  { %v675_v60 = vmul.f32 %v673_v58, %v670_v57 }
 0xea3   :  { %v4571_v61 = vadd.f32 %v676_v59, %v675_v60 }
 0xea5   :  { %v687_v62 = vpack.c.bf16 %v4571_v61, %v4571_v61 }
 0xea7   :  { %689 = vrot.lane.b32.xlu0 %v687_v62, %s4302_s22 }
 0xf19   :  { %v690_v63 = vpop.permute.xlu0 %689 }
 0xf1a   :  { %3787 = vmatmul.mubr.msk.bf16.vlgmr.msra.gmra.mxu1 %vm140_vm2, %v690_v63 }
 0xf1b   :  { %3799 = vmatpush3.bf16.msra.mxu1 %v4433_v11  ;;  %3802 = vmatprep.mubr.msk.bf16.mxu1 %vm4299_vm0, %v4298_v0 }
 0xf1c   :  { %3800 = vmatprep.subr.bf16.mxu1 %v4298_v0 }
 0xf1f   :  { %3801 = vmatpush3.bf16.msra.mxu1 %v4441_v13 }
 0xfda   :  { %v728_v2 = vpop.f32.mrf.mxu1 }
 0xfdb   :  { %v729_v3 = vadd.f32 %v728_v2, %v4470_v23 }
 0xfdc   :  { %v3788_v4 = vpop.f32.mrf.mxu1 }
 0xfdd   :  { %742 = vrot.lane.b32.xlu1 %v729_v3, %s4301_s30  ;;  %v734_v14 = vadd.f32 %v729_v3, %v686_v10 }
 0xfde   :  { %v731_v5 = vpop.f32.mrf.mxu1 }
 0xfdf   :  { %v3487_v11 = vmul.f32 -1.442695, %v734_v14  ;;  %v849_v5 = vld [vmem:[#allocation2 + $0x8] ss:$0 sm:$0xff] }
 0xfe0   :  { %v3789_v7 = vpop.f32.mrf.mxu1 }
 0xfe1   :  { %4104 = vpow2.f32 %v3487_v11  ;;  %v848_v7 = vld [vmem:[#allocation2 + $0x7] ss:$0 sm:$0xff] }
 0xfe2   :  { %v850_v8 = vadd.f32 %v849_v5, %v848_v7 }
 0xfee   :  { %v4105_v15 = vpop.eup %4104 }
 0xfef   :  { %v738_v16 = vadd.f32 1.0, %v4105_v15 }
 0xff1   :  { %4106 = vrcp.f32 %v738_v16 }
 0xffe   :  { %v4107_v17 = vpop.eup %4106 }
 0xfff   :  { %v752_v22 = vsub.f32 1.0, %v4107_v17  ;;  %v758_v25 = vmul.f32 %v4107_v17, %v4571_v61 }
0x104f   :  { %v743_v18 = vpop.permute.xlu1 %742 }
0x1050   :  { %v745_v13 = vmul.f32 %v4107_v17, %v743_v18 }
0x1052   :  { %747 = vrot.lane.b32.xlu0 %v745_v13, %s4301_s30 }
0x10c4   :  { %v748_v19 = vpop.permute.xlu0 %747 }
0x10c5   :  { %v750_v20 = vadd.f32 %v748_v19, %v686_v10 }
0x10c7   :  { %4108 = vtanh.f32 %v750_v20 }
0x10d4   :  { %v4109_v21 = vpop.eup %4108 }
0x10d5   :  { %754 = vrot.lane.b32.xlu1 %v4109_v21, %s4302_s22  ;;  %v4633_v21 = vld [vmem:[%s5261_s12] sm:$0xff]  }
0x1147   :  { %v755_v24 = vpop.permute.xlu1 %754 }
0x1148   :  { %v757_v26 = vmul.f32 %v755_v24, %v752_v22 }
0x114a   :  { %v4587_v27 = vadd.f32 %v758_v25, %v757_v26 }
0x114c   :  { %v769_v28 = vpack.c.bf16 %v4587_v27, %v4587_v27 }
0x114e   :  { %771 = vrot.lane.b32.xlu0 %v769_v28, %s4302_s22 }
0x11c0   :  { %v772_v29 = vpop.permute.xlu0 %771 }
0x11c1   :  { %3795 = vmatmul.mubr.msk.bf16.vlgmr.msra.gmra.mxu0 %vm140_vm2, %v772_v29 }
0x11c2   :  { %3810 = vmatprep.mubr.msk.bf16.mxu0 %vm4299_vm0, %v4298_v0 }
0x1281   :  { %v810_v30 = vpop.f32.mrf.mxu0 }
0x1282   :  { %v811_v32 = vadd.f32 %v810_v30, %v4470_v23 }
0x1283   :  { %v3796_v33 = vpop.f32.mrf.mxu0 }
0x1284   :  { %824 = vrot.lane.b32.xlu1 %v811_v32, %s4301_s30  ;;  %v816_v44 = vadd.f32 %v811_v32, %v768_v42  ;;  %v4657_v33 = vld [vmem:[%s5259_s10 + $0x18] sm:$0xff]  }
0x1285   :  { %v813_v34 = vpop.f32.mrf.mxu0 }
0x1286   :  { %v3489_v45 = vmul.f32 -1.442695, %v816_v44  ;;  %v4018_v34 = vld [vmem:[%s5257_s8 + $0x30] ss:$8 sps:$4 sm:$0xff]   ;;  %v4691_v44 = vld [vmem:[%s5262_s13] ss:$0 sm:$0xff] }
0x1287   :  { %v3797_v36 = vpop.f32.mrf.mxu0 }
0x1288   :  { %4110 = vpow2.f32 %v3489_v45  ;;  %v4020_v36 = vld [vmem:[%s5257_s8 + $0x34] ss:$8 sps:$4 sm:$0xff]  }
0x1289   :  { %1059 = vmatprep.subr.bf16.mxu1 %v4020_v36 }
0x1295   :  { %v4111_v46 = vpop.eup %4110 }
0x1296   :  { %v820_v47 = vadd.f32 1.0, %v4111_v46 }
0x1298   :  { %4112 = vrcp.f32 %v820_v47 }
0x12a5   :  { %v4113_v48 = vpop.eup %4112 }
0x12a6   :  { %v834_v54 = vsub.f32 1.0, %v4113_v48  ;;  %v840_v56 = vmul.f32 %v4113_v48, %v4587_v27 }
0x12f6   :  { %v825_v49 = vpop.permute.xlu1 %824 }
0x12f7   :  { %v827_v50 = vmul.f32 %v4113_v48, %v825_v49 }
0x12f9   :  { %829 = vrot.lane.b32.xlu0 %v827_v50, %s4301_s30 }
0x136b   :  { %v830_v51 = vpop.permute.xlu0 %829 }
0x136c   :  { %v832_v52 = vadd.f32 %v830_v51, %v768_v42  ;;  %v4023_v42 = vld [vmem:[%s5257_s8 + $0x24] ss:$8 sps:$4 sm:$0xff]   ;;  %v4698_v51 = vld [vmem:[%s5260_s11 + $0x1] sm:$0x1] }
0x136e   :  { %4114 = vtanh.f32 %v832_v52 }
0x137b   :  { %v4115_v53 = vpop.eup %4114 }
0x137c   :  { %836 = vrot.lane.b32.xlu1 %v4115_v53, %s4302_s22 }
0x13ee   :  { %v837_v55 = vpop.permute.xlu1 %836 }
0x13ef   :  { %v839_v57 = vmul.f32 %v837_v55, %v834_v54 }
0x13f1   :  { %v841_v58 = vadd.f32 %v840_v56, %v839_v57 }
0x13f3   :  { %v851_v59 = vpack.c.bf16 %v841_v58, %v841_v58 }
0x13f5   :  { %853 = vrot.lane.b32.xlu0 %v851_v59, %s4302_s22 }
0x1467   :  { %v854_v60 = vpop.permute.xlu0 %853 }
0x1468   :  { %3803 = vmatmul.mubr.msk.bf16.vlgmr.msra.gmra.mxu1 %vm140_vm2, %v854_v60 }
0x1469   :  { %1079 = vmatprep.mubr.bf16.mxu1 %v4300_v12  ;;  %1060 = vmatpush1.bf16.msra.mxu1 %v4018_v34 }
0x146a   :  { %1061 = vmatprep.subr.bf16.mxu1 %v4023_v42 }
0x146d   :  { %1062 = vmatpush1.bf16.msra.mxu1 %v4021_v38 }
0x146e   :  { %3822 = vmatprep.subr.bf16.mxu1 %v4298_v0 }
0x1528   :  { %v892_v62 = vpop.f32.mrf.mxu1 }
0x1529   :  { %v893_v63 = vadd.f32 %v892_v62, %v4470_v23 }
0x152a   :  { %v3804_v2 = vpop.f32.mrf.mxu1 }
0x152b   :  { %906 = vrot.lane.b32.xlu1 %v893_v63, %s4301_s30  ;;  %v898_v9 = vadd.f32 %v893_v63, %v850_v8 }
0x152c   :  { %v895_v3 = vpop.f32.mrf.mxu1 }
0x152d   :  { %v3491_v10 = vmul.f32 -1.442695, %v898_v9  ;;  %v3501_v3 = vld [vmem:[%s5258_s9 + $0x2] sm:$0x3] }
0x152e   :  { %v3805_v4 = vpop.f32.mrf.mxu1  ;;  %v1021_v5 = vrot.slane %v3501_v3, %v4497_v43 }
0x152f   :  { %4116 = vpow2.f32 %v3491_v10  ;;  %v1017_v4 = vrot.slane %v3501_v3, %v4491_v41 }
0x153c   :  { %v4117_v14 = vpop.eup %4116 }
0x153d   :  { %v902_v11 = vadd.f32 1.0, %v4117_v14 }
0x153f   :  { %4118 = vrcp.f32 %v902_v11 }
0x154c   :  { %v4119_v15 = vpop.eup %4118 }
0x154d   :  { %v916_v20 = vsub.f32 1.0, %v4119_v15 }
0x159d   :  { %v907_v16 = vpop.permute.xlu1 %906 }
0x159e   :  { %v909_v17 = vmul.f32 %v4119_v15, %v907_v16 }
0x15a0   :  { %911 = vrot.lane.b32.xlu0 %v909_v17, %s4301_s30 }
0x15a4   :  { %349 = vrot.lane.b32.xlu0 %v4503_v6, %s4302_s22 }
0x15a8   :  { %515 = vrot.lane.b32.xlu0 %v4537_v1, %s4302_s22  ;;  %v4627_v1 = vld [vmem:[%s5261_s12 + $0x8] sm:$0xff]  }
0x15a9   :  { %3807 = vmatpush3.bf16.msra.mxu0 %v4627_v1 }
0x15aa   :  { %3808 = vmatprep.subr.bf16.mxu0 %v4298_v0 }
0x15ac   :  { %679 = vrot.lane.b32.xlu0 %v4571_v61, %s4302_s22 }
0x15ad   :  { %3809 = vmatpush3.bf16.msra.mxu0 %v4633_v21 }
0x15ae   :  { %3814 = vmatprep.subr.bf16.mxu0 %v4298_v0 }
0x15b0   :  { %843 = vrot.lane.b32.xlu0 %v841_v58, %s4302_s22 }
0x1612   :  { %v912_v23 = vpop.permute.xlu0 %911 }
0x1613   :  { %v914_v18 = vadd.f32 %v912_v23, %v850_v8 }
0x1615   :  { %4120 = vtanh.f32 %v914_v18 }
0x1616   :  { %v350_v13 = vpop.permute.xlu0 %349 }
0x1617   :  { %353 = vst.msk [vmem:[#allocation3] sm:$0x1] %vm352_vm3, %v350_v13 }
0x1618   :  { %355 = vst.msk [vmem:[#allocation3 + $0x7] sm:$0x1] %vm354_vm4, %v350_v13 }
0x161a   :  { %v516_v19 = vpop.permute.xlu0 %515 }
0x161b   :  { %518 = vst.msk [vmem:[#allocation3 + $0x2] sm:$0x1] %vm352_vm3, %v516_v19 }
0x161c   :  { %519 = vst.msk [vmem:[#allocation3 + $0x5] sm:$0x1] %vm354_vm4, %v516_v19 }
0x161e   :  { %v680_v61 = vpop.permute.xlu0 %679 }
0x1622   :  { %v4121_v6 = vpop.eup %4120  ;;  %v844_v26 = vpop.permute.xlu0 %843 }
0x1623   :  { %918 = vrot.lane.b32.xlu1 %v4121_v6, %s4302_s22 }
0x1627   :  { %433 = vrot.lane.b32.xlu1 %v4520_v35, %s4302_s22 }
0x162b   :  { %597 = vrot.lane.b32.xlu1 %v4554_v31, %s4302_s22  ;;  %v922_v31 = vmul.f32 %v4119_v15, %v841_v58 }
0x162f   :  { %761 = vrot.lane.b32.xlu1 %v4587_v27, %s4302_s22 }
0x1695   :  { %v919_v35 = vpop.permute.xlu1 %918 }
0x1696   :  { %v921_v22 = vmul.f32 %v919_v35, %v916_v20 }
0x1698   :  { %v923_v24 = vadd.f32 %v922_v31, %v921_v22 }
0x1699   :  { %v434_v25 = vpop.permute.xlu1 %433 }
0x169a   :  { %436 = vst.msk [vmem:[#allocation3 + $0x1] sm:$0x1] %vm352_vm3, %v434_v25  ;;  %925 = vrot.lane.b32.xlu1 %v923_v24, %s4302_s22 }
0x169b   :  { %437 = vst.msk [vmem:[#allocation3 + $0x6] sm:$0x1] %vm354_vm4, %v434_v25  ;;  %847 = vst.msk [vmem:[#allocation3 + $0x1] sm:$0x1] %vm354_vm4, %v844_v26 }
0x169c   :  { %846 = vst.msk [vmem:[#allocation3 + $0x6] sm:$0x1] %vm352_vm3, %v844_v26 }
0x169d   :  { %v598_v27 = vpop.permute.xlu1 %597 }
0x169e   :  { %600 = vst.msk [vmem:[#allocation3 + $0x3] sm:$0x1] %vm352_vm3, %v598_v27 }
0x169f   :  { %601 = vst.msk [vmem:[#allocation3 + $0x4] sm:$0x1] %vm354_vm4, %v598_v27  ;;  %683 = vst.msk [vmem:[#allocation3 + $0x3] sm:$0x1] %vm354_vm4, %v680_v61 }
0x16a0   :  { %682 = vst.msk [vmem:[#allocation3 + $0x4] sm:$0x1] %vm352_vm3, %v680_v61 }
0x16a1   :  { %v762_v28 = vpop.permute.xlu1 %761 }
0x16a2   :  { %764 = vst.msk [vmem:[#allocation3 + $0x5] sm:$0x1] %vm352_vm3, %v762_v28 }
0x16a3   :  { %765 = vst.msk [vmem:[#allocation3 + $0x2] sm:$0x1] %vm354_vm4, %v762_v28 }
0x170c   :  { %v926_v29 = vpop.permute.xlu1 %925 }
0x170d   :  { %928 = vst.msk [vmem:[#allocation3 + $0x7] sm:$0x1] %vm352_vm3, %v926_v29 }
0x170e   :  { %929 = vst.msk [vmem:[#allocation3] sm:$0x1] %vm354_vm4, %v926_v29 }
0x1715   :  { %v930_v30 = vld [vmem:[#allocation3] sm:$0xff] }
0x1716   :  { %v931_v32 = vpack.c.bf16 %v930_v30, %v930_v30 }
0x1718   :  { %3811 = vmatmul.mubr.msk.bf16.vlgmr.msra.gmra.mxu0 %vm140_vm2, %v931_v32 }
0x1719   :  { %3818 = vmatprep.mubr.msk.bf16.mxu0 %vm4299_vm0, %v4298_v0  ;;  %3815 = vmatpush3.bf16.msra.mxu0 %v4657_v33 }
0x171a   :  { %3816 = vmatprep.subr.bf16.mxu0 %v4298_v0 }
0x171d   :  { %3817 = vmatpush3.bf16.msra.mxu0 %v4669_v37 }
0x171e   :  { %3830 = vmatprep.subr.bf16.mxu0 %v4298_v0 }
0x1720   :  { %3819 = vmatmul.mubr.bf16.vlgmr.msra.gmra.mxu0 %v4300_v12 }
0x1721   :  { %3831 = vmatpush3.bf16.msra.mxu0 %v4657_v33  ;;  %3834 = vmatprep.mubr.msk.bf16.mxu0 %vm4299_vm0, %v4298_v0 }
0x1722   :  { %3832 = vmatprep.subr.bf16.mxu0 %v4298_v0 }
0x1725   :  { %3833 = vmatpush3.bf16.msra.mxu0 %v4669_v37 }
0x1726   :  { %3846 = vmatprep.subr.bf16.mxu0 %v4298_v0 }
0x17d8   :  { %v987_v45 = vpop.f32.mrf.mxu0 }
0x17d9   :  { %v988_v46 = vadd.f32 %v4691_v44, %v987_v45 }
0x17da   :  { %v3812_v47 = vpop.f32.mrf.mxu0 }
0x17db   :  { %1001 = vrot.lane.b32.xlu0 %v988_v46, %s4302_s22  ;;  %v3496_v50 = vmul.f32 -1.442695, %v988_v46 }
0x17dc   :  { %v990_v48 = vpop.f32.mrf.mxu0 }
0x17dd   :  { %4122 = vpow2.f32 %v3496_v50 }
0x17de   :  { %v3813_v49 = vpop.f32.mrf.mxu0 }
0x17e0   :  { %v1146_v53 = vpop.f32.mrf.mxu0 }
0x17e1   :  { %v1147_v54 = vadd.f32 %v4698_v51, %v1146_v53 }
0x17e2   :  { %v3820_v56 = vpop.f32.mrf.mxu0 }
0x17e3   :  { %1160 = vrot.lane.b32.xlu1 %v1147_v54, %s4301_s30 }
0x17e4   :  { %v1149_v57 = vpop.f32.mrf.mxu0 }
0x17e6   :  { %v3821_v58 = vpop.f32.mrf.mxu0 }
0x17ea   :  { %v4123_v52 = vpop.eup %4122 }
0x17eb   :  { %v996_v55 = vadd.f32 1.0, %v4123_v52 }
0x17ed   :  { %4124 = vrcp.f32 %v996_v55 }
0x17fa   :  { %v4125_v59 = vpop.eup %4124 }
0x17fb   :  { %v999_v60 = vmul.f32 %v4125_v59, %v988_v46 }
0x184d   :  { %v1002_v62 = vpop.permute.xlu0 %1001 }
0x184e   :  { %v1004_v63 = vmul.f32 %v1002_v62, %v999_v60 }
0x1850   :  { %v1005_v2 = vpack.c.bf16 %v1004_v63, %v1004_v63 }
0x1852   :  { %3506 = vmatmul.mubr.msk.bf16.vlgmr.msra.gmra.mxu1 %vm140_vm2, %v1005_v2 }
0x1853   :  { %3823 = vmatpush3.bf16.msra.mxu1 %v4657_v33  ;;  %3826 = vmatprep.mubr.msk.bf16.mxu1 %vm4299_vm0, %v4298_v0 }
0x1854   :  { %3824 = vmatprep.subr.bf16.mxu1 %v4298_v0 }
0x1855   :  { %v1161_v6 = vpop.permute.xlu1 %1160 }
0x1857   :  { %3825 = vmatpush3.bf16.msra.mxu1 %v4669_v37 }
0x1858   :  { %3838 = vmatprep.subr.bf16.mxu1 %v4298_v0 }
0x1912   :  { %v1081_v7 = vpop.f32.mrf.mxu1 }
0x1913   :  { %v1082_v8 = vadd.f32 %v1081_v7, %v1017_v4 }
0x1914   :  { %v1083_v9 = vpop.f32.mrf.mxu1 }
0x1915   :  { %1088 = vst [vmem:[#allocation2] sm:$0xff] %v1082_v8  ;;  %v1084_v10 = vadd.f32 %v1083_v9, %v1021_v5 }
0x1916   :  { %v1085_v14 = vpop.f32.mrf.mxu1 }
0x1917   :  { %1089 = vst [vmem:[#allocation2 + $0x8] sm:$0xff] %v1084_v10 }
0x1918   :  { %v1086_v11 = vpop.f32.mrf.mxu1 }
0x191c   :  { %v1097_v15 = vld [vmem:[#allocation2] ss:$0 sm:$0xff]  ;;  %v1184_v46 = vld [vmem:[#allocation2 + $0x1] ss:$0 sm:$0xff]  ;;  %v1266_v11 = vld [vmem:[#allocation2 + $0x2] ss:$0 sm:$0xff] }
0x191e   :  { %v1098_v16 = vld [vmem:[#allocation2 + $0xf] ss:$0 sm:$0xff]  ;;  %v1185_v45 = vld [vmem:[#allocation2 + $0xe] ss:$0 sm:$0xff]  ;;  %v1267_v14 = vld [vmem:[#allocation2 + $0xd] ss:$0 sm:$0xff] }
0x191f   :  { %v1099_v17 = vadd.f32 %v1098_v16, %v1097_v15  ;;  %v1186_v47 = vadd.f32 %v1185_v45, %v1184_v46  ;;  %v1268_v15 = vadd.f32 %v1267_v14, %v1266_v11  ;;  %v1348_v45 = vld [vmem:[#allocation2 + $0x3] ss:$0 sm:$0xff]  ;;  %v1431_v14 = vld [vmem:[#allocation2 + $0xb] ss:$0 sm:$0xff]  ;;  %v1430_v11 = vld [vmem:[#allocation2 + $0x4] ss:$0 sm:$0xff] }
0x1921   :  { %v1152_v23 = vadd.f32 %v1147_v54, %v1099_v17 }
0x1923   :  { %v3514_v18 = vmul.f32 -1.442695, %v1152_v23 }
0x1925   :  { %4126 = vpow2.f32 %v3514_v18 }
0x1932   :  { %v4127_v13 = vpop.eup %4126 }
0x1933   :  { %v1156_v19 = vadd.f32 1.0, %v4127_v13 }
0x1935   :  { %4128 = vrcp.f32 %v1156_v19 }
0x1942   :  { %v4129_v61 = vpop.eup %4128 }
0x1943   :  { %v1163_v20 = vmul.f32 %v4129_v61, %v1161_v6  ;;  %v1170_v24 = vsub.f32 1.0, %v4129_v61  ;;  %v1176_v26 = vmul.f32 0.0, %v4129_v61 }
0x1945   :  { %1165 = vrot.lane.b32.xlu0 %v1163_v20, %s4301_s30 }
0x19b7   :  { %v1166_v35 = vpop.permute.xlu0 %1165 }
0x19b8   :  { %v1168_v31 = vadd.f32 %v1166_v35, %v1099_v17 }
0x19ba   :  { %4130 = vtanh.f32 %v1168_v31 }
0x19c7   :  { %v4131_v22 = vpop.eup %4130 }
0x19c8   :  { %1172 = vrot.lane.b32.xlu1 %v4131_v22, %s4302_s22 }
0x1a3a   :  { %v1173_v25 = vpop.permute.xlu1 %1172 }
0x1a3b   :  { %v1175_v27 = vmul.f32 %v1173_v25, %v1170_v24 }
0x1a3d   :  { %v4716_v28 = vadd.f32 %v1176_v26, %v1175_v27 }
0x1a3f   :  { %v1187_v29 = vpack.c.bf16 %v4716_v28, %v4716_v28 }
0x1a41   :  { %1189 = vrot.lane.b32.xlu0 %v1187_v29, %s4302_s22 }
0x1ab3   :  { %v1190_v30 = vpop.permute.xlu0 %1189 }
0x1ab4   :  { %3827 = vmatmul.mubr.msk.bf16.vlgmr.msra.gmra.mxu1 %vm140_vm2, %v1190_v30 }
0x1ab5   :  { %3839 = vmatpush3.bf16.msra.mxu1 %v4657_v33  ;;  %3842 = vmatprep.mubr.msk.bf16.mxu1 %vm4299_vm0, %v4298_v0 }
0x1ab6   :  { %3840 = vmatprep.subr.bf16.mxu1 %v4298_v0 }
0x1ab9   :  { %3841 = vmatpush3.bf16.msra.mxu1 %v4669_v37 }
0x1aba   :  { %3854 = vmatprep.subr.bf16.mxu1 %v4298_v0 }
0x1b74   :  { %v1228_v32 = vpop.f32.mrf.mxu1 }
0x1b75   :  { %v1229_v34 = vadd.f32 %v4698_v51, %v1228_v32 }
0x1b76   :  { %v3828_v36 = vpop.f32.mrf.mxu1 }
0x1b77   :  { %1242 = vrot.lane.b32.xlu1 %v1229_v34, %s4301_s30  ;;  %v1234_v48 = vadd.f32 %v1229_v34, %v1186_v47 }
0x1b78   :  { %v1231_v38 = vpop.f32.mrf.mxu1 }
0x1b79   :  { %v3516_v49 = vmul.f32 -1.442695, %v1234_v48 }
0x1b7a   :  { %v3829_v42 = vpop.f32.mrf.mxu1 }
0x1b7b   :  { %4132 = vpow2.f32 %v3516_v49  ;;  %v1349_v42 = vld [vmem:[#allocation2 + $0xc] ss:$0 sm:$0xff] }
0x1b7c   :  { %v1350_v46 = vadd.f32 %v1349_v42, %v1348_v45  ;;  %v1513_v45 = vld [vmem:[#allocation2 + $0xa] ss:$0 sm:$0xff] }
0x1b88   :  { %v4133_v50 = vpop.eup %4132 }
0x1b89   :  { %v1238_v52 = vadd.f32 1.0, %v4133_v50 }
0x1b8b   :  { %4134 = vrcp.f32 %v1238_v52 }
0x1b98   :  { %v4135_v53 = vpop.eup %4134 }
0x1b99   :  { %v1252_v59 = vsub.f32 1.0, %v4135_v53  ;;  %v1258_v62 = vmul.f32 %v4135_v53, %v4716_v28 }
0x1be9   :  { %v1243_v54 = vpop.permute.xlu1 %1242 }
0x1bea   :  { %v1245_v55 = vmul.f32 %v4135_v53, %v1243_v54 }
0x1bec   :  { %1247 = vrot.lane.b32.xlu0 %v1245_v55, %s4301_s30 }
0x1c5e   :  { %v1248_v56 = vpop.permute.xlu0 %1247 }
0x1c5f   :  { %v1250_v57 = vadd.f32 %v1248_v56, %v1186_v47 }
0x1c61   :  { %4136 = vtanh.f32 %v1250_v57 }
0x1c6e   :  { %v4137_v58 = vpop.eup %4136 }
0x1c6f   :  { %1254 = vrot.lane.b32.xlu1 %v4137_v58, %s4302_s22 }
0x1ce1   :  { %v1255_v60 = vpop.permute.xlu1 %1254 }
0x1ce2   :  { %v1257_v63 = vmul.f32 %v1255_v60, %v1252_v59 }
0x1ce4   :  { %v4733_v2 = vadd.f32 %v1258_v62, %v1257_v63 }
0x1ce6   :  { %v1269_v3 = vpack.c.bf16 %v4733_v2, %v4733_v2 }
0x1ce8   :  { %1271 = vrot.lane.b32.xlu0 %v1269_v3, %s4302_s22 }
0x1d5a   :  { %v1272_v4 = vpop.permute.xlu0 %1271 }
0x1d5b   :  { %3835 = vmatmul.mubr.msk.bf16.vlgmr.msra.gmra.mxu0 %vm140_vm2, %v1272_v4 }
0x1d5c   :  { %3847 = vmatpush3.bf16.msra.mxu0 %v4657_v33  ;;  %3850 = vmatprep.mubr.msk.bf16.mxu0 %vm4299_vm0, %v4298_v0 }
0x1d5d   :  { %3848 = vmatprep.subr.bf16.mxu0 %v4298_v0 }
0x1d60   :  { %3849 = vmatpush3.bf16.msra.mxu0 %v4669_v37 }
0x1d61   :  { %3862 = vmatprep.subr.bf16.mxu0 %v4298_v0 }
0x1e1b   :  { %v1310_v5 = vpop.f32.mrf.mxu0 }
0x1e1c   :  { %v1311_v7 = vadd.f32 %v4698_v51, %v1310_v5 }
0x1e1d   :  { %v3836_v8 = vpop.f32.mrf.mxu0 }
0x1e1e   :  { %1324 = vrot.lane.b32.xlu1 %v1311_v7, %s4301_s30  ;;  %v1316_v16 = vadd.f32 %v1311_v7, %v1268_v15 }
0x1e1f   :  { %v1313_v9 = vpop.f32.mrf.mxu0 }
0x1e20   :  { %v3518_v17 = vmul.f32 -1.442695, %v1316_v16 }
0x1e21   :  { %v3837_v10 = vpop.f32.mrf.mxu0 }
0x1e22   :  { %4138 = vpow2.f32 %v3518_v17 }
0x1e2f   :  { %v4139_v23 = vpop.eup %4138 }
0x1e30   :  { %v1320_v18 = vadd.f32 1.0, %v4139_v23 }
0x1e32   :  { %4140 = vrcp.f32 %v1320_v18 }
0x1e3f   :  { %v4141_v13 = vpop.eup %4140 }
0x1e40   :  { %v1334_v31 = vsub.f32 1.0, %v4141_v13  ;;  %v1340_v24 = vmul.f32 %v4141_v13, %v4733_v2 }
0x1e90   :  { %v1325_v19 = vpop.permute.xlu1 %1324 }
0x1e91   :  { %v1327_v6 = vmul.f32 %v4141_v13, %v1325_v19 }
0x1e93   :  { %1329 = vrot.lane.b32.xlu0 %v1327_v6, %s4301_s30 }
0x1f05   :  { %v1330_v61 = vpop.permute.xlu0 %1329 }
0x1f06   :  { %v1332_v20 = vadd.f32 %v1330_v61, %v1268_v15  ;;  %v1432_v15 = vadd.f32 %v1431_v14, %v1430_v11  ;;  %v1595_v14 = vld [vmem:[#allocation2 + $0x9] ss:$0 sm:$0xff]  ;;  %v1594_v11 = vld [vmem:[#allocation2 + $0x6] ss:$0 sm:$0xff] }
0x1f08   :  { %4142 = vtanh.f32 %v1332_v20 }
0x1f15   :  { %v4143_v35 = vpop.eup %4142 }
0x1f16   :  { %1336 = vrot.lane.b32.xlu1 %v4143_v35, %s4302_s22 }
0x1f88   :  { %v1337_v22 = vpop.permute.xlu1 %1336 }
0x1f89   :  { %v1339_v25 = vmul.f32 %v1337_v22, %v1334_v31 }
0x1f8b   :  { %v4750_v26 = vadd.f32 %v1340_v24, %v1339_v25 }
0x1f8d   :  { %v1351_v27 = vpack.c.bf16 %v4750_v26, %v4750_v26 }
0x1f8f   :  { %1353 = vrot.lane.b32.xlu0 %v1351_v27, %s4302_s22 }
0x2001   :  { %v1354_v29 = vpop.permute.xlu0 %1353 }
0x2002   :  { %3843 = vmatmul.mubr.msk.bf16.vlgmr.msra.gmra.mxu1 %vm140_vm2, %v1354_v29 }
0x2003   :  { %3855 = vmatpush3.bf16.msra.mxu1 %v4657_v33  ;;  %3858 = vmatprep.mubr.msk.bf16.mxu1 %vm4299_vm0, %v4298_v0 }
0x2004   :  { %3856 = vmatprep.subr.bf16.mxu1 %v4298_v0 }
0x2007   :  { %3857 = vmatpush3.bf16.msra.mxu1 %v4669_v37 }
0x2008   :  { %3870 = vmatprep.subr.bf16.mxu1 %v4298_v0 }
0x20c2   :  { %v1392_v30 = vpop.f32.mrf.mxu1 }
0x20c3   :  { %v1393_v32 = vadd.f32 %v4698_v51, %v1392_v30 }
0x20c4   :  { %v3844_v34 = vpop.f32.mrf.mxu1 }
0x20c5   :  { %1406 = vrot.lane.b32.xlu1 %v1393_v32, %s4301_s30  ;;  %v1398_v47 = vadd.f32 %v1393_v32, %v1350_v46 }
0x20c6   :  { %v1395_v36 = vpop.f32.mrf.mxu1 }
0x20c7   :  { %v3520_v48 = vmul.f32 -1.442695, %v1398_v47 }
0x20c8   :  { %v3845_v38 = vpop.f32.mrf.mxu1 }
0x20c9   :  { %4144 = vpow2.f32 %v3520_v48 }
0x20d6   :  { %v4145_v49 = vpop.eup %4144 }
0x20d7   :  { %v1402_v50 = vadd.f32 1.0, %v4145_v49 }
0x20d9   :  { %4146 = vrcp.f32 %v1402_v50 }
0x20e6   :  { %v4147_v52 = vpop.eup %4146 }
0x20e7   :  { %v1416_v58 = vsub.f32 1.0, %v4147_v52  ;;  %v1422_v60 = vmul.f32 %v4147_v52, %v4750_v26 }
0x2137   :  { %v1407_v53 = vpop.permute.xlu1 %1406 }
0x2138   :  { %v1409_v54 = vmul.f32 %v4147_v52, %v1407_v53 }
0x213a   :  { %1411 = vrot.lane.b32.xlu0 %v1409_v54, %s4301_s30 }
0x21ac   :  { %v1412_v55 = vpop.permute.xlu0 %1411 }
0x21ad   :  { %v1414_v56 = vadd.f32 %v1412_v55, %v1350_v46  ;;  %v1512_v46 = vld [vmem:[#allocation2 + $0x5] ss:$0 sm:$0xff] }
0x21ae   :  { %v1514_v47 = vadd.f32 %v1513_v45, %v1512_v46  ;;  %v1676_v45 = vld [vmem:[#allocation2 + $0x7] ss:$0 sm:$0xff] }
0x21af   :  { %4148 = vtanh.f32 %v1414_v56 }
0x21bc   :  { %v4149_v57 = vpop.eup %4148 }
0x21bd   :  { %1418 = vrot.lane.b32.xlu1 %v4149_v57, %s4302_s22 }
0x222f   :  { %v1419_v59 = vpop.permute.xlu1 %1418 }
0x2230   :  { %v1421_v62 = vmul.f32 %v1419_v59, %v1416_v58 }
0x2232   :  { %v4767_v63 = vadd.f32 %v1422_v60, %v1421_v62 }
0x2234   :  { %v1433_v3 = vpack.c.bf16 %v4767_v63, %v4767_v63 }
0x2236   :  { %1435 = vrot.lane.b32.xlu0 %v1433_v3, %s4302_s22 }
0x22a8   :  { %v1436_v4 = vpop.permute.xlu0 %1435 }
0x22a9   :  { %3851 = vmatmul.mubr.msk.bf16.vlgmr.msra.gmra.mxu0 %vm140_vm2, %v1436_v4 }
0x22aa   :  { %3863 = vmatpush3.bf16.msra.mxu0 %v4657_v33  ;;  %3866 = vmatprep.mubr.msk.bf16.mxu0 %vm4299_vm0, %v4298_v0 }
0x22ab   :  { %3864 = vmatprep.subr.bf16.mxu0 %v4298_v0 }
0x22ae   :  { %3865 = vmatpush3.bf16.msra.mxu0 %v4669_v37 }
0x22af   :  { %3878 = vmatprep.subr.bf16.mxu0 %v4298_v0 }
0x2369   :  { %v1474_v5 = vpop.f32.mrf.mxu0 }
0x236a   :  { %v1475_v7 = vadd.f32 %v4698_v51, %v1474_v5 }
0x236b   :  { %v3852_v8 = vpop.f32.mrf.mxu0 }
0x236c   :  { %1488 = vrot.lane.b32.xlu1 %v1475_v7, %s4301_s30  ;;  %v1480_v16 = vadd.f32 %v1475_v7, %v1432_v15 }
0x236d   :  { %v1477_v9 = vpop.f32.mrf.mxu0 }
0x236e   :  { %v3522_v17 = vmul.f32 -1.442695, %v1480_v16 }
0x236f   :  { %v3853_v10 = vpop.f32.mrf.mxu0 }
0x2370   :  { %4150 = vpow2.f32 %v3522_v17 }
0x237d   :  { %v4151_v23 = vpop.eup %4150 }
0x237e   :  { %v1484_v18 = vadd.f32 1.0, %v4151_v23 }
0x2380   :  { %4152 = vrcp.f32 %v1484_v18 }
0x238d   :  { %v4153_v13 = vpop.eup %4152 }
0x238e   :  { %v1498_v31 = vsub.f32 1.0, %v4153_v13  ;;  %v1504_v24 = vmul.f32 %v4153_v13, %v4767_v63 }
0x23de   :  { %v1489_v19 = vpop.permute.xlu1 %1488 }
0x23df   :  { %v1491_v6 = vmul.f32 %v4153_v13, %v1489_v19 }
0x23e1   :  { %1493 = vrot.lane.b32.xlu0 %v1491_v6, %s4301_s30 }
0x2453   :  { %v1494_v61 = vpop.permute.xlu0 %1493 }
0x2454   :  { %v1496_v20 = vadd.f32 %v1494_v61, %v1432_v15 }
0x2456   :  { %4154 = vtanh.f32 %v1496_v20 }
0x2463   :  { %v4155_v35 = vpop.eup %4154 }
0x2464   :  { %1500 = vrot.lane.b32.xlu1 %v4155_v35, %s4302_s22 }
0x24d6   :  { %v1501_v22 = vpop.permute.xlu1 %1500 }
0x24d7   :  { %v1503_v25 = vmul.f32 %v1501_v22, %v1498_v31 }
0x24d9   :  { %v4784_v27 = vadd.f32 %v1504_v24, %v1503_v25 }
0x24db   :  { %v1515_v29 = vpack.c.bf16 %v4784_v27, %v4784_v27 }
0x24dd   :  { %1517 = vrot.lane.b32.xlu0 %v1515_v29, %s4302_s22 }
0x254f   :  { %v1518_v30 = vpop.permute.xlu0 %1517 }
0x2550   :  { %3859 = vmatmul.mubr.msk.bf16.vlgmr.msra.gmra.mxu1 %vm140_vm2, %v1518_v30 }
0x2551   :  { %3871 = vmatpush3.bf16.msra.mxu1 %v4657_v33  ;;  %3874 = vmatprep.mubr.msk.bf16.mxu1 %vm4299_vm0, %v4298_v0 }
0x2552   :  { %3872 = vmatprep.subr.bf16.mxu1 %v4298_v0 }
0x2555   :  { %3873 = vmatpush3.bf16.msra.mxu1 %v4669_v37 }
0x2610   :  { %v1556_v32 = vpop.f32.mrf.mxu1 }
0x2611   :  { %v1557_v34 = vadd.f32 %v4698_v51, %v1556_v32 }
0x2612   :  { %v3860_v36 = vpop.f32.mrf.mxu1 }
0x2613   :  { %1570 = vrot.lane.b32.xlu1 %v1557_v34, %s4301_s30  ;;  %v1562_v48 = vadd.f32 %v1557_v34, %v1514_v47 }
0x2614   :  { %v1559_v38 = vpop.f32.mrf.mxu1 }
0x2615   :  { %v3524_v33 = vmul.f32 -1.442695, %v1562_v48 }
0x2616   :  { %v3861_v42 = vpop.f32.mrf.mxu1 }
0x2617   :  { %4156 = vpow2.f32 %v3524_v33  ;;  %v1677_v42 = vld [vmem:[#allocation2 + $0x8] ss:$0 sm:$0xff] }
0x2618   :  { %v1678_v46 = vadd.f32 %v1677_v42, %v1676_v45 }
0x2624   :  { %v4157_v49 = vpop.eup %4156 }
0x2625   :  { %v1566_v50 = vadd.f32 1.0, %v4157_v49 }
0x2627   :  { %4158 = vrcp.f32 %v1566_v50 }
0x2634   :  { %v4159_v52 = vpop.eup %4158 }
0x2635   :  { %v1580_v57 = vsub.f32 1.0, %v4159_v52  ;;  %v1586_v59 = vmul.f32 %v4159_v52, %v4784_v27 }
0x2685   :  { %v1571_v53 = vpop.permute.xlu1 %1570 }
0x2686   :  { %v1573_v37 = vmul.f32 %v4159_v52, %v1571_v53 }
0x2688   :  { %1575 = vrot.lane.b32.xlu0 %v1573_v37, %s4301_s30 }
0x26fa   :  { %v1576_v54 = vpop.permute.xlu0 %1575 }
0x26fb   :  { %v1578_v55 = vadd.f32 %v1576_v54, %v1514_v47 }
0x26fd   :  { %4160 = vtanh.f32 %v1578_v55 }
0x270a   :  { %v4161_v56 = vpop.eup %4160 }
0x270b   :  { %1582 = vrot.lane.b32.xlu1 %v4161_v56, %s4302_s22 }
0x277d   :  { %v1583_v58 = vpop.permute.xlu1 %1582 }
0x277e   :  { %v1585_v60 = vmul.f32 %v1583_v58, %v1580_v57 }
0x2780   :  { %v4800_v62 = vadd.f32 %v1586_v59, %v1585_v60 }
0x2782   :  { %v1597_v3 = vpack.c.bf16 %v4800_v62, %v4800_v62 }
0x2784   :  { %1599 = vrot.lane.b32.xlu0 %v1597_v3, %s4302_s22 }
0x27f6   :  { %v1600_v4 = vpop.permute.xlu0 %1599 }
0x27f7   :  { %3867 = vmatmul.mubr.msk.bf16.vlgmr.msra.gmra.mxu0 %vm140_vm2, %v1600_v4 }
0x27f8   :  { %3879 = vmatpush3.bf16.msra.mxu0 %v4627_v1  ;;  %3882 = vmatprep.mubr.msk.bf16.mxu0 %vm4299_vm0, %v4298_v0  ;;  %v1596_v1 = vadd.f32 %v1595_v14, %v1594_v11  ;;  %v4029_v14 = vld [vmem:[%s5257_s8 + $0x40] ss:$8 sps:$4 sm:$0xff]   ;;  %v4031_v11 = vld [vmem:[%s5257_s8 + $0x44] ss:$8 sps:$4 sm:$0xff]  }
0x27f9   :  { %3880 = vmatprep.subr.bf16.mxu0 %v4298_v0 }
0x27fc   :  { %3881 = vmatpush3.bf16.msra.mxu0 %v4633_v21 }
0x27fd   :  { %3886 = vmatprep.subr.bf16.mxu0 %v4298_v0 }
0x28b7   :  { %v1638_v5 = vpop.f32.mrf.mxu0 }
0x28b8   :  { %v1639_v7 = vadd.f32 %v4698_v51, %v1638_v5 }
0x28b9   :  { %v3868_v8 = vpop.f32.mrf.mxu0 }
0x28ba   :  { %1652 = vrot.lane.b32.xlu1 %v1639_v7, %s4301_s30  ;;  %v1644_v15 = vadd.f32 %v1639_v7, %v1596_v1  ;;  %v4860_v7 = vld [vmem:[%s5259_s10 + $0x28] sm:$0xff]   ;;  %v4026_v8 = vld [vmem:[%s5257_s8 + $0x50] ss:$8 sps:$4 sm:$0xff]  }
0x28bb   :  { %v1641_v9 = vpop.f32.mrf.mxu0 }
0x28bc   :  { %v3526_v16 = vmul.f32 -1.442695, %v1644_v15  ;;  %v4028_v9 = vld [vmem:[%s5257_s8 + $0x54] ss:$8 sps:$4 sm:$0xff]  }
0x28bd   :  { %v3869_v10 = vpop.f32.mrf.mxu0  ;;  %1869 = vmatprep.subr.bf16.mxu1 %v4028_v9 }
0x28be   :  { %4162 = vpow2.f32 %v3526_v16  ;;  %v4872_v10 = vld [vmem:[%s5259_s10 + $0x20] sm:$0xff]  }
0x28cb   :  { %v4163_v17 = vpop.eup %4162 }
0x28cc   :  { %v1648_v23 = vadd.f32 1.0, %v4163_v17 }
0x28ce   :  { %4164 = vrcp.f32 %v1648_v23 }
0x28db   :  { %v4165_v21 = vpop.eup %4164 }
0x28dc   :  { %v1662_v20 = vsub.f32 1.0, %v4165_v21  ;;  %v1668_v31 = vmul.f32 %v4165_v21, %v4800_v62 }
0x292c   :  { %v1653_v18 = vpop.permute.xlu1 %1652 }
0x292d   :  { %v1655_v13 = vmul.f32 %v4165_v21, %v1653_v18  ;;  %v4896_v18 = vld [vmem:[%s5260_s11 + $0x2] sm:$0x1] }
0x292f   :  { %1657 = vrot.lane.b32.xlu0 %v1655_v13, %s4301_s30 }
0x29a1   :  { %v1658_v19 = vpop.permute.xlu0 %1657 }
0x29a2   :  { %v1660_v6 = vadd.f32 %v1658_v19, %v1596_v1 }
0x29a4   :  { %4166 = vtanh.f32 %v1660_v6 }
0x29b1   :  { %v4167_v61 = vpop.eup %4166 }
0x29b2   :  { %1664 = vrot.lane.b32.xlu1 %v4167_v61, %s4302_s22 }
0x2a24   :  { %v1665_v35 = vpop.permute.xlu1 %1664 }
0x2a25   :  { %v1667_v22 = vmul.f32 %v1665_v35, %v1662_v20 }
0x2a27   :  { %v1669_v24 = vadd.f32 %v1668_v31, %v1667_v22 }
0x2a29   :  { %v1679_v25 = vpack.c.bf16 %v1669_v24, %v1669_v24 }
0x2a2b   :  { %1681 = vrot.lane.b32.xlu0 %v1679_v25, %s4302_s22 }
0x2a9d   :  { %v1682_v29 = vpop.permute.xlu0 %1681 }
0x2a9e   :  { %3875 = vmatmul.mubr.msk.bf16.vlgmr.msra.gmra.mxu1 %vm140_vm2, %v1682_v29 }
0x2a9f   :  { %1889 = vmatprep.mubr.bf16.mxu1 %v4300_v12  ;;  %1870 = vmatpush1.bf16.msra.mxu1 %v4026_v8 }
0x2aa0   :  { %1871 = vmatprep.subr.bf16.mxu1 %v4031_v11 }
0x2aa3   :  { %1872 = vmatpush1.bf16.msra.mxu1 %v4029_v14 }
0x2aa4   :  { %3894 = vmatprep.subr.bf16.mxu1 %v4298_v0 }
0x2b5e   :  { %v1720_v30 = vpop.f32.mrf.mxu1 }
0x2b5f   :  { %v1721_v32 = vadd.f32 %v4698_v51, %v1720_v30  ;;  %v3535_v30 = vld [vmem:[%s5258_s9 + $0x4] sm:$0x3] }
0x2b60   :  { %v3876_v34 = vpop.f32.mrf.mxu1 }
0x2b61   :  { %1734 = vrot.lane.b32.xlu1 %v1721_v32, %s4301_s30  ;;  %v1726_v47 = vadd.f32 %v1721_v32, %v1678_v46  ;;  %v1827_v32 = vrot.slane %v3535_v30, %v4491_v41  ;;  %v1831_v34 = vrot.slane %v3535_v30, %v4497_v43 }
0x2b62   :  { %v1723_v36 = vpop.f32.mrf.mxu1 }
0x2b63   :  { %v3528_v48 = vmul.f32 -1.442695, %v1726_v47 }
0x2b64   :  { %v3877_v38 = vpop.f32.mrf.mxu1 }
0x2b65   :  { %4168 = vpow2.f32 %v3528_v48 }
0x2b72   :  { %v4169_v33 = vpop.eup %4168 }
0x2b73   :  { %v1730_v49 = vadd.f32 1.0, %v4169_v33 }
0x2b75   :  { %4170 = vrcp.f32 %v1730_v49 }
0x2b82   :  { %v4171_v50 = vpop.eup %4170 }
0x2b83   :  { %v1750_v57 = vmul.f32 %v4171_v50, %v1669_v24 }
0x2bd3   :  { %v1735_v52 = vpop.permute.xlu1 %1734 }
0x2bd4   :  { %v1737_v53 = vmul.f32 %v4171_v50, %v1735_v52 }
0x2bd6   :  { %1739 = vrot.lane.b32.xlu0 %v1737_v53, %s4301_s30 }
0x2bda   :  { %1179 = vrot.lane.b32.xlu0 %v4716_v28, %s4302_s22 }
0x2bde   :  { %1343 = vrot.lane.b32.xlu0 %v4750_v26, %s4302_s22 }
0x2be2   :  { %1507 = vrot.lane.b32.xlu0 %v4784_v27, %s4302_s22  ;;  %v1744_v27 = vsub.f32 1.0, %v4171_v50 }
0x2be6   :  { %1671 = vrot.lane.b32.xlu0 %v1669_v24, %s4302_s22 }
0x2c48   :  { %v1740_v51 = vpop.permute.xlu0 %1739 }
0x2c49   :  { %v1742_v37 = vadd.f32 %v1740_v51, %v1678_v46 }
0x2c4b   :  { %4172 = vtanh.f32 %v1742_v37 }
0x2c4c   :  { %v1180_v54 = vpop.permute.xlu0 %1179 }
0x2c4d   :  { %1182 = vst.msk [vmem:[#allocation3] sm:$0x1] %vm352_vm3, %v1180_v54 }
0x2c4e   :  { %1183 = vst.msk [vmem:[#allocation3 + $0x7] sm:$0x1] %vm354_vm4, %v1180_v54 }
0x2c50   :  { %v1344_v55 = vpop.permute.xlu0 %1343 }
0x2c51   :  { %1346 = vst.msk [vmem:[#allocation3 + $0x2] sm:$0x1] %vm352_vm3, %v1344_v55 }
0x2c52   :  { %1347 = vst.msk [vmem:[#allocation3 + $0x5] sm:$0x1] %vm354_vm4, %v1344_v55 }
0x2c54   :  { %v1508_v26 = vpop.permute.xlu0 %1507 }
0x2c58   :  { %v4173_v28 = vpop.eup %4172  ;;  %v1672_v3 = vpop.permute.xlu0 %1671 }
0x2c59   :  { %1746 = vrot.lane.b32.xlu1 %v4173_v28, %s4302_s22 }
0x2c5d   :  { %1261 = vrot.lane.b32.xlu1 %v4733_v2, %s4302_s22 }
0x2c61   :  { %1425 = vrot.lane.b32.xlu1 %v4767_v63, %s4302_s22 }
0x2c65   :  { %1589 = vrot.lane.b32.xlu1 %v4800_v62, %s4302_s22 }
0x2ccb   :  { %v1747_v56 = vpop.permute.xlu1 %1746 }
0x2ccc   :  { %v1749_v58 = vmul.f32 %v1747_v56, %v1744_v27 }
0x2cce   :  { %v1751_v59 = vadd.f32 %v1750_v57, %v1749_v58 }
0x2ccf   :  { %v1262_v60 = vpop.permute.xlu1 %1261 }
0x2cd0   :  { %1264 = vst.msk [vmem:[#allocation3 + $0x1] sm:$0x1] %vm352_vm3, %v1262_v60  ;;  %1753 = vrot.lane.b32.xlu1 %v1751_v59, %s4302_s22 }
0x2cd1   :  { %1265 = vst.msk [vmem:[#allocation3 + $0x6] sm:$0x1] %vm354_vm4, %v1262_v60  ;;  %1675 = vst.msk [vmem:[#allocation3 + $0x1] sm:$0x1] %vm354_vm4, %v1672_v3 }
0x2cd2   :  { %1674 = vst.msk [vmem:[#allocation3 + $0x6] sm:$0x1] %vm352_vm3, %v1672_v3 }
0x2cd3   :  { %v1426_v2 = vpop.permute.xlu1 %1425 }
0x2cd4   :  { %1428 = vst.msk [vmem:[#allocation3 + $0x3] sm:$0x1] %vm352_vm3, %v1426_v2 }
0x2cd5   :  { %1429 = vst.msk [vmem:[#allocation3 + $0x4] sm:$0x1] %vm354_vm4, %v1426_v2  ;;  %1511 = vst.msk [vmem:[#allocation3 + $0x3] sm:$0x1] %vm354_vm4, %v1508_v26 }
0x2cd6   :  { %1510 = vst.msk [vmem:[#allocation3 + $0x4] sm:$0x1] %vm352_vm3, %v1508_v26 }
0x2cd7   :  { %v1590_v63 = vpop.permute.xlu1 %1589 }
0x2cd8   :  { %1592 = vst.msk [vmem:[#allocation3 + $0x5] sm:$0x1] %vm352_vm3, %v1590_v63 }
0x2cd9   :  { %1593 = vst.msk [vmem:[#allocation3 + $0x2] sm:$0x1] %vm354_vm4, %v1590_v63 }
0x2d42   :  { %v1754_v62 = vpop.permute.xlu1 %1753 }
0x2d43   :  { %1756 = vst.msk [vmem:[#allocation3 + $0x7] sm:$0x1] %vm352_vm3, %v1754_v62 }
0x2d44   :  { %1757 = vst.msk [vmem:[#allocation3] sm:$0x1] %vm354_vm4, %v1754_v62 }
0x2d4b   :  { %v1758_v4 = vld [vmem:[#allocation3] sm:$0xff] }
0x2d4c   :  { %v1759_v5 = vpack.c.bf16 %v1758_v4, %v1758_v4 }
0x2d4e   :  { %3883 = vmatmul.mubr.msk.bf16.vlgmr.msra.gmra.mxu0 %vm140_vm2, %v1759_v5 }
0x2d4f   :  { %3890 = vmatprep.mubr.msk.bf16.mxu0 %vm4299_vm0, %v4298_v0  ;;  %3887 = vmatpush3.bf16.msra.mxu0 %v4860_v7 }
0x2d50   :  { %3888 = vmatprep.subr.bf16.mxu0 %v4298_v0 }
0x2d53   :  { %3889 = vmatpush3.bf16.msra.mxu0 %v4872_v10 }
0x2d54   :  { %3902 = vmatprep.subr.bf16.mxu0 %v4298_v0 }
0x2d56   :  { %3891 = vmatmul.mubr.bf16.vlgmr.msra.gmra.mxu0 %v4300_v12 }
0x2d57   :  { %3903 = vmatpush3.bf16.msra.mxu0 %v4860_v7  ;;  %3906 = vmatprep.mubr.msk.bf16.mxu0 %vm4299_vm0, %v4298_v0 }
0x2d58   :  { %3904 = vmatprep.subr.bf16.mxu0 %v4298_v0 }
0x2d5b   :  { %3905 = vmatpush3.bf16.msra.mxu0 %v4872_v10 }
0x2d5c   :  { %3918 = vmatprep.subr.bf16.mxu0 %v4298_v0 }
0x2e0e   :  { %v1797_v1 = vpop.f32.mrf.mxu0 }
0x2e0f   :  { %v1798_v15 = vadd.f32 %v4691_v44, %v1797_v1 }
0x2e10   :  { %v3884_v16 = vpop.f32.mrf.mxu0 }
0x2e11   :  { %1811 = vrot.lane.b32.xlu0 %v1798_v15, %s4302_s22  ;;  %v3530_v21 = vmul.f32 -1.442695, %v1798_v15 }
0x2e12   :  { %v1800_v17 = vpop.f32.mrf.mxu0 }
0x2e13   :  { %4174 = vpow2.f32 %v3530_v21 }
0x2e14   :  { %v3885_v23 = vpop.f32.mrf.mxu0 }
0x2e16   :  { %v1956_v19 = vpop.f32.mrf.mxu0 }
0x2e17   :  { %v1957_v6 = vadd.f32 %v4896_v18, %v1956_v19 }
0x2e18   :  { %v3892_v20 = vpop.f32.mrf.mxu0 }
0x2e19   :  { %1970 = vrot.lane.b32.xlu1 %v1957_v6, %s4301_s30 }
0x2e1a   :  { %v1959_v44 = vpop.f32.mrf.mxu0 }
0x2e1c   :  { %v3893_v35 = vpop.f32.mrf.mxu0 }
0x2e20   :  { %v4175_v13 = vpop.eup %4174 }
0x2e21   :  { %v1806_v61 = vadd.f32 1.0, %v4175_v13 }
0x2e23   :  { %4176 = vrcp.f32 %v1806_v61 }
0x2e30   :  { %v4177_v31 = vpop.eup %4176 }
0x2e31   :  { %v1809_v22 = vmul.f32 %v4177_v31, %v1798_v15 }
0x2e83   :  { %v1812_v24 = vpop.permute.xlu0 %1811 }
0x2e84   :  { %v1814_v25 = vmul.f32 %v1812_v24, %v1809_v22 }
0x2e86   :  { %v1815_v29 = vpack.c.bf16 %v1814_v25, %v1814_v25 }
0x2e88   :  { %3540 = vmatmul.mubr.msk.bf16.vlgmr.msra.gmra.mxu1 %vm140_vm2, %v1815_v29 }
0x2e89   :  { %3895 = vmatpush3.bf16.msra.mxu1 %v4860_v7  ;;  %3898 = vmatprep.mubr.msk.bf16.mxu1 %vm4299_vm0, %v4298_v0 }
0x2e8a   :  { %3896 = vmatprep.subr.bf16.mxu1 %v4298_v0 }
0x2e8b   :  { %v1971_v41 = vpop.permute.xlu1 %1970 }
0x2e8d   :  { %3897 = vmatpush3.bf16.msra.mxu1 %v4872_v10 }
0x2e8e   :  { %3910 = vmatprep.subr.bf16.mxu1 %v4298_v0 }
0x2f48   :  { %v1891_v36 = vpop.f32.mrf.mxu1 }
0x2f49   :  { %v1892_v38 = vadd.f32 %v1891_v36, %v1827_v32 }
0x2f4a   :  { %v1893_v42 = vpop.f32.mrf.mxu1 }
0x2f4b   :  { %1898 = vst [vmem:[#allocation2] sm:$0xff] %v1892_v38  ;;  %v1894_v45 = vadd.f32 %v1893_v42, %v1831_v34 }
0x2f4c   :  { %v1895_v46 = vpop.f32.mrf.mxu1 }
0x2f4d   :  { %1899 = vst [vmem:[#allocation2 + $0x8] sm:$0xff] %v1894_v45 }
0x2f4e   :  { %v1896_v47 = vpop.f32.mrf.mxu1 }
0x2f52   :  { %v1907_v48 = vld [vmem:[#allocation2] ss:$0 sm:$0xff]  ;;  %v1994_v8 = vld [vmem:[#allocation2 + $0x1] ss:$0 sm:$0xff]  ;;  %v2076_v36 = vld [vmem:[#allocation2 + $0x2] ss:$0 sm:$0xff] }
0x2f54   :  { %v1908_v33 = vld [vmem:[#allocation2 + $0xf] ss:$0 sm:$0xff]  ;;  %v1995_v5 = vld [vmem:[#allocation2 + $0xe] ss:$0 sm:$0xff]  ;;  %v2077_v34 = vld [vmem:[#allocation2 + $0xd] ss:$0 sm:$0xff] }
0x2f55   :  { %v1909_v49 = vadd.f32 %v1908_v33, %v1907_v48  ;;  %v1996_v9 = vadd.f32 %v1995_v5, %v1994_v8  ;;  %v2078_v38 = vadd.f32 %v2077_v34, %v2076_v36 }
0x2f57   :  { %v1962_v50 = vadd.f32 %v1957_v6, %v1909_v49 }
0x2f59   :  { %v3548_v52 = vmul.f32 -1.442695, %v1962_v50 }
0x2f5b   :  { %4178 = vpow2.f32 %v3548_v52 }
0x2f68   :  { %v4179_v53 = vpop.eup %4178 }
0x2f69   :  { %v1966_v51 = vadd.f32 1.0, %v4179_v53 }
0x2f6b   :  { %4180 = vrcp.f32 %v1966_v51 }
0x2f78   :  { %v4181_v37 = vpop.eup %4180 }
0x2f79   :  { %v1973_v43 = vmul.f32 %v4181_v37, %v1971_v41  ;;  %v1980_v26 = vsub.f32 1.0, %v4181_v37  ;;  %v1986_v56 = vmul.f32 0.0, %v4181_v37 }
0x2f7b   :  { %1975 = vrot.lane.b32.xlu0 %v1973_v43, %s4301_s30 }
0x2fed   :  { %v1976_v54 = vpop.permute.xlu0 %1975 }
0x2fee   :  { %v1978_v55 = vadd.f32 %v1976_v54, %v1909_v49 }
0x2ff0   :  { %4182 = vtanh.f32 %v1978_v55 }
0x2ffd   :  { %v4183_v28 = vpop.eup %4182 }
0x2ffe   :  { %1982 = vrot.lane.b32.xlu1 %v4183_v28, %s4302_s22 }
0x3070   :  { %v1983_v27 = vpop.permute.xlu1 %1982 }
0x3071   :  { %v1985_v57 = vmul.f32 %v1983_v27, %v1980_v26 }
0x3073   :  { %v4914_v58 = vadd.f32 %v1986_v56, %v1985_v57 }
0x3075   :  { %v1997_v59 = vpack.c.bf16 %v4914_v58, %v4914_v58 }
0x3077   :  { %1999 = vrot.lane.b32.xlu0 %v1997_v59, %s4302_s22 }
0x30e9   :  { %v2000_v60 = vpop.permute.xlu0 %1999 }
0x30ea   :  { %3899 = vmatmul.mubr.msk.bf16.vlgmr.msra.gmra.mxu1 %vm140_vm2, %v2000_v60  ;;  %v2159_v60 = vld [vmem:[#allocation2 + $0xc] ss:$0 sm:$0xff] }
0x30eb   :  { %3911 = vmatpush3.bf16.msra.mxu1 %v4860_v7  ;;  %3914 = vmatprep.mubr.msk.bf16.mxu1 %vm4299_vm0, %v4298_v0 }
0x30ec   :  { %3912 = vmatprep.subr.bf16.mxu1 %v4298_v0 }
0x30ef   :  { %3913 = vmatpush3.bf16.msra.mxu1 %v4872_v10 }
0x30f0   :  { %3926 = vmatprep.subr.bf16.mxu1 %v4298_v0 }
0x31aa   :  { %v2038_v3 = vpop.f32.mrf.mxu1 }
0x31ab   :  { %v2039_v2 = vadd.f32 %v4896_v18, %v2038_v3  ;;  %v2158_v3 = vld [vmem:[#allocation2 + $0x3] ss:$0 sm:$0xff] }
0x31ac   :  { %v3900_v63 = vpop.f32.mrf.mxu1 }
0x31ad   :  { %2052 = vrot.lane.b32.xlu1 %v2039_v2, %s4301_s30  ;;  %v2044_v14 = vadd.f32 %v2039_v2, %v1996_v9  ;;  %v2160_v2 = vadd.f32 %v2159_v60, %v2158_v3 }
0x31ae   :  { %v2041_v62 = vpop.f32.mrf.mxu1 }
0x31af   :  { %v3550_v11 = vmul.f32 -1.442695, %v2044_v14 }
0x31b0   :  { %v3901_v4 = vpop.f32.mrf.mxu1 }
0x31b1   :  { %4184 = vpow2.f32 %v3550_v11 }
0x31be   :  { %v4185_v1 = vpop.eup %4184 }
0x31bf   :  { %v2048_v15 = vadd.f32 1.0, %v4185_v1 }
0x31c1   :  { %4186 = vrcp.f32 %v2048_v15 }
0x31ce   :  { %v4187_v16 = vpop.eup %4186 }
0x31cf   :  { %v2062_v6 = vsub.f32 1.0, %v4187_v16  ;;  %v2068_v20 = vmul.f32 %v4187_v16, %v4914_v58 }
0x321f   :  { %v2053_v17 = vpop.permute.xlu1 %2052 }
0x3220   :  { %v2055_v23 = vmul.f32 %v4187_v16, %v2053_v17 }
0x3222   :  { %2057 = vrot.lane.b32.xlu0 %v2055_v23, %s4301_s30 }
0x3294   :  { %v2058_v21 = vpop.permute.xlu0 %2057 }
0x3295   :  { %v2060_v13 = vadd.f32 %v2058_v21, %v1996_v9 }
0x3297   :  { %4188 = vtanh.f32 %v2060_v13 }
0x32a4   :  { %v4189_v19 = vpop.eup %4188 }
0x32a5   :  { %2064 = vrot.lane.b32.xlu1 %v4189_v19, %s4302_s22 }
0x3317   :  { %v2065_v61 = vpop.permute.xlu1 %2064 }
0x3318   :  { %v2067_v44 = vmul.f32 %v2065_v61, %v2062_v6 }
0x331a   :  { %v4931_v35 = vadd.f32 %v2068_v20, %v2067_v44 }
0x331c   :  { %v2079_v31 = vpack.c.bf16 %v4931_v35, %v4931_v35 }
0x331e   :  { %2081 = vrot.lane.b32.xlu0 %v2079_v31, %s4302_s22 }
0x3390   :  { %v2082_v22 = vpop.permute.xlu0 %2081 }
0x3391   :  { %3907 = vmatmul.mubr.msk.bf16.vlgmr.msra.gmra.mxu0 %vm140_vm2, %v2082_v22 }
0x3392   :  { %3919 = vmatpush3.bf16.msra.mxu0 %v4860_v7  ;;  %3922 = vmatprep.mubr.msk.bf16.mxu0 %vm4299_vm0, %v4298_v0 }
0x3393   :  { %3920 = vmatprep.subr.bf16.mxu0 %v4298_v0 }
0x3396   :  { %3921 = vmatpush3.bf16.msra.mxu0 %v4872_v10 }
0x3397   :  { %3934 = vmatprep.subr.bf16.mxu0 %v4298_v0 }
0x3451   :  { %v2120_v24 = vpop.f32.mrf.mxu0 }
0x3452   :  { %v2121_v25 = vadd.f32 %v4896_v18, %v2120_v24  ;;  %v2241_v24 = vld [vmem:[#allocation2 + $0xb] ss:$0 sm:$0xff] }
0x3453   :  { %v3908_v29 = vpop.f32.mrf.mxu0 }
0x3454   :  { %2134 = vrot.lane.b32.xlu1 %v2121_v25, %s4301_s30  ;;  %v2126_v42 = vadd.f32 %v2121_v25, %v2078_v38  ;;  %v2240_v25 = vld [vmem:[#allocation2 + $0x4] ss:$0 sm:$0xff] }
0x3455   :  { %v2123_v30 = vpop.f32.mrf.mxu0  ;;  %v2242_v29 = vadd.f32 %v2241_v24, %v2240_v25 }
0x3456   :  { %v3552_v45 = vmul.f32 -1.442695, %v2126_v42 }
0x3457   :  { %v3909_v32 = vpop.f32.mrf.mxu0 }
0x3458   :  { %4190 = vpow2.f32 %v3552_v45 }
0x3465   :  { %v4191_v46 = vpop.eup %4190 }
0x3466   :  { %v2130_v47 = vadd.f32 1.0, %v4191_v46 }
0x3468   :  { %4192 = vrcp.f32 %v2130_v47 }
0x3475   :  { %v4193_v48 = vpop.eup %4192 }
0x3476   :  { %v2144_v51 = vsub.f32 1.0, %v4193_v48  ;;  %v2150_v37 = vmul.f32 %v4193_v48, %v4931_v35 }
0x34c6   :  { %v2135_v33 = vpop.permute.xlu1 %2134 }
0x34c7   :  { %v2137_v49 = vmul.f32 %v4193_v48, %v2135_v33 }
0x34c9   :  { %2139 = vrot.lane.b32.xlu0 %v2137_v49, %s4301_s30 }
0x353b   :  { %v2140_v50 = vpop.permute.xlu0 %2139 }
0x353c   :  { %v2142_v52 = vadd.f32 %v2140_v50, %v2078_v38 }
0x353e   :  { %4194 = vtanh.f32 %v2142_v52 }
0x354b   :  { %v4195_v53 = vpop.eup %4194 }
0x354c   :  { %2146 = vrot.lane.b32.xlu1 %v4195_v53, %s4302_s22 }
0x35be   :  { %v2147_v41 = vpop.permute.xlu1 %2146 }
0x35bf   :  { %v2149_v43 = vmul.f32 %v2147_v41, %v2144_v51 }
0x35c1   :  { %v4948_v54 = vadd.f32 %v2150_v37, %v2149_v43 }
0x35c3   :  { %v2161_v55 = vpack.c.bf16 %v4948_v54, %v4948_v54 }
0x35c5   :  { %2163 = vrot.lane.b32.xlu0 %v2161_v55, %s4302_s22 }
0x3637   :  { %v2164_v28 = vpop.permute.xlu0 %2163 }
0x3638   :  { %3915 = vmatmul.mubr.msk.bf16.vlgmr.msra.gmra.mxu1 %vm140_vm2, %v2164_v28 }
0x3639   :  { %3927 = vmatpush3.bf16.msra.mxu1 %v4860_v7  ;;  %3930 = vmatprep.mubr.msk.bf16.mxu1 %vm4299_vm0, %v4298_v0 }
0x363a   :  { %3928 = vmatprep.subr.bf16.mxu1 %v4298_v0 }
0x363d   :  { %3929 = vmatpush3.bf16.msra.mxu1 %v4872_v10 }
0x363e   :  { %3942 = vmatprep.subr.bf16.mxu1 %v4298_v0 }
0x36f8   :  { %v2202_v26 = vpop.f32.mrf.mxu1 }
0x36f9   :  { %v2203_v27 = vadd.f32 %v4896_v18, %v2202_v26 }
0x36fa   :  { %v3916_v56 = vpop.f32.mrf.mxu1 }
0x36fb   :  { %2216 = vrot.lane.b32.xlu1 %v2203_v27, %s4301_s30  ;;  %v2208_v63 = vadd.f32 %v2203_v27, %v2160_v2  ;;  %v2323_v27 = vld [vmem:[#allocation2 + $0xa] ss:$0 sm:$0xff]  ;;  %v2322_v56 = vld [vmem:[#allocation2 + $0x5] ss:$0 sm:$0xff] }
0x36fc   :  { %v2205_v57 = vpop.f32.mrf.mxu1 }
0x36fd   :  { %v3554_v62 = vmul.f32 -1.442695, %v2208_v63 }
0x36fe   :  { %v3917_v59 = vpop.f32.mrf.mxu1 }
0x36ff   :  { %4196 = vpow2.f32 %v3554_v62 }
0x370c   :  { %v4197_v4 = vpop.eup %4196 }
0x370d   :  { %v2212_v5 = vadd.f32 1.0, %v4197_v4 }
0x370f   :  { %4198 = vrcp.f32 %v2212_v5 }
0x371c   :  { %v4199_v8 = vpop.eup %4198 }
0x371d   :  { %v2226_v16 = vsub.f32 1.0, %v4199_v8  ;;  %v2232_v23 = vmul.f32 %v4199_v8, %v4948_v54 }
0x376d   :  { %v2217_v9 = vpop.permute.xlu1 %2216 }
0x376e   :  { %v2219_v14 = vmul.f32 %v4199_v8, %v2217_v9 }
0x3770   :  { %2221 = vrot.lane.b32.xlu0 %v2219_v14, %s4301_s30 }
0x37e2   :  { %v2222_v11 = vpop.permute.xlu0 %2221 }
0x37e3   :  { %v2224_v1 = vadd.f32 %v2222_v11, %v2160_v2 }
0x37e5   :  { %4200 = vtanh.f32 %v2224_v1 }
0x37f2   :  { %v4201_v15 = vpop.eup %4200 }
0x37f3   :  { %2228 = vrot.lane.b32.xlu1 %v4201_v15, %s4302_s22 }
0x3865   :  { %v2229_v17 = vpop.permute.xlu1 %2228 }
0x3866   :  { %v2231_v21 = vmul.f32 %v2229_v17, %v2226_v16  ;;  %v4250_v17 = vld [vmem:[%s5261_s12 + $0x8] sm:$0xff]  }
0x3868   :  { %v4965_v13 = vadd.f32 %v2232_v23, %v2231_v21  ;;  %v4251_v23 = vld [vmem:[%s5261_s12] sm:$0xff]  }
0x386a   :  { %v2243_v19 = vpack.c.bf16 %v4965_v13, %v4965_v13 }
0x386c   :  { %2245 = vrot.lane.b32.xlu0 %v2243_v19, %s4302_s22 }
0x38de   :  { %v2246_v6 = vpop.permute.xlu0 %2245 }
0x38df   :  { %3923 = vmatmul.mubr.msk.bf16.vlgmr.msra.gmra.mxu0 %vm140_vm2, %v2246_v6 }
0x38e0   :  { %3935 = vmatpush3.bf16.msra.mxu0 %v4860_v7  ;;  %3938 = vmatprep.mubr.msk.bf16.mxu0 %vm4299_vm0, %v4298_v0 }
0x38e1   :  { %3936 = vmatprep.subr.bf16.mxu0 %v4298_v0 }
0x38e4   :  { %3937 = vmatpush3.bf16.msra.mxu0 %v4872_v10 }
0x38e5   :  { %3950 = vmatprep.subr.bf16.mxu0 %v4298_v0 }
0x399f   :  { %v2284_v61 = vpop.f32.mrf.mxu0 }
0x39a0   :  { %v2285_v20 = vadd.f32 %v4896_v18, %v2284_v61 }
0x39a1   :  { %v3924_v44 = vpop.f32.mrf.mxu0 }
0x39a2   :  { %2298 = vrot.lane.b32.xlu1 %v2285_v20, %s4301_s30  ;;  %v2290_v30 = vadd.f32 %v2285_v20, %v2242_v29  ;;  %v2405_v44 = vld [vmem:[#allocation2 + $0x9] ss:$0 sm:$0xff] }
0x39a3   :  { %v2287_v31 = vpop.f32.mrf.mxu0 }
0x39a4   :  { %v3556_v32 = vmul.f32 -1.442695, %v2290_v30  ;;  %v2404_v31 = vld [vmem:[#allocation2 + $0x6] ss:$0 sm:$0xff] }
0x39a5   :  { %v3925_v22 = vpop.f32.mrf.mxu0 }
0x39a6   :  { %4202 = vpow2.f32 %v3556_v32  ;;  %v2406_v22 = vadd.f32 %v2405_v44, %v2404_v31 }
0x39b3   :  { %v4203_v34 = vpop.eup %4202 }
0x39b4   :  { %v2294_v36 = vadd.f32 1.0, %v4203_v34 }
0x39b6   :  { %4204 = vrcp.f32 %v2294_v36 }
0x39c3   :  { %v4205_v38 = vpop.eup %4204 }
0x39c4   :  { %v2308_v33 = vsub.f32 1.0, %v4205_v38  ;;  %v2314_v50 = vmul.f32 %v4205_v38, %v4965_v13 }
0x3a14   :  { %v2299_v42 = vpop.permute.xlu1 %2298 }
0x3a15   :  { %v2301_v45 = vmul.f32 %v4205_v38, %v2299_v42 }
0x3a17   :  { %2303 = vrot.lane.b32.xlu0 %v2301_v45, %s4301_s30 }
0x3a89   :  { %v2304_v46 = vpop.permute.xlu0 %2303 }
0x3a8a   :  { %v2306_v47 = vadd.f32 %v2304_v46, %v2242_v29 }
0x3a8c   :  { %4206 = vtanh.f32 %v2306_v47 }
0x3a99   :  { %v4207_v48 = vpop.eup %4206 }
0x3a9a   :  { %2310 = vrot.lane.b32.xlu1 %v4207_v48, %s4302_s22 }
0x3b0c   :  { %v2311_v49 = vpop.permute.xlu1 %2310 }
0x3b0d   :  { %v2313_v52 = vmul.f32 %v2311_v49, %v2308_v33 }
0x3b0f   :  { %v4982_v53 = vadd.f32 %v2314_v50, %v2313_v52 }
0x3b11   :  { %v2325_v51 = vpack.c.bf16 %v4982_v53, %v4982_v53 }
0x3b13   :  { %2327 = vrot.lane.b32.xlu0 %v2325_v51, %s4302_s22 }
0x3b85   :  { %v2328_v41 = vpop.permute.xlu0 %2327 }
0x3b86   :  { %3931 = vmatmul.mubr.msk.bf16.vlgmr.msra.gmra.mxu1 %vm140_vm2, %v2328_v41 }
0x3b87   :  { %3943 = vmatpush3.bf16.msra.mxu1 %v4860_v7  ;;  %3946 = vmatprep.mubr.msk.bf16.mxu1 %vm4299_vm0, %v4298_v0  ;;  %v2324_v7 = vadd.f32 %v2323_v27, %v2322_v56 }
0x3b88   :  { %3944 = vmatprep.subr.bf16.mxu1 %v4298_v0 }
0x3b8b   :  { %3945 = vmatpush3.bf16.msra.mxu1 %v4872_v10 }
0x3b8c   :  { %3958 = vmatprep.subr.bf16.mxu1 %v4298_v0 }
0x3c46   :  { %v2366_v37 = vpop.f32.mrf.mxu1 }
0x3c47   :  { %v2367_v43 = vadd.f32 %v4896_v18, %v2366_v37 }
0x3c48   :  { %v3932_v55 = vpop.f32.mrf.mxu1 }
0x3c49   :  { %2380 = vrot.lane.b32.xlu1 %v2367_v43, %s4301_s30  ;;  %v2372_v57 = vadd.f32 %v2367_v43, %v2324_v7 }
0x3c4a   :  { %v2369_v28 = vpop.f32.mrf.mxu1 }
0x3c4b   :  { %v3558_v59 = vmul.f32 -1.442695, %v2372_v57  ;;  %v2487_v28 = vld [vmem:[#allocation2 + $0x8] ss:$0 sm:$0xff] }
0x3c4c   :  { %v3933_v26 = vpop.f32.mrf.mxu1 }
0x3c4d   :  { %4208 = vpow2.f32 %v3558_v59  ;;  %v2486_v26 = vld [vmem:[#allocation2 + $0x7] ss:$0 sm:$0xff] }
0x3c4e   :  { %v2488_v27 = vadd.f32 %v2487_v28, %v2486_v26 }
0x3c5a   :  { %v4209_v60 = vpop.eup %4208 }
0x3c5b   :  { %v2376_v3 = vadd.f32 1.0, %v4209_v60 }
0x3c5d   :  { %4210 = vrcp.f32 %v2376_v3 }
0x3c6a   :  { %v4211_v10 = vpop.eup %4210 }
0x3c6b   :  { %v2390_v8 = vsub.f32 1.0, %v4211_v10  ;;  %v2396_v14 = vmul.f32 %v4211_v10, %v4982_v53 }
0x3cbb   :  { %v2381_v2 = vpop.permute.xlu1 %2380 }
0x3cbc   :  { %v2383_v63 = vmul.f32 %v4211_v10, %v2381_v2 }
0x3cbe   :  { %2385 = vrot.lane.b32.xlu0 %v2383_v63, %s4301_s30 }
0x3d30   :  { %v2386_v62 = vpop.permute.xlu0 %2385 }
0x3d31   :  { %v2388_v4 = vadd.f32 %v2386_v62, %v2324_v7 }
0x3d33   :  { %4212 = vtanh.f32 %v2388_v4 }
0x3d40   :  { %v4213_v5 = vpop.eup %4212 }
0x3d41   :  { %2392 = vrot.lane.b32.xlu1 %v4213_v5, %s4302_s22 }
0x3db3   :  { %v2393_v9 = vpop.permute.xlu1 %2392 }
0x3db4   :  { %v2395_v11 = vmul.f32 %v2393_v9, %v2390_v8 }
0x3db6   :  { %v4999_v1 = vadd.f32 %v2396_v14, %v2395_v11 }
0x3db8   :  { %v2407_v15 = vpack.c.bf16 %v4999_v1, %v4999_v1 }
0x3dba   :  { %2409 = vrot.lane.b32.xlu0 %v2407_v15, %s4302_s22 }
0x3e2c   :  { %v2410_v16 = vpop.permute.xlu0 %2409 }
0x3e2d   :  { %3939 = vmatmul.mubr.msk.bf16.vlgmr.msra.gmra.mxu0 %vm140_vm2, %v2410_v16 }
0x3e2e   :  { %3951 = vmatpush3.bf16.msra.mxu0 %v4250_v17  ;;  %3954 = vmatprep.mubr.msk.bf16.mxu0 %vm4299_vm0, %v4298_v0 }
0x3e2f   :  { %3952 = vmatprep.subr.bf16.mxu0 %v4298_v0 }
0x3e32   :  { %3953 = vmatpush3.bf16.msra.mxu0 %v4251_v23  ;;  %v4252_v23 = vld [vmem:[%s5262_s13] ss:$0 sm:$0xff] }
0x3eed   :  { %v2448_v21 = vpop.f32.mrf.mxu0 }
0x3eee   :  { %v2449_v19 = vadd.f32 %v4896_v18, %v2448_v21 }
0x3eef   :  { %v3940_v6 = vpop.f32.mrf.mxu0 }
0x3ef0   :  { %2462 = vrot.lane.b32.xlu1 %v2449_v19, %s4301_s30  ;;  %v2454_v24 = vadd.f32 %v2449_v19, %v2406_v22 }
0x3ef1   :  { %v2451_v61 = vpop.f32.mrf.mxu0 }
0x3ef2   :  { %v3560_v25 = vmul.f32 -1.442695, %v2454_v24  ;;  %v4034_v24 = vld [vmem:[%s5263_s14 + $0x34] ss:$8 sps:$4 sm:$0xff]  }
0x3ef3   :  { %v3941_v20 = vpop.f32.mrf.mxu0  ;;  %2745 = vmatprep.subr.bf16.mxu0 %v4034_v24  ;;  %v4055_v24 = vld [vmem:[%s5263_s14 + $0x44] ss:$8 sps:$4 sm:$0xff]  }
0x3ef4   :  { %4214 = vpow2.f32 %v3560_v25  ;;  %v4037_v25 = vld [vmem:[%s5263_s14 + $0x24] ss:$8 sps:$4 sm:$0xff]  }
0x3f01   :  { %v4215_v29 = vpop.eup %4214 }
0x3f02   :  { %v2458_v30 = vadd.f32 1.0, %v4215_v29  ;;  %v4035_v29 = vld [vmem:[%s5263_s14 + $0x20] ss:$8 sps:$4 sm:$0xff]  }
0x3f04   :  { %4216 = vrcp.f32 %v2458_v30  ;;  %v4040_v30 = vld [vmem:[%s5263_s14 + $0x14] ss:$8 sps:$4 sm:$0xff]  }
0x3f11   :  { %v4217_v32 = vpop.eup %4216 }
0x3f12   :  { %v2472_v46 = vsub.f32 1.0, %v4217_v32  ;;  %v2478_v48 = vmul.f32 %v4217_v32, %v4999_v1 }
0x3f62   :  { %v2463_v34 = vpop.permute.xlu1 %2462 }
0x3f63   :  { %v2465_v36 = vmul.f32 %v4217_v32, %v2463_v34  ;;  %v4038_v34 = vld [vmem:[%s5263_s14 + $0x10] ss:$8 sps:$4 sm:$0xff]  }
0x3f65   :  { %2467 = vrot.lane.b32.xlu0 %v2465_v36, %s4301_s30 }
0x3fd7   :  { %v2468_v38 = vpop.permute.xlu0 %2467 }
0x3fd8   :  { %v2470_v42 = vadd.f32 %v2468_v38, %v2406_v22  ;;  %v4032_v22 = vld [vmem:[%s5263_s14 + $0x30] ss:$8 sps:$4 sm:$0xff]  }
0x3fda   :  { %4218 = vtanh.f32 %v2470_v42 }
0x3fe7   :  { %v4219_v45 = vpop.eup %4218 }
0x3fe8   :  { %2474 = vrot.lane.b32.xlu1 %v4219_v45, %s4302_s22  ;;  %v2625_v45 = vld [vmem:[#allocation4] sm:$0xff] }
0x405a   :  { %v2475_v47 = vpop.permute.xlu1 %2474 }
0x405b   :  { %v2477_v33 = vmul.f32 %v2475_v47, %v2472_v46 }
0x405d   :  { %v2479_v49 = vadd.f32 %v2478_v48, %v2477_v33  ;;  %v5083_v48 = vpack.c.bf16 %v2625_v45, %v2625_v45  ;;  %v4043_v33 = vld [vmem:[%s5263_s14 + $0x4] ss:$8 sps:$4 sm:$0xff]  }
0x405f   :  { %v2489_v50 = vpack.c.bf16 %v2479_v49, %v2479_v49 }
0x4061   :  { %2491 = vrot.lane.b32.xlu0 %v2489_v50, %s4302_s22  ;;  %v2628_v50 = vsel %vm2627_vm6, %v2625_v45, 0.0  ;;  %v3602_v45 = vld [vmem:[%s5265_s16 + $0x1] ss:$0 sm:$0xff] }
0x40d3   :  { %v2492_v52 = vpop.permute.xlu0 %2491 }
0x40d4   :  { %3947 = vmatmul.mubr.msk.bf16.vlgmr.msra.gmra.mxu1 %vm140_vm2, %v2492_v52 }
0x40d5   :  { %3960 = vmatprep.mubr.msk.bf16.mxu1 %vm4299_vm0, %v4298_v0 }
0x4194   :  { %v2530_v51 = vpop.f32.mrf.mxu1 }
0x4195   :  { %v2531_v41 = vadd.f32 %v4896_v18, %v2530_v51 }
0x4196   :  { %v3948_v37 = vpop.f32.mrf.mxu1 }
0x4197   :  { %2544 = vrot.lane.b32.xlu1 %v2531_v41, %s4301_s30  ;;  %v2536_v56 = vadd.f32 %v2531_v41, %v2488_v27 }
0x4198   :  { %v2533_v43 = vpop.f32.mrf.mxu1 }
0x4199   :  { %v3562_v7 = vmul.f32 -1.442695, %v2536_v56 }
0x419a   :  { %v3949_v55 = vpop.f32.mrf.mxu1 }
0x419b   :  { %4220 = vpow2.f32 %v3562_v7 }
0x41a8   :  { %v4221_v57 = vpop.eup %4220 }
0x41a9   :  { %v2540_v59 = vadd.f32 1.0, %v4221_v57 }
0x41ab   :  { %4222 = vrcp.f32 %v2540_v59 }
0x41b8   :  { %v4223_v60 = vpop.eup %4222 }
0x41b9   :  { %v2560_v5 = vmul.f32 %v4223_v60, %v2479_v49 }
0x4209   :  { %v2545_v3 = vpop.permute.xlu1 %2544 }
0x420a   :  { %v2547_v10 = vmul.f32 %v4223_v60, %v2545_v3  ;;  %v3575_v3 = vld [vmem:[%s5266_s17] ss:$0 sm:$0xff] }
0x420c   :  { %2549 = vrot.lane.b32.xlu0 %v2547_v10, %s4301_s30 }
0x4210   :  { %1989 = vrot.lane.b32.xlu0 %v4914_v58, %s4302_s22 }
0x4214   :  { %2153 = vrot.lane.b32.xlu0 %v4948_v54, %s4302_s22 }
0x4218   :  { %2317 = vrot.lane.b32.xlu0 %v4982_v53, %s4302_s22  ;;  %v2554_v53 = vsub.f32 1.0, %v4223_v60 }
0x421c   :  { %2481 = vrot.lane.b32.xlu0 %v2479_v49, %s4302_s22  ;;  %v4041_v49 = vld [vmem:[%s5263_s14] ss:$8 sps:$4 sm:$0xff]  }
0x427e   :  { %v2550_v18 = vpop.permute.xlu0 %2549 }
0x427f   :  { %v2552_v2 = vadd.f32 %v2550_v18, %v2488_v27  ;;  %v3577_v27 = vld [vmem:[%s5265_s16] ss:$0 sm:$0xff] }
0x4281   :  { %4224 = vtanh.f32 %v2552_v2  ;;  %v3576_v2 = vld [vmem:[%s5264_s15] ss:$0 sm:$0xff] }
0x4282   :  { %v1990_v63 = vpop.permute.xlu0 %1989 }
0x4283   :  { %1992 = vst.msk [vmem:[#allocation3] sm:$0x1] %vm352_vm3, %v1990_v63 }
0x4284   :  { %1993 = vst.msk [vmem:[#allocation3 + $0x7] sm:$0x1] %vm354_vm4, %v1990_v63 }
0x4286   :  { %v2154_v62 = vpop.permute.xlu0 %2153 }
0x4287   :  { %2156 = vst.msk [vmem:[#allocation3 + $0x2] sm:$0x1] %vm352_vm3, %v2154_v62 }
0x4288   :  { %2157 = vst.msk [vmem:[#allocation3 + $0x5] sm:$0x1] %vm354_vm4, %v2154_v62 }
0x428a   :  { %v2318_v54 = vpop.permute.xlu0 %2317 }
0x428e   :  { %v4225_v58 = vpop.eup %4224  ;;  %v2482_v11 = vpop.permute.xlu0 %2481 }
0x428f   :  { %2556 = vrot.lane.b32.xlu1 %v4225_v58, %s4302_s22 }
0x4293   :  { %2071 = vrot.lane.b32.xlu1 %v4931_v35, %s4302_s22 }
0x4297   :  { %2235 = vrot.lane.b32.xlu1 %v4965_v13, %s4302_s22 }
0x429b   :  { %2399 = vrot.lane.b32.xlu1 %v4999_v1, %s4302_s22 }
0x4301   :  { %v2557_v4 = vpop.permute.xlu1 %2556 }
0x4302   :  { %v2559_v8 = vmul.f32 %v2557_v4, %v2554_v53 }
0x4304   :  { %v2561_v9 = vadd.f32 %v2560_v5, %v2559_v8 }
0x4305   :  { %v2072_v14 = vpop.permute.xlu1 %2071 }
0x4306   :  { %2074 = vst.msk [vmem:[#allocation3 + $0x1] sm:$0x1] %vm352_vm3, %v2072_v14  ;;  %2563 = vrot.lane.b32.xlu1 %v2561_v9, %s4302_s22 }
0x4307   :  { %2075 = vst.msk [vmem:[#allocation3 + $0x6] sm:$0x1] %vm354_vm4, %v2072_v14  ;;  %2485 = vst.msk [vmem:[#allocation3 + $0x1] sm:$0x1] %vm354_vm4, %v2482_v11 }
0x4308   :  { %2484 = vst.msk [vmem:[#allocation3 + $0x6] sm:$0x1] %vm352_vm3, %v2482_v11 }
0x4309   :  { %v2236_v35 = vpop.permute.xlu1 %2235 }
0x430a   :  { %2238 = vst.msk [vmem:[#allocation3 + $0x3] sm:$0x1] %vm352_vm3, %v2236_v35 }
0x430b   :  { %2239 = vst.msk [vmem:[#allocation3 + $0x4] sm:$0x1] %vm354_vm4, %v2236_v35  ;;  %2321 = vst.msk [vmem:[#allocation3 + $0x3] sm:$0x1] %vm354_vm4, %v2318_v54 }
0x430c   :  { %2320 = vst.msk [vmem:[#allocation3 + $0x4] sm:$0x1] %vm352_vm3, %v2318_v54 }
0x430d   :  { %v2400_v13 = vpop.permute.xlu1 %2399 }
0x430e   :  { %2402 = vst.msk [vmem:[#allocation3 + $0x5] sm:$0x1] %vm352_vm3, %v2400_v13 }
0x430f   :  { %2403 = vst.msk [vmem:[#allocation3 + $0x2] sm:$0x1] %vm354_vm4, %v2400_v13 }
0x4378   :  { %v2564_v1 = vpop.permute.xlu1 %2563 }
0x4379   :  { %2566 = vst.msk [vmem:[#allocation3 + $0x7] sm:$0x1] %vm352_vm3, %v2564_v1 }
0x437a   :  { %2567 = vst.msk [vmem:[#allocation3] sm:$0x1] %vm354_vm4, %v2564_v1 }
0x4381   :  { %v2568_v15 = vld [vmem:[#allocation3] sm:$0xff] }
0x4382   :  { %v2569_v16 = vpack.c.bf16 %v2568_v15, %v2568_v15 }
0x4384   :  { %3955 = vmatmul.mubr.msk.bf16.vlgmr.msra.gmra.mxu0 %vm140_vm2, %v2569_v16 }
0x4385   :  { %2769 = vmatprep.mubr.bf16.mxu0 %v4300_v12  ;;  %2746 = vmatpush1.bf16.msra.mxu0 %v4032_v22  ;;  %v4050_v22 = vld [vmem:[%s5263_s14 + $0x50] ss:$8 sps:$4 sm:$0xff]  }
0x4386   :  { %2747 = vmatprep.subr.bf16.mxu0 %v4037_v25  ;;  %v4053_v25 = vld [vmem:[%s5263_s14 + $0x40] ss:$8 sps:$4 sm:$0xff]  }
0x4389   :  { %2748 = vmatpush1.bf16.msra.mxu0 %v4035_v29 }
0x438a   :  { %2749 = vmatprep.subr.bf16.mxu0 %v4040_v30 }
0x438d   :  { %2750 = vmatpush1.bf16.msra.mxu0 %v4038_v34 }
0x438e   :  { %2751 = vmatprep.subr.bf16.mxu0 %v4043_v33 }
0x4391   :  { %2752 = vmatpush1.bf16.msra.mxu0 %v4041_v49 }
0x4392   :  { %3970 = vmatprep.subr.bf16.mxu0 %v4298_v0 }
0x4444   :  { %v2607_v17 = vpop.f32.mrf.mxu0 }
0x4445   :  { %v2608_v21 = vadd.f32 %v4252_v23, %v2607_v17 }
0x4446   :  { %v3956_v19 = vpop.f32.mrf.mxu0 }
0x4447   :  { %2621 = vrot.lane.b32.xlu0 %v2608_v21, %s4302_s22  ;;  %v3564_v20 = vmul.f32 -1.442695, %v2608_v21 }
0x4448   :  { %v2610_v6 = vpop.f32.mrf.mxu0 }
0x4449   :  { %4226 = vpow2.f32 %v3564_v20  ;;  %v4049_v20 = vld [vmem:[%s5263_s14 + $0x64] ss:$8 sps:$4 sm:$0xff]  }
0x444a   :  { %v3957_v61 = vpop.f32.mrf.mxu0 }
0x444b   :  { %v4044_v61 = vld [vmem:[%s5263_s14 + $0x70] ss:$8 sps:$4 sm:$0xff]  }
0x4456   :  { %v4227_v44 = vpop.eup %4226 }
0x4457   :  { %v2616_v31 = vadd.f32 1.0, %v4227_v44  ;;  %v4047_v44 = vld [vmem:[%s5263_s14 + $0x60] ss:$8 sps:$4 sm:$0xff]  }
0x4459   :  { %4228 = vrcp.f32 %v2616_v31  ;;  %v4052_v31 = vld [vmem:[%s5263_s14 + $0x54] ss:$8 sps:$4 sm:$0xff]  }
0x4466   :  { %v4229_v32 = vpop.eup %4228  ;;  %2629 = vadd.xlane.f32.xlu0 %v2628_v50  ;;  %v3598_v50 = vld [vmem:[%s5266_s17 + $0x1] ss:$0 sm:$0xff] }
0x4467   :  { %v2619_v36 = vmul.f32 %v4229_v32, %v2608_v21  ;;  %v4046_v21 = vld [vmem:[%s5263_s14 + $0x74] ss:$8 sps:$4 sm:$0xff]  }
0x44b9   :  { %v2622_v38 = vpop.permute.xlu0 %2621 }
0x44ba   :  { %v2624_v42 = vmul.f32 %v2622_v38, %v2619_v36 }
0x44bc   :  { %v2631_v46 = vpack.c.bf16 %v2624_v42, %v2624_v42 }
0x44be   :  { %2681 = vrot.lane.b32.xlu1 %v2631_v46, %s4303_s24  ;;  %v2637_v47 = vsel %vm2635_vm5, %v2631_v46, 0 }
0x44bf   :  { %3959 = vmatpush3.bf16.msra.mxu1 %v2637_v47 }
0x44c0   :  { %3964 = vmatprep.subr.bf16.mxu1 %v4298_v0 }
0x44c2   :  { %3961 = vmatmul.mubr.msk.bf16.vlgmr.msra.gmra.mxu1 %vm2627_vm6, %v5083_v48 }
0x44c3   :  { %3966 = vmatprep.mubr.msk.bf16.mxu1 %vm4299_vm0, %v4298_v0 }
0x44ef   :  { %v5106_v60 = vpop.xlane.xlu0 %2629 }
0x44f0   :  { %v2785_v10 = vmul.f32 %v3575_v3, %v5106_v60 }
0x4530   :  { %v2682_v41 = vpop.permute.xlu1 %2681 }
0x4582   :  { %v2673_v52 = vpop.f32.mrf.mxu1 }
0x4583   :  { %v2679_v51 = vpack.c.bf16 %v2673_v52, %v2673_v52  ;;  %v2984_v52 = vmul.f32 %v3598_v50, %v5106_v60 }
0x4584   :  { %v3962_v37 = vpop.f32.mrf.mxu1 }
0x4585   :  { %v2685_v43 = vsel %vm140_vm2, %v2679_v51, %v2682_v41  ;;  %v3600_v41 = vld [vmem:[%s5264_s15 + $0x1] ss:$0 sm:$0xff] }
0x4586   :  { %v2676_v55 = vpop.f32.mrf.mxu1  ;;  %3574 = vmatmul.mubr.msk.bf16.vlgmr.msra.gmra.mxu0 %vm2734_vm7, %v2685_v43 }
0x4587   :  { %3972 = vmatprep.mubr.msk.bf16.mxu0 %vm4299_vm0, %v4298_v0 }
0x4588   :  { %v3963_v28 = vpop.f32.mrf.mxu1 }
0x4646   :  { %v2771_v26 = vpop.f32.mrf.mxu0 }
0x4647   :  { %v2786_v18 = vadd.f32 %v2785_v10, %v2771_v26 }
0x4648   :  { %v2773_v56 = vpop.f32.mrf.mxu0 }
0x4649   :  { %v2802_v7 = vadd.f32 %v3577_v27, %v2773_v56  ;;  %v2794_v63 = vadd.f32 %v3576_v2, %v2786_v18 }
0x464a   :  { %v2775_v57 = vpop.f32.mrf.mxu0 }
0x464b   :  { %2811 = vrot.lane.b32.xlu1 %v2802_v7, %s4301_s30  ;;  %v2803_v62 = vadd.f32 %v2802_v7, %v2794_v63 }
0x464c   :  { %v2776_v59 = vpop.f32.mrf.mxu0 }
0x464d   :  { %v3578_v58 = vmul.f32 -1.442695, %v2803_v62 }
0x464f   :  { %4230 = vpow2.f32 %v3578_v58 }
0x465c   :  { %v4231_v54 = vpop.eup %4230 }
0x465d   :  { %v2807_v53 = vadd.f32 1.0, %v4231_v54  ;;  %v4058_v54 = vld [vmem:[%s5263_s14 + $0xb4] ss:$8 sps:$4 sm:$0xff]  }
0x465f   :  { %4232 = vrcp.f32 %v2807_v53 }
0x466c   :  { %v4233_v4 = vpop.eup %4232 }
0x466d   :  { %v2821_v13 = vsub.f32 1.0, %v4233_v4 }
0x46bd   :  { %v2812_v5 = vpop.permute.xlu1 %2811 }
0x46be   :  { %v2814_v8 = vmul.f32 %v4233_v4, %v2812_v5  ;;  %v4056_v5 = vld [vmem:[%s5263_s14 + $0xb0] ss:$8 sps:$4 sm:$0xff]  }
0x46c0   :  { %2816 = vrot.lane.b32.xlu1 %v2814_v8, %s4301_s30  ;;  %v4061_v8 = vld [vmem:[%s5263_s14 + $0xa4] ss:$8 sps:$4 sm:$0xff]  }
0x4732   :  { %v2817_v9 = vpop.permute.xlu1 %2816 }
0x4733   :  { %v2819_v14 = vadd.f32 %v2817_v9, %v2794_v63  ;;  %v4059_v9 = vld [vmem:[%s5263_s14 + $0xa0] ss:$8 sps:$4 sm:$0xff]  }
0x4735   :  { %4234 = vtanh.f32 %v2819_v14  ;;  %v4064_v14 = vld [vmem:[%s5263_s14 + $0x94] ss:$8 sps:$4 sm:$0xff]  }
0x4742   :  { %v4235_v11 = vpop.eup %4234 }
0x4743   :  { %2823 = vrot.lane.b32.xlu1 %v4235_v11, %s4302_s22  ;;  %v4062_v11 = vld [vmem:[%s5263_s14 + $0x90] ss:$8 sps:$4 sm:$0xff]  }
0x4747   :  { %2828 = vrot.lane.b32.xlu1 %v2624_v42, %s4303_s24  ;;  %s4273_s24 = scalar_lea.vmem %s3457_s23, 32 }
0x4748   :  { %p4274_p5 = scmp.ne.s32.totalorder %s3457_s23, %s4273_s24  ;;  %p4279_p7 = scmp.lt.s32.totalorder %s4273_s24, %s4273_s24 }
0x474a   :  { %p4280_p8 = por %p4279_p7, %p4278_p6 }
0x474c   :  { %p4281_p9 = pnand %p4280_p8, %p4274_p5 }
0x47b5   :  { %v2824_v35 = vpop.permute.xlu1 %2823 }
0x47b6   :  { %v2826_v15 = vmul.f32 %v2824_v35, %v2821_v13 }
0x47b9   :  { %v2829_v1 = vpop.permute.xlu1 %2828 }
0x47ba   :  { %v2831_v16 = vmul.f32 %v4233_v4, %v2829_v1 }
0x47bc   :  { %v2832_v17 = vadd.f32 %v2831_v16, %v2826_v15 }
0x47be   :  { %v2833_v23 = vpack.c.bf16 %v2832_v17, %v2832_v17 }
0x47c0   :  { %2835 = vrot.lane.b32.xlu1 %v2833_v23, %s4302_s22 }
0x4832   :  { %v2836_v19 = vpop.permute.xlu1 %2835 }
0x4833   :  { %v2838_v6 = vsel %vm2635_vm5, %v2836_v19, 0 }
0x4834   :  { %3965 = vmatpush3.bf16.msra.mxu1 %v2838_v6 }
0x4835   :  { %2943 = vmatprep.subr.bf16.mxu1 %v4046_v21  ;;  %v3627_v21 = vld [vmem:[%s5265_s16 + $0x2] ss:$0 sm:$0xff] }
0x4837   :  { %3967 = vmatmul.mubr.msk.bf16.vlgmr.msra.gmra.mxu1 %vm2627_vm6, %v5083_v48 }
0x4838   :  { %2944 = vmatpush1.bf16.msra.mxu1 %v4044_v61  ;;  %2967 = vmatprep.mubr.bf16.mxu1 %v4300_v12 }
0x4839   :  { %2945 = vmatprep.subr.bf16.mxu1 %v4049_v20 }
0x483c   :  { %2946 = vmatpush1.bf16.msra.mxu1 %v4047_v44  ;;  %v3623_v44 = vld [vmem:[%s5266_s17 + $0x2] ss:$0 sm:$0xff]  ;;  %s5278_s17 = sld [smem:[#allocation13_spill]] }
0x483d   :  { %2947 = vmatprep.subr.bf16.mxu1 %v4052_v31  ;;  %v3181_v31 = vmul.f32 %v3623_v44, %v5106_v60 }
0x4840   :  { %2948 = vmatpush1.bf16.msra.mxu1 %v4050_v22 }
0x4841   :  { %2949 = vmatprep.subr.bf16.mxu1 %v4055_v24  ;;  %v3625_v24 = vld [vmem:[%s5264_s15 + $0x2] ss:$0 sm:$0xff] }
0x4844   :  { %2950 = vmatpush1.bf16.msra.mxu1 %v4053_v25 }
0x4845   :  { %3981 = vmatprep.subr.bf16.mxu1 %v4298_v0 }
0x48f7   :  { %v2874_v29 = vpop.f32.mrf.mxu1 }
0x48f8   :  { %v2880_v30 = vpack.c.bf16 %v2874_v29, %v2874_v29 }
0x48f9   :  { %v3968_v32 = vpop.f32.mrf.mxu1 }
0x48fa   :  { %v2883_v34 = vsel %vm140_vm2, %v2880_v30, %v2833_v23 }
0x48fb   :  { %v2877_v36 = vpop.f32.mrf.mxu1  ;;  %3596 = vmatmul.mubr.msk.bf16.vlgmr.msra.gmra.mxu1 %vm2734_vm7, %v2883_v34 }
0x48fc   :  { %3989 = vmatprep.mubr.msk.bf16.mxu1 %vm4299_vm0, %v4298_v0 }
0x48fd   :  { %v3969_v38 = vpop.f32.mrf.mxu1 }
0x49bb   :  { %v2969_v42 = vpop.f32.mrf.mxu1 }
0x49bc   :  { %v2985_v51 = vadd.f32 %v2984_v52, %v2969_v42 }
0x49bd   :  { %v2971_v46 = vpop.f32.mrf.mxu1 }
0x49be   :  { %v3003_v47 = vadd.f32 %v3602_v45, %v2971_v46  ;;  %v2994_v37 = vadd.f32 %v3600_v41, %v2985_v51  ;;  %v3228_v51 = vld [vmem:[%s5278_s17] sm:$0xff] }
0x49bf   :  { %v2973_v33 = vpop.f32.mrf.mxu1  ;;  %v3629_v41 = vld [vmem:[%s5279_s4] ss:$0 sm:$0xff] }
0x49c0   :  { %3012 = vrot.lane.b32.xlu1 %v3003_v47, %s4301_s30  ;;  %v3004_v43 = vadd.f32 %v3003_v47, %v2994_v37  ;;  %vm3235_vm8 = vcmp.eq.s32.totalorder %v4488_v40, %v3629_v41  ;;  %v4068_v40 = vld [vmem:[%s5267_s18 + $0x18] sm:$0xff]  }
0x49c1   :  { %v2974_v49 = vpop.f32.mrf.mxu1  ;;  %3982 = vmatpush3.bf16.msra.mxu1 %v4068_v40 }
0x49c2   :  { %v3603_v55 = vmul.f32 -1.442695, %v3004_v43  ;;  %v3630_v43 = vsel %vm3235_vm8, 1.0, %v4298_v0  ;;  %3983 = vmatprep.subr.bf16.mxu1 %v4298_v0 }
0x49c4   :  { %4236 = vpow2.f32 %v3603_v55  ;;  %v3247_v55 = vsel %vm3246_vm9, %v3630_v43, 0.0 }
0x49d1   :  { %v4237_v28 = vpop.eup %4236 }
0x49d2   :  { %v3008_v26 = vadd.f32 1.0, %v4237_v28 }
0x49d4   :  { %4238 = vrcp.f32 %v3008_v26  ;;  %v3239_v26 = vand.u32 127, %v183_v39  ;;  %v4070_v39 = vld [vmem:[%s5267_s18 + $0x8] sm:$0xff]  }
0x49e1   :  { %v4239_v27 = vpop.eup %4238 }
0x49e2   :  { %v3022_v10 = vsub.f32 1.0, %v4239_v27  ;;  %v3028_v2 = vmul.f32 %v4239_v27, %v2832_v17 }
0x4a32   :  { %v3013_v56 = vpop.permute.xlu1 %3012 }
0x4a33   :  { %v3015_v7 = vmul.f32 %v4239_v27, %v3013_v56 }
0x4a35   :  { %3017 = vrot.lane.b32.xlu1 %v3015_v7, %s4301_s30 }
0x4aa7   :  { %v3018_v57 = vpop.permute.xlu1 %3017 }
0x4aa8   :  { %v3020_v59 = vadd.f32 %v3018_v57, %v2994_v37  ;;  %v4304_v37 = vmov 1  }
0x4aa9   :  { %4004 = vset.pattern.permute.xlu0 %v4304_v37 }
0x4aaa   :  { %4240 = vtanh.f32 %v3020_v59  ;;  %v4069_v59 = vld [vmem:[%s5267_s18 + $0x10] sm:$0xff]  }
0x4aab   :  { %3984 = vmatpush3.bf16.msra.mxu1 %v4069_v59 }
0x4aac   :  { %3985 = vmatprep.subr.bf16.mxu1 %v4298_v0 }
0x4aaf   :  { %3986 = vmatpush3.bf16.msra.mxu1 %v4070_v39 }
0x4ab0   :  { %3987 = vmatprep.subr.bf16.mxu1 %v4298_v0 }
0x4ab7   :  { %v4241_v3 = vpop.eup %4240 }
0x4ab8   :  { %3024 = vrot.lane.b32.xlu1 %v4241_v3, %s4302_s22  ;;  %v4071_v3 = vld [vmem:[%s5267_s18] sm:$0xff]  }
0x4ab9   :  { %3988 = vmatpush3.bf16.msra.mxu1 %v4071_v3 }
0x4b2a   :  { %v3025_v18 = vpop.permute.xlu1 %3024 }
0x4b2b   :  { %v3027_v63 = vmul.f32 %v3025_v18, %v3022_v10 }
0x4b2d   :  { %v3029_v62 = vadd.f32 %v3028_v2, %v3027_v63 }
0x4b2f   :  { %v3030_v58 = vpack.c.bf16 %v3029_v62, %v3029_v62 }
0x4b31   :  { %3032 = vrot.lane.b32.xlu0 %v3030_v58, %s4302_s22 }
0x4b50   :  { %3248 = vadd.xlane.f32.xlu0 %v3247_v55 }
0x4ba3   :  { %v3033_v53 = vpop.permute.xlu0 %3032 }
0x4ba4   :  { %v3035_v4 = vsel %vm2635_vm5, %v3033_v53, 0 }
0x4ba5   :  { %3971 = vmatpush3.bf16.msra.mxu0 %v3035_v4 }
0x4ba6   :  { %3140 = vmatprep.subr.bf16.mxu0 %v4058_v54 }
0x4ba8   :  { %3973 = vmatmul.mubr.msk.bf16.vlgmr.msra.gmra.mxu0 %vm2627_vm6, %v5083_v48  ;;  %v4067_v48 = vld [vmem:[%s5263_s14 + $0x84] ss:$8 sps:$4 sm:$0xff]  }
0x4ba9   :  { %3141 = vmatpush1.bf16.msra.mxu0 %v4056_v5  ;;  %3164 = vmatprep.mubr.bf16.mxu0 %v4300_v12  ;;  %v4065_v12 = vld [vmem:[%s5263_s14 + $0x80] ss:$8 sps:$4 sm:$0xff]  }
0x4baa   :  { %3142 = vmatprep.subr.bf16.mxu0 %v4061_v8 }
0x4bad   :  { %3143 = vmatpush1.bf16.msra.mxu0 %v4059_v9 }
0x4bae   :  { %3144 = vmatprep.subr.bf16.mxu0 %v4064_v14 }
0x4bb1   :  { %3145 = vmatpush1.bf16.msra.mxu0 %v4062_v11 }
0x4bb2   :  { %3146 = vmatprep.subr.bf16.mxu0 %v4067_v48 }
0x4bb5   :  { %3147 = vmatpush1.bf16.msra.mxu0 %v4065_v12 }
0x4bb6   :  { %3976 = vmatprep.subr.mxu0 %v4298_v0 }
0x4bd9   :  { %v3249_v5 = vpop.xlane.xlu0 %3248 }
0x4bda   :  { %v3250_v9 = vmax.f32 %v3249_v5, 1.0  ;;  %vm3361_vm13 = vcmp.gt.f32.partialorder %v3249_v5, 0.0 }
0x4c68   :  { %v3071_v35 = vpop.f32.mrf.mxu0 }
0x4c69   :  { %v3077_v13 = vpack.c.bf16 %v3071_v35, %v3071_v35 }
0x4c6a   :  { %v3974_v1 = vpop.f32.mrf.mxu0 }
0x4c6b   :  { %v3080_v15 = vsel %vm140_vm2, %v3077_v13, %v3030_v58 }
0x4c6c   :  { %v3074_v16 = vpop.f32.mrf.mxu0  ;;  %3621 = vmatmul.mubr.msk.bf16.vlgmr.msra.gmra.mxu0 %vm2734_vm7, %v3080_v15 }
0x4c6d   :  { %3978 = vmatprep.mubr.msk.f32.mxu0 %vm4299_vm0, %v4298_v0 }
0x4c6e   :  { %v3975_v17 = vpop.f32.mrf.mxu0 }
0x4d2c   :  { %v3166_v23 = vpop.f32.mrf.mxu0 }
0x4d2d   :  { %v3182_v22 = vadd.f32 %v3181_v31, %v3166_v23 }
0x4d2e   :  { %v3168_v19 = vpop.f32.mrf.mxu0 }
0x4d2f   :  { %v3200_v6 = vadd.f32 %v3627_v21, %v3168_v19  ;;  %v3191_v25 = vadd.f32 %v3625_v24, %v3182_v22 }
0x4d30   :  { %v3170_v61 = vpop.f32.mrf.mxu0 }
0x4d31   :  { %3209 = vrot.lane.b32.xlu1 %v3200_v6, %s4301_s30  ;;  %v3201_v29 = vadd.f32 %v3200_v6, %v3191_v25 }
0x4d32   :  { %v3171_v20 = vpop.f32.mrf.mxu0 }
0x4d33   :  { %v3628_v30 = vmul.f32 -1.442695, %v3201_v29  ;;  %v3634_v20 = vld [vmem:[%s5268_s19] ss:$0 sm:$0xff] }
0x4d35   :  { %4242 = vpow2.f32 %v3628_v30 }
0x4d42   :  { %v4243_v32 = vpop.eup %4242 }
0x4d43   :  { %v3205_v34 = vadd.f32 1.0, %v4243_v32 }
0x4d45   :  { %4244 = vrcp.f32 %v3205_v34 }
0x4d52   :  { %v4245_v36 = vpop.eup %4244 }
0x4d53   :  { %v3219_v47 = vsub.f32 1.0, %v4245_v36  ;;  %v3225_v49 = vmul.f32 %v4245_v36, %v3029_v62 }
0x4da3   :  { %v3210_v38 = vpop.permute.xlu1 %3209 }
0x4da4   :  { %v3212_v42 = vmul.f32 %v4245_v36, %v3210_v38 }
0x4da6   :  { %3214 = vrot.lane.b32.xlu1 %v3212_v42, %s4301_s30 }
0x4e18   :  { %v3215_v45 = vpop.permute.xlu1 %3214 }
0x4e19   :  { %v3217_v46 = vadd.f32 %v3215_v45, %v3191_v25 }
0x4e1b   :  { %4246 = vtanh.f32 %v3217_v46 }
0x4e1c   :  { %4248 = vrcp.f32 %v3250_v9 }
0x4e28   :  { %v4247_v60 = vpop.eup %4246 }
0x4e29   :  { %3221 = vrot.lane.b32.xlu1 %v4247_v60, %s4302_s22  ;;  %v4249_v15 = vpop.eup %4248 }
0x4e9b   :  { %v3222_v33 = vpop.permute.xlu1 %3221 }
0x4e9c   :  { %v3224_v50 = vmul.f32 %v3222_v33, %v3219_v47 }
0x4e9e   :  { %v3226_v52 = vadd.f32 %v3225_v49, %v3224_v50 }
0x4ea0   :  { %3254 = vrot.lane.b32.xlu1 %v3226_v52, %s4302_s22 }
0x4ea4   :  { %3241 = vperm.xlu1 %4002, %v3228_v51  }
0x4f12   :  { %v3255_v28 = vpop.permute.xlu1 %3254 }
0x4f13   :  { %3977 = vmatpush3.msra.mxu0 %v3255_v28 }
0x4f14   :  { %3979 = vmatmul.mubr.msk.f32.vlgmr.msra.gmra.mxu0 %vm2627_vm6, %v3630_v43 }
0x4f1f   :  { %v3242_v27 = vpop.permute.xlu1 %3241 }
0x4f20   :  { %vm3243_vm10 = vcmp.eq.s32.totalorder %v3239_v26, %v3242_v27 }
0x4f21   :  { %v3631_v56 = vsel %vm3243_vm10, 1.0, %v4298_v0 }
0x4f22   :  { %v3633_v7 = vadd.f32 -1.0, %v3631_v56 }
0x4f24   :  { %v3332_v57 = vmul.f32 1e+30, %v3633_v7 }
0x4f26   :  { %3335 = vperm.xlu1 %4002, %v3332_v57  }
0x4f2a   :  { %4003 = vset.pattern.permute.xlu1 %v4304_v37 }
0x4f2b   :  { %3348 = vperm.xlu1 %4003, %v3332_v57  }
0x4fa1   :  { %v3336_v10 = vpop.permute.xlu1 %3335 }
0x4fa2   :  { %v3338_v63 = vadd.f32 %v3336_v10, %v3226_v52 }
0x4fa4   :  { %v3340_v58 = vsel %vm3339_vm11, %v3338_v63, -inf }
0x4fa5   :  { %v3341_v53 = vrot.slane %v3340_v58, 4 }
0x4fa6   :  { %v3349_v18 = vpop.permute.xlu1 %3348 }
0x4fa7   :  { %v3351_v2 = vadd.f32 %v3349_v18, %v3226_v52  ;;  %v3342_v8 = vmax.f32 %v3340_v58, %v3341_v53 }
0x4fa9   :  { %v3352_v62 = vsel %vm3339_vm11, %v3351_v2, -inf  ;;  %v3343_v0 = vrot.slane %v3342_v8, 2 }
0x4faa   :  { %v3353_v54 = vrot.slane %v3352_v62, 4 }
0x4fab   :  { %v3344_v48 = vmax.f32 %v3342_v8, %v3343_v0 }
0x4fac   :  { %v3354_v4 = vmax.f32 %v3352_v62, %v3353_v54 }
0x4fad   :  { %v3345_v35 = vrot.slane %v3344_v48, 1 }
0x4fae   :  { %v3355_v14 = vrot.slane %v3354_v4, 2 }
0x4faf   :  { %v3346_v1 = vmax.f32 %v3344_v48, %v3345_v35 }
0x4fb0   :  { %v3356_v11 = vmax.f32 %v3354_v4, %v3355_v14 }
0x4fb2   :  { %v3357_v12 = vrot.slane %v3356_v11, 1 }
0x4fb4   :  { %v3358_v13 = vmax.f32 %v3356_v11, %v3357_v12 }
0x4fb6   :  { %v3360_v16 = vsel %vm3359_vm12, %v3346_v1, %v3358_v13 }
0x4fb7   :  { %v3364_v21 = vsel %vm3361_vm13, %v3360_v16, 0.0 }
0x4fd4   :  { %v3326_v17 = vpop.f32.mrf.mxu0 }
0x4fd5   :  { %v3330_v23 = vmul.f32 %v4249_v15, %v3326_v17 }
0x4fd6   :  { %v3980_v19 = vpop.f32.mrf.mxu0 }
0x4fd7   :  { %v3365_v6 = vsel %vm140_vm2, %v3330_v23, %v3364_v21 }
0x4fd8   :  { %v3366_v61 = vpack.c.bf16 %v3365_v6, %v3365_v6 }
0x4fda   :  { %3990 = vmatmul.mubr.msk.bf16.vlgmr.msra.gmra.mxu1 %vm2734_vm7, %v3366_v61 }
0x509a   :  { %v3443_v44 = vpop.f32.mrf.mxu1 }
0x509b   :  { %v3444_v31 = vadd.f32 %v3634_v20, %v3443_v44 }
0x509c   :  { %v3991_v22 = vpop.f32.mrf.mxu1 }
0x509d   :  { %3449 = vst.msk [vmem:[#allocation7] sm:$0x3] %vm3246_vm9, %v3444_v31 }
0x509e   :  { %v3446_v24 = vpop.f32.mrf.mxu1 }
0x509f   :  { %4284 = shalt.err (!%p4281_p9)
}
0x50a0   :  { %3459 = dma.vmem_to_hbm [thread:$0]  %s3457_s23, 32, %s5269_s20, [#allocation6]   ;;  %v3992_v25 = vpop.f32.mrf.mxu1 }
0x50a1   :  { %4295 = dma.done.wait [#allocation6], 32  }
0x50a2   :  { %4296 = vsyncadd [#allocation6], 4294967264 }
0x50a3   :  { %3463 = vsyncpa [#allocation5], 1 }
0x50a4   :  { %3464 = vsyncpa [#allocation6], 1 }

</bundles_post_ra>
